<compile_context>
chip_gen: v5e
topology: v5e:2x2
jax: 0.10.0
libtpu: 0.0.40
codegen_flags: <defaults>
</compile_context>

<pallas_src>
import jax
import jax.numpy as jnp
from jax.experimental import pallas as pl
from jax.experimental.pallas import tpu as pltpu

_EPS = 1e-5
_LANE = 128


def _round_up(x, m):
    return (x + m - 1) // m * m


# --------------------------- Pallas kernels ---------------------------------

def _conv_stats_kernel(xpad_ref, w_ref, y_ref, st_ref):
    """conv3x3 as a single im2col GEMM + per-image (sum, sum^2) channel stats.

    xpad_ref: (1, H+2, W+2, Cp) f32   w_ref: (9*Cp, Cp) compute dtype
    y_ref:    (1, H, W, Cp)  f32      st_ref: (1, 2, Cp) f32
    """
    _, Hp, Wp, Cp = xpad_ref.shape
    H, W = Hp - 2, Wp - 2
    # im2col: concatenate the 9 shifted windows once -> one lane-dense GEMM.
    cols = [xpad_ref[:, kh:kh + H, kw:kw + W, :].reshape(H * W, Cp)
            for kh in range(3) for kw in range(3)]
    patches = jnp.concatenate(cols, axis=-1).astype(w_ref.dtype)   # (H*W, 9*Cp)
    y = jnp.dot(patches, w_ref[...], preferred_element_type=jnp.float32)
    y_ref[...] = y.reshape(1, H, W, Cp)
    s1 = jnp.sum(y, axis=0, keepdims=True)          # (1, Cp)
    s2 = jnp.sum(y * y, axis=0, keepdims=True)      # (1, Cp)
    st_ref[...] = jnp.concatenate([s1, s2], axis=0).reshape(1, 2, Cp)


def _bn_relu_conv_stats_kernel(y1_ref, w_ref, ab_ref, y2_ref, st_ref, zpad_ref):
    """bn1 (folded to scale/shift) + ReLU + conv3x3 (im2col GEMM) + stats.

    y1_ref: (1, H, W, Cp) f32   w_ref: (9*Cp, Cp)   ab_ref: (2, Cp) f32
    y2_ref: (1, H, W, Cp) f32   st_ref: (1, 2, Cp) f32
    zpad_ref: VMEM scratch (H+2, W+16, Cp) f32 — zero-padded, normalized
      activation; interior stored at column offset 8 so the store stays
      sublane-aligned (the conv2 halo columns are the zeros at 7 and 8+W).
    """
    _, H, W, Cp = y1_ref.shape
    scale = ab_ref[0:1, :]                                   # (1, Cp)
    shift = ab_ref[1:2, :]
    z = jnp.maximum(y1_ref[...].reshape(H * W, Cp) * scale + shift, 0.0)
    zpad_ref[...] = jnp.zeros(zpad_ref.shape, zpad_ref.dtype)
    zpad_ref[1:H + 1, 8:8 + W, :] = z.reshape(H, W, Cp)
    cols = [zpad_ref[kh:kh + H, 7 + kw:7 + kw + W, :].reshape(H * W, Cp)
            for kh in range(3) for kw in range(3)]
    patches = jnp.concatenate(cols, axis=-1).astype(w_ref.dtype)
    y2 = jnp.dot(patches, w_ref[...], preferred_element_type=jnp.float32)
    y2_ref[...] = y2.reshape(1, H, W, Cp)
    s1 = jnp.sum(y2, axis=0, keepdims=True)
    s2 = jnp.sum(y2 * y2, axis=0, keepdims=True)
    st_ref[...] = jnp.concatenate([s1, s2], axis=0).reshape(1, 2, Cp)


def _bn_add_relu_kernel(y2_ref, id_ref, ab_ref, o_ref):
    """bn2 (folded to scale/shift) + residual add + ReLU."""
    _, H, W, Cp = y2_ref.shape
    scale = ab_ref[0:1, :]
    shift = ab_ref[1:2, :]
    y = (y2_ref[...].reshape(H * W, Cp) * scale + shift
         + id_ref[...].reshape(H * W, Cp))
    o_ref[...] = jnp.maximum(y, 0.0).reshape(1, H, W, Cp)


# ----------------------------- wrapper ---------------------------------------

def _bn_affine(stats, gamma, beta, count):
    """Fold training-mode BN into y*scale + shift (one-pass sum / sum^2)."""
    s1 = jnp.sum(stats[:, 0, :], axis=0)                 # (Cp,)
    s2 = jnp.sum(stats[:, 1, :], axis=0)
    mean = s1 / count
    var = jnp.maximum(s2 / count - mean * mean, 0.0)     # biased variance
    scale = gamma * jax.lax.rsqrt(var + _EPS)
    shift = beta - mean * scale
    return jnp.stack([scale, shift], axis=0).astype(jnp.float32)   # (2, Cp)


def basic_block_forward(x_nchw, w1, g1, b1, w2, g2, b2, *,
                        compute_dtype=jnp.float32):
    """BasicBlock.forward with stride=1, downsample=None.

    x_nchw: (N, C, H, W) f32 (PyTorch layout); returns (N, C, H, W) f32.
    w1, w2: (3, 3, C, C) HWIO;  g*, b*: (C,) BN affine params.
    compute_dtype: MXU operand dtype. float32 (default) matches the module's
      numerics; jnp.bfloat16 is the recommended high-throughput setting on
      v6e/v7x (use a looser numeric tolerance in that case).
    """
    x = jnp.transpose(x_nchw, (0, 2, 3, 1)).astype(jnp.float32)    # NHWC
    N, H, W, C = x.shape
    Cp = _round_up(C, _LANE)
    Hp, Wp = H + 2, W + 2
    nhw = N * H * W

    # Lane-dense channel padding + spatial halo padding (done once at entry).
    # TODO(synk): in a full ResNet pipeline keep activations in this padded
    # NHWC layout end-to-end so the transpose/pad below happens once per net,
    # not once per block.
    x_cp = jnp.pad(x, ((0, 0), (0, 0), (0, 0), (0, Cp - C)))       # (N,H,W,Cp)
    xpad = jnp.pad(x_cp, ((0, 0), (1, 1), (1, 1), (0, 0)))         # (N,Hp,Wp,Cp)

    def prep_w(w):        # (3,3,C,C) HWIO -> (9*Cp, Cp), im2col-matched order
        wp = jnp.pad(w, ((0, 0), (0, 0), (0, Cp - C), (0, Cp - C)))
        return wp.reshape(9 * Cp, Cp).astype(compute_dtype)

    def prep_v(v):        # (C,) -> (Cp,) f32, zero padded
        return jnp.pad(v.reshape(-1).astype(jnp.float32), (0, Cp - C))

    w1m, w2m = prep_w(w1), prep_w(w2)
    g1v, b1v = prep_v(g1), prep_v(b1)
    g2v, b2v = prep_v(g2), prep_v(b2)

    act_bytes = nhw * Cp * 4
    xpad_bytes = N * Hp * Wp * Cp * 4
    w_bytes = 9 * Cp * Cp * jnp.dtype(compute_dtype).itemsize
    st_bytes = N * 2 * Cp * 4
    conv_flops = 2 * nhw * 9 * Cp * Cp
    cparams = pltpu.CompilerParams(dimension_semantics=("parallel",))

    blk_img_pad = pl.BlockSpec((1, Hp, Wp, Cp), lambda n: (n, 0, 0, 0))
    blk_img = pl.BlockSpec((1, H, W, Cp), lambda n: (n, 0, 0, 0))
    blk_w = pl.BlockSpec((9 * Cp, Cp), lambda n: (0, 0))
    blk_st = pl.BlockSpec((1, 2, Cp), lambda n: (n, 0, 0))
    blk_ab = pl.BlockSpec((2, Cp), lambda n: (0, 0))

    # ---- pass 1: conv1 + per-image (sum, sum^2) ------------------------------
    y1, st1 = pl.pallas_call(
        _conv_stats_kernel,
        grid=(N,),
        in_specs=[blk_img_pad, blk_w],
        out_specs=[blk_img, blk_st],
        out_shape=[jax.ShapeDtypeStruct((N, H, W, Cp), jnp.float32),
                   jax.ShapeDtypeStruct((N, 2, Cp), jnp.float32)],
        compiler_params=cparams,
        cost_estimate=pl.CostEstimate(
            flops=conv_flops, transcendentals=0,
            bytes_accessed=xpad_bytes + w_bytes + act_bytes + st_bytes),
    )(xpad, w1m)

    ab1 = _bn_affine(st1, g1v, b1v, nhw)

    # ---- pass 2: bn1 + relu + conv2 + per-image (sum, sum^2), fused ----------
    y2, st2 = pl.pallas_call(
        _bn_relu_conv_stats_kernel,
        grid=(N,),
        in_specs=[blk_img, blk_w, blk_ab],
        out_specs=[blk_img, blk_st],
        out_shape=[jax.ShapeDtypeStruct((N, H, W, Cp), jnp.float32),
                   jax.ShapeDtypeStruct((N, 2, Cp), jnp.float32)],
        scratch_shapes=[pltpu.VMEM((H + 2, W + 16, Cp), jnp.float32)],
        compiler_params=cparams,
        cost_estimate=pl.CostEstimate(
            flops=conv_flops + 4 * nhw * Cp, transcendentals=0,
            bytes_accessed=2 * act_bytes + w_bytes + st_bytes),
    )(y1, w2m, ab1)

    ab2 = _bn_affine(st2, g2v, b2v, nhw)

    # ---- pass 3: bn2 + residual add + relu -----------------------------------
    outp = pl.pallas_call(
        _bn_add_relu_kernel,
        grid=(N,),
        in_specs=[blk_img, blk_img, blk_ab],
        out_specs=blk_img,
        out_shape=jax.ShapeDtypeStruct((N, H, W, Cp), jnp.float32),
        compiler_params=cparams,
        cost_estimate=pl.CostEstimate(
            flops=4 * nhw * Cp, transcendentals=0,
            bytes_accessed=3 * act_bytes),
    )(y2, x_cp, ab2)

    out = outp[:, :, :, :C]                                # drop channel pad
    return jnp.transpose(out, (0, 3, 1, 2))                # back to NCHW


# ----------------------- pure-JAX reference (for checking) -------------------

def _ref_forward(x_nchw, w1, g1, b1, w2, g2, b2):
    def conv(x, w):
        return jax.lax.conv_general_dilated(
            x, w, (1, 1), 'SAME', dimension_numbers=('NHWC', 'HWIO', 'NHWC'))

    def bn(y, g, b):
        m = jnp.mean(y, axis=(0, 1, 2), keepdims=True)
        v = jnp.mean(jnp.square(y - m), axis=(0, 1, 2), keepdims=True)
        return (y - m) * g.reshape(1, 1, 1, -1) * jax.lax.rsqrt(v + _EPS) \
            + b.reshape(1, 1, 1, -1)

    x = jnp.transpose(x_nchw, (0, 2, 3, 1))
    o = jax.nn.relu(bn(conv(x, w1), g1, b1))
    o = jax.nn.relu(bn(conv(o, w2), g2, b2) + x)
    return jnp.transpose(o, (0, 3, 1, 2))


if __name__ == "__main__":
    key = jax.random.PRNGKey(0)
    k1, k2, k3 = jax.random.split(key, 3)

    N, C, H, W = 2, 8, 16, 16            # inplanes = planes = 8, stride = 1
    x = jax.random.normal(k1, (N, C, H, W), jnp.float32)

    fan_in = 9 * C
    w1 = jax.random.normal(k2, (3, 3, C, C), jnp.float32) * (2.0 / fan_in) ** 0.5
    w2 = jax.random.normal(k3, (3, 3, C, C), jnp.float32) * (2.0 / fan_in) ** 0.5
    g1 = jnp.ones((C,), jnp.float32)
    b1 = jnp.zeros((C,), jnp.float32)
    g2 = jnp.ones((C,), jnp.float32)
    b2 = jnp.zeros((C,), jnp.float32)

    fwd = jax.jit(basic_block_forward)
    out = jax.block_until_ready(fwd(x, w1, g1, b1, w2, g2, b2))

    ref = _ref_forward(x, w1, g1, b1, w2, g2, b2)
    assert out.shape == (N, C, H, W)
    err = jnp.max(jnp.abs(out - ref))
    assert jnp.allclose(out, ref, atol=1e-3, rtol=1e-3), f"max err {err}"
    print("KERNEL_OK")
</pallas_src>

<mosaic_0001>
module attributes {stable_mosaic.version = 11 : i64} {
  func.func @_conv_stats_kernel(%arg0: i32, %arg1: memref<1x18x18x128xf32, #tpu.memory_space<vmem>>, %arg2: memref<1152x128xf32, #tpu.memory_space<vmem>>, %arg3: memref<1x16x16x128xf32, #tpu.memory_space<vmem>>, %arg4: memref<1x2x128xf32, #tpu.memory_space<vmem>>) attributes {dimension_semantics = [#tpu.dimension_semantics<parallel>], iteration_bounds = array<i64: 2>, scalar_prefetch = 0 : i64, scratch_operands = 0 : i64, tpu.core_type = #tpu.core_type<tc>, window_params = [{transform_indices = @transform_0, window_bounds = array<i64: 1, 18, 18, 128>}, {pipeline_mode = #tpu.pipeline_mode<synchronous>, transform_indices = @transform_1, window_bounds = array<i64: 1152, 128>}, {transform_indices = @transform_2, window_bounds = array<i64: 1, 16, 16, 128>}, {transform_indices = @transform_3, window_bounds = array<i64: 1, 2, 128>}]} {
    %c0 = arith.constant 0 : index
    %c0_0 = arith.constant 0 : index
    %c0_1 = arith.constant 0 : index
    %c0_2 = arith.constant 0 : index
    %0 = vector.load %arg1[%c0, %c0_0, %c0_1, %c0_2] : memref<1x18x18x128xf32, #tpu.memory_space<vmem>>, vector<1x16x16x128xf32>
    %1 = vector.shape_cast %0 : vector<1x16x16x128xf32> to vector<256x128xf32>
    %c0_3 = arith.constant 0 : index
    %c0_4 = arith.constant 0 : index
    %c1 = arith.constant 1 : index
    %c0_5 = arith.constant 0 : index
    %2 = vector.load %arg1[%c0_3, %c0_4, %c1, %c0_5] : memref<1x18x18x128xf32, #tpu.memory_space<vmem>>, vector<1x16x16x128xf32>
    %3 = vector.shape_cast %2 : vector<1x16x16x128xf32> to vector<256x128xf32>
    %c0_6 = arith.constant 0 : index
    %c0_7 = arith.constant 0 : index
    %c2 = arith.constant 2 : index
    %c0_8 = arith.constant 0 : index
    %4 = vector.load %arg1[%c0_6, %c0_7, %c2, %c0_8] : memref<1x18x18x128xf32, #tpu.memory_space<vmem>>, vector<1x16x16x128xf32>
    %5 = vector.shape_cast %4 : vector<1x16x16x128xf32> to vector<256x128xf32>
    %c0_9 = arith.constant 0 : index
    %c1_10 = arith.constant 1 : index
    %c0_11 = arith.constant 0 : index
    %c0_12 = arith.constant 0 : index
    %6 = vector.load %arg1[%c0_9, %c1_10, %c0_11, %c0_12] : memref<1x18x18x128xf32, #tpu.memory_space<vmem>>, vector<1x16x16x128xf32>
    %7 = vector.shape_cast %6 : vector<1x16x16x128xf32> to vector<256x128xf32>
    %c0_13 = arith.constant 0 : index
    %c1_14 = arith.constant 1 : index
    %c1_15 = arith.constant 1 : index
    %c0_16 = arith.constant 0 : index
    %8 = vector.load %arg1[%c0_13, %c1_14, %c1_15, %c0_16] : memref<1x18x18x128xf32, #tpu.memory_space<vmem>>, vector<1x16x16x128xf32>
    %9 = vector.shape_cast %8 : vector<1x16x16x128xf32> to vector<256x128xf32>
    %c0_17 = arith.constant 0 : index
    %c1_18 = arith.constant 1 : index
    %c2_19 = arith.constant 2 : index
    %c0_20 = arith.constant 0 : index
    %10 = vector.load %arg1[%c0_17, %c1_18, %c2_19, %c0_20] : memref<1x18x18x128xf32, #tpu.memory_space<vmem>>, vector<1x16x16x128xf32>
    %11 = vector.shape_cast %10 : vector<1x16x16x128xf32> to vector<256x128xf32>
    %c0_21 = arith.constant 0 : index
    %c2_22 = arith.constant 2 : index
    %c0_23 = arith.constant 0 : index
    %c0_24 = arith.constant 0 : index
    %12 = vector.load %arg1[%c0_21, %c2_22, %c0_23, %c0_24] : memref<1x18x18x128xf32, #tpu.memory_space<vmem>>, vector<1x16x16x128xf32>
    %13 = vector.shape_cast %12 : vector<1x16x16x128xf32> to vector<256x128xf32>
    %c0_25 = arith.constant 0 : index
    %c2_26 = arith.constant 2 : index
    %c1_27 = arith.constant 1 : index
    %c0_28 = arith.constant 0 : index
    %14 = vector.load %arg1[%c0_25, %c2_26, %c1_27, %c0_28] : memref<1x18x18x128xf32, #tpu.memory_space<vmem>>, vector<1x16x16x128xf32>
    %15 = vector.shape_cast %14 : vector<1x16x16x128xf32> to vector<256x128xf32>
    %c0_29 = arith.constant 0 : index
    %c2_30 = arith.constant 2 : index
    %c2_31 = arith.constant 2 : index
    %c0_32 = arith.constant 0 : index
    %16 = vector.load %arg1[%c0_29, %c2_30, %c2_31, %c0_32] : memref<1x18x18x128xf32, #tpu.memory_space<vmem>>, vector<1x16x16x128xf32>
    %17 = vector.shape_cast %16 : vector<1x16x16x128xf32> to vector<256x128xf32>
    %18 = tpu.concatenate %1, %3, %5, %7, %9, %11, %13, %15, %17 in 1 : vector<256x128xf32>, vector<256x128xf32>, vector<256x128xf32>, vector<256x128xf32>, vector<256x128xf32>, vector<256x128xf32>, vector<256x128xf32>, vector<256x128xf32>, vector<256x128xf32> -> vector<256x1152xf32>
    %c0_33 = arith.constant 0 : index
    %c0_34 = arith.constant 0 : index
    %19 = vector.load %arg2[%c0_33, %c0_34] : memref<1152x128xf32, #tpu.memory_space<vmem>>, vector<1152x128xf32>
    %cst = arith.constant dense<0.000000e+00> : vector<256x128xf32>
    %20 = tpu.matmul %18, %19, %cst {dimension_numbers = #tpu.dot_dimension_numbers<[1], [0], [0], [1], [0, 0, 1, 1], [], []>} : vector<256x1152xf32>, vector<1152x128xf32>, vector<256x128xf32> -> vector<256x128xf32>
    %21 = vector.shape_cast %20 : vector<256x128xf32> to vector<1x16x16x128xf32>
    %c0_35 = arith.constant 0 : index
    %c0_36 = arith.constant 0 : index
    %c0_37 = arith.constant 0 : index
    %c0_38 = arith.constant 0 : index
    %22 = vector.load %arg3[%c0_35, %c0_36, %c0_37, %c0_38] : memref<1x16x16x128xf32, #tpu.memory_space<vmem>>, vector<1x16x16x128xf32>
    tpu.vector_store %arg3[%c0_35, %c0_36, %c0_37, %c0_38], %21 {strides = array<i32>} : memref<1x16x16x128xf32, #tpu.memory_space<vmem>>, vector<1x16x16x128xf32>,
    %cst_39 = arith.constant dense<0.000000e+00> : vector<128xf32>
    %23 = vector.multi_reduction <add>, %20, %cst_39 [0] : vector<256x128xf32> to vector<128xf32>
    %24 = vector.shape_cast %23 : vector<128xf32> to vector<1x128xf32>
    %25 = arith.mulf %20, %20 : vector<256x128xf32>
    %cst_40 = arith.constant dense<0.000000e+00> : vector<128xf32>
    %26 = vector.multi_reduction <add>, %25, %cst_40 [0] : vector<256x128xf32> to vector<128xf32>
    %27 = vector.shape_cast %26 : vector<128xf32> to vector<1x128xf32>
    %28 = tpu.concatenate %24, %27 in 0 : vector<1x128xf32>, vector<1x128xf32> -> vector<2x128xf32>
    %29 = vector.shape_cast %28 : vector<2x128xf32> to vector<1x2x128xf32>
    %c0_41 = arith.constant 0 : index
    %c0_42 = arith.constant 0 : index
    %c0_43 = arith.constant 0 : index
    %30 = vector.load %arg4[%c0_41, %c0_42, %c0_43] : memref<1x2x128xf32, #tpu.memory_space<vmem>>, vector<1x2x128xf32>
    tpu.vector_store %arg4[%c0_41, %c0_42, %c0_43], %29 {strides = array<i32>} : memref<1x2x128xf32, #tpu.memory_space<vmem>>, vector<1x2x128xf32>,
    return
  }
  func.func @transform_0(%arg0: i32) -> (i32, i32, i32, i32) {
    %c0_i32 = arith.constant 0 : i32
    %c0_i32_0 = arith.constant 0 : i32
    %c0_i32_1 = arith.constant 0 : i32
    %c0_i32_2 = arith.constant 0 : i32
    return %arg0, %c0_i32, %c0_i32_0, %c0_i32_1 : i32, i32, i32, i32
  }
  func.func @transform_1(%arg0: i32) -> (i32, i32) {
    %c0_i32 = arith.constant 0 : i32
    %c0_i32_0 = arith.constant 0 : i32
    %c0_i32_1 = arith.constant 0 : i32
    return %c0_i32, %c0_i32_0 : i32, i32
  }
  func.func @transform_2(%arg0: i32) -> (i32, i32, i32, i32) {
    %c0_i32 = arith.constant 0 : i32
    %c0_i32_0 = arith.constant 0 : i32
    %c0_i32_1 = arith.constant 0 : i32
    %c0_i32_2 = arith.constant 0 : i32
    return %arg0, %c0_i32, %c0_i32_0, %c0_i32_1 : i32, i32, i32, i32
  }
  func.func @transform_3(%arg0: i32) -> (i32, i32, i32) {
    %c0_i32 = arith.constant 0 : i32
    %c0_i32_0 = arith.constant 0 : i32
    %c0_i32_1 = arith.constant 0 : i32
    return %arg0, %c0_i32, %c0_i32_0 : i32, i32, i32
  }
}

module attributes {stable_mosaic.version = 11 : i64} {
  func.func @_bn_relu_conv_stats_kernel(%arg0: i32, %arg1: memref<1x16x16x128xf32, #tpu.memory_space<vmem>>, %arg2: memref<1152x128xf32, #tpu.memory_space<vmem>>, %arg3: memref<2x128xf32, #tpu.memory_space<vmem>>, %arg4: memref<1x16x16x128xf32, #tpu.memory_space<vmem>>, %arg5: memref<1x2x128xf32, #tpu.memory_space<vmem>>, %arg6: memref<18x32x128xf32, #tpu.memory_space<vmem>>) attributes {dimension_semantics = [#tpu.dimension_semantics<parallel>], iteration_bounds = array<i64: 2>, scalar_prefetch = 0 : i64, scratch_operands = 1 : i64, tpu.core_type = #tpu.core_type<tc>, window_params = [{transform_indices = @transform_0, window_bounds = array<i64: 1, 16, 16, 128>}, {pipeline_mode = #tpu.pipeline_mode<synchronous>, transform_indices = @transform_1, window_bounds = array<i64: 1152, 128>}, {pipeline_mode = #tpu.pipeline_mode<synchronous>, transform_indices = @transform_2, window_bounds = array<i64: 2, 128>}, {transform_indices = @transform_3, window_bounds = array<i64: 1, 16, 16, 128>}, {transform_indices = @transform_4, window_bounds = array<i64: 1, 2, 128>}]} {
    %c0 = arith.constant 0 : index
    %c0_0 = arith.constant 0 : index
    %0 = vector.load %arg3[%c0, %c0_0] : memref<2x128xf32, #tpu.memory_space<vmem>>, vector<1x128xf32>
    %c1 = arith.constant 1 : index
    %c0_1 = arith.constant 0 : index
    %1 = vector.load %arg3[%c1, %c0_1] : memref<2x128xf32, #tpu.memory_space<vmem>>, vector<1x128xf32>
    %c0_2 = arith.constant 0 : index
    %c0_3 = arith.constant 0 : index
    %c0_4 = arith.constant 0 : index
    %c0_5 = arith.constant 0 : index
    %2 = vector.load %arg1[%c0_2, %c0_3, %c0_4, %c0_5] : memref<1x16x16x128xf32, #tpu.memory_space<vmem>>, vector<1x16x16x128xf32>
    %3 = vector.shape_cast %2 : vector<1x16x16x128xf32> to vector<256x128xf32>
    %4 = vector.broadcast %0 : vector<1x128xf32> to vector<256x128xf32>
    %5 = arith.mulf %3, %4 : vector<256x128xf32>
    %6 = vector.broadcast %1 : vector<1x128xf32> to vector<256x128xf32>
    %7 = arith.addf %5, %6 : vector<256x128xf32>
    %cst = arith.constant 0.000000e+00 : f32
    %8 = vector.broadcast %cst : f32 to vector<256x128xf32>
    %9 = arith.maximumf %7, %8 : vector<256x128xf32>
    %cst_6 = arith.constant 0.000000e+00 : f32
    %10 = vector.broadcast %cst_6 : f32 to vector<18x32x128xf32>
    %c0_7 = arith.constant 0 : index
    %c0_8 = arith.constant 0 : index
    %c0_9 = arith.constant 0 : index
    %11 = vector.load %arg6[%c0_7, %c0_8, %c0_9] : memref<18x32x128xf32, #tpu.memory_space<vmem>>, vector<18x32x128xf32>
    tpu.vector_store %arg6[%c0_7, %c0_8, %c0_9], %10 {strides = array<i32>} : memref<18x32x128xf32, #tpu.memory_space<vmem>>, vector<18x32x128xf32>,
    %12 = vector.shape_cast %9 : vector<256x128xf32> to vector<16x16x128xf32>
    %c1_10 = arith.constant 1 : index
    %c8 = arith.constant 8 : index
    %c0_11 = arith.constant 0 : index
    %13 = vector.load %arg6[%c1_10, %c8, %c0_11] : memref<18x32x128xf32, #tpu.memory_space<vmem>>, vector<16x16x128xf32>
    tpu.vector_store %arg6[%c1_10, %c8, %c0_11], %12 {strides = array<i32>} : memref<18x32x128xf32, #tpu.memory_space<vmem>>, vector<16x16x128xf32>,
    %c0_12 = arith.constant 0 : index
    %c7 = arith.constant 7 : index
    %c0_13 = arith.constant 0 : index
    %14 = vector.load %arg6[%c0_12, %c7, %c0_13] : memref<18x32x128xf32, #tpu.memory_space<vmem>>, vector<16x16x128xf32>
    %15 = vector.shape_cast %14 : vector<16x16x128xf32> to vector<256x128xf32>
    %c0_14 = arith.constant 0 : index
    %c8_15 = arith.constant 8 : index
    %c0_16 = arith.constant 0 : index
    %16 = vector.load %arg6[%c0_14, %c8_15, %c0_16] : memref<18x32x128xf32, #tpu.memory_space<vmem>>, vector<16x16x128xf32>
    %17 = vector.shape_cast %16 : vector<16x16x128xf32> to vector<256x128xf32>
    %c0_17 = arith.constant 0 : index
    %c9 = arith.constant 9 : index
    %c0_18 = arith.constant 0 : index
    %18 = vector.load %arg6[%c0_17, %c9, %c0_18] : memref<18x32x128xf32, #tpu.memory_space<vmem>>, vector<16x16x128xf32>
    %19 = vector.shape_cast %18 : vector<16x16x128xf32> to vector<256x128xf32>
    %c1_19 = arith.constant 1 : index
    %c7_20 = arith.constant 7 : index
    %c0_21 = arith.constant 0 : index
    %20 = vector.load %arg6[%c1_19, %c7_20, %c0_21] : memref<18x32x128xf32, #tpu.memory_space<vmem>>, vector<16x16x128xf32>
    %21 = vector.shape_cast %20 : vector<16x16x128xf32> to vector<256x128xf32>
    %c1_22 = arith.constant 1 : index
    %c8_23 = arith.constant 8 : index
    %c0_24 = arith.constant 0 : index
    %22 = vector.load %arg6[%c1_22, %c8_23, %c0_24] : memref<18x32x128xf32, #tpu.memory_space<vmem>>, vector<16x16x128xf32>
    %23 = vector.shape_cast %22 : vector<16x16x128xf32> to vector<256x128xf32>
    %c1_25 = arith.constant 1 : index
    %c9_26 = arith.constant 9 : index
    %c0_27 = arith.constant 0 : index
    %24 = vector.load %arg6[%c1_25, %c9_26, %c0_27] : memref<18x32x128xf32, #tpu.memory_space<vmem>>, vector<16x16x128xf32>
    %25 = vector.shape_cast %24 : vector<16x16x128xf32> to vector<256x128xf32>
    %c2 = arith.constant 2 : index
    %c7_28 = arith.constant 7 : index
    %c0_29 = arith.constant 0 : index
    %26 = vector.load %arg6[%c2, %c7_28, %c0_29] : memref<18x32x128xf32, #tpu.memory_space<vmem>>, vector<16x16x128xf32>
    %27 = vector.shape_cast %26 : vector<16x16x128xf32> to vector<256x128xf32>
    %c2_30 = arith.constant 2 : index
    %c8_31 = arith.constant 8 : index
    %c0_32 = arith.constant 0 : index
    %28 = vector.load %arg6[%c2_30, %c8_31, %c0_32] : memref<18x32x128xf32, #tpu.memory_space<vmem>>, vector<16x16x128xf32>
    %29 = vector.shape_cast %28 : vector<16x16x128xf32> to vector<256x128xf32>
    %c2_33 = arith.constant 2 : index
    %c9_34 = arith.constant 9 : index
    %c0_35 = arith.constant 0 : index
    %30 = vector.load %arg6[%c2_33, %c9_34, %c0_35] : memref<18x32x128xf32, #tpu.memory_space<vmem>>, vector<16x16x128xf32>
    %31 = vector.shape_cast %30 : vector<16x16x128xf32> to vector<256x128xf32>
    %32 = tpu.concatenate %15, %17, %19, %21, %23, %25, %27, %29, %31 in 1 : vector<256x128xf32>, vector<256x128xf32>, vector<256x128xf32>, vector<256x128xf32>, vector<256x128xf32>, vector<256x128xf32>, vector<256x128xf32>, vector<256x128xf32>, vector<256x128xf32> -> vector<256x1152xf32>
    %c0_36 = arith.constant 0 : index
    %c0_37 = arith.constant 0 : index
    %33 = vector.load %arg2[%c0_36, %c0_37] : memref<1152x128xf32, #tpu.memory_space<vmem>>, vector<1152x128xf32>
    %cst_38 = arith.constant dense<0.000000e+00> : vector<256x128xf32>
    %34 = tpu.matmul %32, %33, %cst_38 {dimension_numbers = #tpu.dot_dimension_numbers<[1], [0], [0], [1], [0, 0, 1, 1], [], []>} : vector<256x1152xf32>, vector<1152x128xf32>, vector<256x128xf32> -> vector<256x128xf32>
    %35 = vector.shape_cast %34 : vector<256x128xf32> to vector<1x16x16x128xf32>
    %c0_39 = arith.constant 0 : index
    %c0_40 = arith.constant 0 : index
    %c0_41 = arith.constant 0 : index
    %c0_42 = arith.constant 0 : index
    %36 = vector.load %arg4[%c0_39, %c0_40, %c0_41, %c0_42] : memref<1x16x16x128xf32, #tpu.memory_space<vmem>>, vector<1x16x16x128xf32>
    tpu.vector_store %arg4[%c0_39, %c0_40, %c0_41, %c0_42], %35 {strides = array<i32>} : memref<1x16x16x128xf32, #tpu.memory_space<vmem>>, vector<1x16x16x128xf32>,
    %cst_43 = arith.constant dense<0.000000e+00> : vector<128xf32>
    %37 = vector.multi_reduction <add>, %34, %cst_43 [0] : vector<256x128xf32> to vector<128xf32>
    %38 = vector.shape_cast %37 : vector<128xf32> to vector<1x128xf32>
    %39 = arith.mulf %34, %34 : vector<256x128xf32>
    %cst_44 = arith.constant dense<0.000000e+00> : vector<128xf32>
    %40 = vector.multi_reduction <add>, %39, %cst_44 [0] : vector<256x128xf32> to vector<128xf32>
    %41 = vector.shape_cast %40 : vector<128xf32> to vector<1x128xf32>
    %42 = tpu.concatenate %38, %41 in 0 : vector<1x128xf32>, vector<1x128xf32> -> vector<2x128xf32>
    %43 = vector.shape_cast %42 : vector<2x128xf32> to vector<1x2x128xf32>
    %c0_45 = arith.constant 0 : index
    %c0_46 = arith.constant 0 : index
    %c0_47 = arith.constant 0 : index
    %44 = vector.load %arg5[%c0_45, %c0_46, %c0_47] : memref<1x2x128xf32, #tpu.memory_space<vmem>>, vector<1x2x128xf32>
    tpu.vector_store %arg5[%c0_45, %c0_46, %c0_47], %43 {strides = array<i32>} : memref<1x2x128xf32, #tpu.memory_space<vmem>>, vector<1x2x128xf32>,
    return
  }
  func.func @transform_0(%arg0: i32) -> (i32, i32, i32, i32) {
    %c0_i32 = arith.constant 0 : i32
    %c0_i32_0 = arith.constant 0 : i32
    %c0_i32_1 = arith.constant 0 : i32
    %c0_i32_2 = arith.constant 0 : i32
    return %arg0, %c0_i32, %c0_i32_0, %c0_i32_1 : i32, i32, i32, i32
  }
  func.func @transform_1(%arg0: i32) -> (i32, i32) {
    %c0_i32 = arith.constant 0 : i32
    %c0_i32_0 = arith.constant 0 : i32
    %c0_i32_1 = arith.constant 0 : i32
    return %c0_i32, %c0_i32_0 : i32, i32
  }
  func.func @transform_2(%arg0: i32) -> (i32, i32) {
    %c0_i32 = arith.constant 0 : i32
    %c0_i32_0 = arith.constant 0 : i32
    %c0_i32_1 = arith.constant 0 : i32
    return %c0_i32, %c0_i32_0 : i32, i32
  }
  func.func @transform_3(%arg0: i32) -> (i32, i32, i32, i32) {
    %c0_i32 = arith.constant 0 : i32
    %c0_i32_0 = arith.constant 0 : i32
    %c0_i32_1 = arith.constant 0 : i32
    %c0_i32_2 = arith.constant 0 : i32
    return %arg0, %c0_i32, %c0_i32_0, %c0_i32_1 : i32, i32, i32, i32
  }
  func.func @transform_4(%arg0: i32) -> (i32, i32, i32) {
    %c0_i32 = arith.constant 0 : i32
    %c0_i32_0 = arith.constant 0 : i32
    %c0_i32_1 = arith.constant 0 : i32
    return %arg0, %c0_i32, %c0_i32_0 : i32, i32, i32
  }
}

module attributes {stable_mosaic.version = 11 : i64} {
  func.func @_bn_add_relu_kernel(%arg0: i32, %arg1: memref<1x16x16x128xf32, #tpu.memory_space<vmem>>, %arg2: memref<1x16x16x128xf32, #tpu.memory_space<vmem>>, %arg3: memref<2x128xf32, #tpu.memory_space<vmem>>, %arg4: memref<1x16x16x128xf32, #tpu.memory_space<vmem>>) attributes {dimension_semantics = [#tpu.dimension_semantics<parallel>], iteration_bounds = array<i64: 2>, scalar_prefetch = 0 : i64, scratch_operands = 0 : i64, tpu.core_type = #tpu.core_type<tc>, window_params = [{transform_indices = @transform_0, window_bounds = array<i64: 1, 16, 16, 128>}, {transform_indices = @transform_1, window_bounds = array<i64: 1, 16, 16, 128>}, {pipeline_mode = #tpu.pipeline_mode<synchronous>, transform_indices = @transform_2, window_bounds = array<i64: 2, 128>}, {transform_indices = @transform_3, window_bounds = array<i64: 1, 16, 16, 128>}]} {
    %c0 = arith.constant 0 : index
    %c0_0 = arith.constant 0 : index
    %0 = vector.load %arg3[%c0, %c0_0] : memref<2x128xf32, #tpu.memory_space<vmem>>, vector<1x128xf32>
    %c1 = arith.constant 1 : index
    %c0_1 = arith.constant 0 : index
    %1 = vector.load %arg3[%c1, %c0_1] : memref<2x128xf32, #tpu.memory_space<vmem>>, vector<1x128xf32>
    %c0_2 = arith.constant 0 : index
    %c0_3 = arith.constant 0 : index
    %c0_4 = arith.constant 0 : index
    %c0_5 = arith.constant 0 : index
    %2 = vector.load %arg1[%c0_2, %c0_3, %c0_4, %c0_5] : memref<1x16x16x128xf32, #tpu.memory_space<vmem>>, vector<1x16x16x128xf32>
    %3 = vector.shape_cast %2 : vector<1x16x16x128xf32> to vector<256x128xf32>
    %4 = vector.broadcast %0 : vector<1x128xf32> to vector<256x128xf32>
    %5 = arith.mulf %3, %4 : vector<256x128xf32>
    %6 = vector.broadcast %1 : vector<1x128xf32> to vector<256x128xf32>
    %7 = arith.addf %5, %6 : vector<256x128xf32>
    %c0_6 = arith.constant 0 : index
    %c0_7 = arith.constant 0 : index
    %c0_8 = arith.constant 0 : index
    %c0_9 = arith.constant 0 : index
    %8 = vector.load %arg2[%c0_6, %c0_7, %c0_8, %c0_9] : memref<1x16x16x128xf32, #tpu.memory_space<vmem>>, vector<1x16x16x128xf32>
    %9 = vector.shape_cast %8 : vector<1x16x16x128xf32> to vector<256x128xf32>
    %10 = arith.addf %7, %9 : vector<256x128xf32>
    %cst = arith.constant 0.000000e+00 : f32
    %11 = vector.broadcast %cst : f32 to vector<256x128xf32>
    %12 = arith.maximumf %10, %11 : vector<256x128xf32>
    %13 = vector.shape_cast %12 : vector<256x128xf32> to vector<1x16x16x128xf32>
    %c0_10 = arith.constant 0 : index
    %c0_11 = arith.constant 0 : index
    %c0_12 = arith.constant 0 : index
    %c0_13 = arith.constant 0 : index
    %14 = vector.load %arg4[%c0_10, %c0_11, %c0_12, %c0_13] : memref<1x16x16x128xf32, #tpu.memory_space<vmem>>, vector<1x16x16x128xf32>
    tpu.vector_store %arg4[%c0_10, %c0_11, %c0_12, %c0_13], %13 {strides = array<i32>} : memref<1x16x16x128xf32, #tpu.memory_space<vmem>>, vector<1x16x16x128xf32>,
    return
  }
  func.func @transform_0(%arg0: i32) -> (i32, i32, i32, i32) {
    %c0_i32 = arith.constant 0 : i32
    %c0_i32_0 = arith.constant 0 : i32
    %c0_i32_1 = arith.constant 0 : i32
    %c0_i32_2 = arith.constant 0 : i32
    return %arg0, %c0_i32, %c0_i32_0, %c0_i32_1 : i32, i32, i32, i32
  }
  func.func @transform_1(%arg0: i32) -> (i32, i32, i32, i32) {
    %c0_i32 = arith.constant 0 : i32
    %c0_i32_0 = arith.constant 0 : i32
    %c0_i32_1 = arith.constant 0 : i32
    %c0_i32_2 = arith.constant 0 : i32
    return %arg0, %c0_i32, %c0_i32_0, %c0_i32_1 : i32, i32, i32, i32
  }
  func.func @transform_2(%arg0: i32) -> (i32, i32) {
    %c0_i32 = arith.constant 0 : i32
    %c0_i32_0 = arith.constant 0 : i32
    %c0_i32_1 = arith.constant 0 : i32
    return %c0_i32, %c0_i32_0 : i32, i32
  }
  func.func @transform_3(%arg0: i32) -> (i32, i32, i32, i32) {
    %c0_i32 = arith.constant 0 : i32
    %c0_i32_0 = arith.constant 0 : i32
    %c0_i32_1 = arith.constant 0 : i32
    %c0_i32_2 = arith.constant 0 : i32
    return %arg0, %c0_i32, %c0_i32_0, %c0_i32_1 : i32, i32, i32, i32
  }
}

</mosaic_0001>

<bundles_post_ra>
// kernel: basic_block_forward.5
= control target key start
LH: loop header
LB: loop body
LE: loop exit
PB: predicated region body
PF: predicated region fallthrough
CT: control target
= control target key end

     0   :  { %s540_s12 = smov 0   ;;  %s741_s0 = inlined_call_operand.vmem [shape: f32[2,16,16,128], index: 0, kind: input, shape index: {}]   ;;  %s742_s1 = inlined_call_operand.vmem [shape: f32[2,16,16,128], index: 1, kind: input, shape index: {}]   ;;  %s743_s2 = inlined_call_operand.vmem [shape: f32[2,128], index: 2, kind: input, shape index: {}]   ;;  %s744_s3 = inlined_call_operand.vmem [shape: f32[2,16,16,128], index: 3, kind: output, shape index: {}]  }
   0x1 LB: > { %s486_s13 = sadd.s32 4294967295, %s518_s12   ;;  %p490_p0 = scmp.ge.s32.totalorder %s518_s12, 1  ;;  %s518_s12 = sphi %s540_s12, %s13_s12  }
   0x2   : > { %p147_p1 = scmp.lt.s32.totalorder %s518_s12, 3 }
   0x4   : > { %p148_p2 = pnand %p490_p0, %p147_p1 }
   0x5   : > { %p176_p3 = scmp.lt.s32.totalorder (!%p148_p2), %s486_s13, 1 }
   0x6   : > { %151 = sbr.rel (%p148_p2) target bundleno = 55 (0x37), region = 32 }
   0xb   : > { %s746_s13 = smov (!%p176_p3, %s486_s13), 1  ;;  %v551_v0 = vld [vmem:[%s743_s2] ss:$0 sm:$0xff]  ;;  %v570_v1 = vld [vmem:[%s743_s2 + $0x1] ss:$0 sm:$0xff] }
   0xc   : > { %s553_s16 = sshll.u32 %s746_s13, 8 }
   0xd   : > { %s559_s19 = scalar_lea.vmem %s741_s0, %s553_s16  ;;  %s565_s22 = scalar_lea.vmem %s742_s1, %s553_s16 }
   0xe   : > { %v193_v2 = vld [vmem:[%s559_s19] sm:$0xff]  ;;  %v194_v3 = vld [vmem:[%s559_s19 + $0x8] sm:$0xff]  ;;  %v195_v7 = vld [vmem:[%s559_s19 + $0x10] sm:$0xff]  ;;  %s601_s27 = scalar_lea.vmem %s744_s3, %s553_s16 }
   0xf   : > { %v226_v4 = vmul.f32 %v551_v0, %v193_v2  ;;  %v291_v5 = vld [vmem:[%s565_s22] sm:$0xff]  ;;  %v227_v6 = vmul.f32 %v551_v0, %v194_v3  ;;  %v292_v8 = vld [vmem:[%s565_s22 + $0x8] sm:$0xff]  ;;  %v228_v9 = vmul.f32 %v551_v0, %v195_v7  ;;  %v196_v10 = vld [vmem:[%s559_s19 + $0x18] sm:$0xff] }
  0x10   : > { %v197_v11 = vld [vmem:[%s559_s19 + $0x20] sm:$0xff]  ;;  %v293_v14 = vld [vmem:[%s565_s22 + $0x10] sm:$0xff]  ;;  %v229_v15 = vmul.f32 %v551_v0, %v196_v10  ;;  %v294_v16 = vld [vmem:[%s565_s22 + $0x18] sm:$0xff] }
  0x11   : > { %v259_v12 = vadd.f32 %v570_v1, %v226_v4  ;;  %v260_v13 = vadd.f32 %v570_v1, %v227_v6  ;;  %v230_v17 = vmul.f32 %v551_v0, %v197_v11  ;;  %v198_v18 = vld [vmem:[%s559_s19 + $0x28] sm:$0xff]  ;;  %v261_v19 = vadd.f32 %v570_v1, %v228_v9  ;;  %v295_v20 = vld [vmem:[%s565_s22 + $0x20] sm:$0xff]  ;;  %v199_v22 = vld [vmem:[%s559_s19 + $0x30] sm:$0xff] }
  0x12   : > { %v231_v21 = vmul.f32 %v551_v0, %v198_v18  ;;  %v200_v23 = vld [vmem:[%s559_s19 + $0x38] sm:$0xff]  ;;  %v262_v26 = vadd.f32 %v570_v1, %v229_v15  ;;  %v296_v28 = vld [vmem:[%s565_s22 + $0x28] sm:$0xff]  ;;  %v232_v31 = vmul.f32 %v551_v0, %v199_v22  ;;  %v201_v33 = vld [vmem:[%s559_s19 + $0x40] sm:$0xff] }
  0x13   : > { %v323_v24 = vadd.f32 %v291_v5, %v259_v12  ;;  %v324_v25 = vadd.f32 %v292_v8, %v260_v13  ;;  %v263_v27 = vadd.f32 %v570_v1, %v230_v17  ;;  %v325_v29 = vadd.f32 %v293_v14, %v261_v19  ;;  %v202_v34 = vld [vmem:[%s559_s19 + $0x48] sm:$0xff]  ;;  %v297_v39 = vld [vmem:[%s565_s22 + $0x30] sm:$0xff]  ;;  %v298_v40 = vld [vmem:[%s565_s22 + $0x38] sm:$0xff] }
  0x14   : > { %v264_v30 = vadd.f32 %v570_v1, %v231_v21  ;;  %v233_v32 = vmul.f32 %v551_v0, %v200_v23  ;;  %v326_v37 = vadd.f32 %v294_v16, %v262_v26  ;;  %v203_v41 = vld [vmem:[%s559_s19 + $0x50] sm:$0xff]  ;;  %v265_v44 = vadd.f32 %v570_v1, %v232_v31  ;;  %v204_v46 = vld [vmem:[%s559_s19 + $0x58] sm:$0xff]  ;;  %v205_v47 = vld [vmem:[%s559_s19 + $0x60] sm:$0xff] }
  0x15   : > { %v355_v35 = vmax.f32 %v323_v24, 0.0  ;;  %v356_v36 = vmax.f32 %v324_v25, 0.0  ;;  %v327_v38 = vadd.f32 %v295_v20, %v263_v27  ;;  %v357_v42 = vmax.f32 %v325_v29, 0.0  ;;  %v206_v52 = vld [vmem:[%s559_s19 + $0x68] sm:$0xff]  ;;  %v299_v56 = vld [vmem:[%s565_s22 + $0x40] sm:$0xff]  ;;  %v301_v61 = vld [vmem:[%s565_s22 + $0x50] sm:$0xff] }
  0x16   : > { %v328_v43 = vadd.f32 %v296_v28, %v264_v30  ;;  %v266_v45 = vadd.f32 %v570_v1, %v233_v32  ;;  %v358_v48 = vmax.f32 %v326_v37, 0.0  ;;  %v234_v50 = vmul.f32 %v551_v0, %v201_v33  ;;  %v300_v57 = vld [vmem:[%s565_s22 + $0x48] sm:$0xff]  ;;  %v207_v2 = vld [vmem:[%s559_s19 + $0x70] sm:$0xff]  ;;  %v208_v3 = vld [vmem:[%s559_s19 + $0x78] sm:$0xff] }
  0x17   : > { %387 = vst [vmem:[%s601_s27] sm:$0xff] %v355_v35  ;;  %v359_v49 = vmax.f32 %v327_v38, 0.0  ;;  %v235_v51 = vmul.f32 %v551_v0, %v202_v34  ;;  %v329_v54 = vadd.f32 %v297_v39, %v265_v44  ;;  %v236_v58 = vmul.f32 %v551_v0, %v203_v41  ;;  %v302_v7 = vld [vmem:[%s565_s22 + $0x58] sm:$0xff]  ;;  %v303_v8 = vld [vmem:[%s565_s22 + $0x60] sm:$0xff]  ;;  %v304_v14 = vld [vmem:[%s565_s22 + $0x68] sm:$0xff] }
  0x18   : > { %388 = vst [vmem:[%s601_s27 + $0x8] sm:$0xff] %v356_v36  ;;  %v360_v53 = vmax.f32 %v328_v43, 0.0  ;;  %v330_v55 = vadd.f32 %v298_v40, %v266_v45  ;;  %v267_v59 = vadd.f32 %v570_v1, %v234_v50  ;;  %v237_v62 = vmul.f32 %v551_v0, %v204_v46  ;;  %v209_v19 = vld [vmem:[%s559_s19 + $0x80] sm:$0xff]  ;;  %v210_v20 = vld [vmem:[%s559_s19 + $0x88] sm:$0xff]  ;;  %v305_v25 = vld [vmem:[%s565_s22 + $0x70] sm:$0xff] }
  0x19   : > { %389 = vst [vmem:[%s601_s27 + $0x10] sm:$0xff] %v357_v42  ;;  %v268_v60 = vadd.f32 %v570_v1, %v235_v51  ;;  %v238_v63 = vmul.f32 %v551_v0, %v205_v47  ;;  %v361_v4 = vmax.f32 %v329_v54, 0.0  ;;  %v269_v6 = vadd.f32 %v570_v1, %v236_v58  ;;  %v306_v26 = vld [vmem:[%s565_s22 + $0x78] sm:$0xff]  ;;  %v211_v27 = vld [vmem:[%s559_s19 + $0x90] sm:$0xff]  ;;  %v213_v33 = vld [vmem:[%s559_s19 + $0xa0] sm:$0xff] }
  0x1a   : > { %390 = vst [vmem:[%s601_s27 + $0x18] sm:$0xff] %v358_v48  ;;  %v362_v5 = vmax.f32 %v330_v55, 0.0  ;;  %v239_v9 = vmul.f32 %v551_v0, %v206_v52  ;;  %v331_v10 = vadd.f32 %v299_v56, %v267_v59  ;;  %v270_v12 = vadd.f32 %v570_v1, %v237_v62  ;;  %v212_v32 = vld [vmem:[%s559_s19 + $0x98] sm:$0xff]  ;;  %v214_v38 = vld [vmem:[%s559_s19 + $0xa8] sm:$0xff]  ;;  %v307_v42 = vld [vmem:[%s565_s22 + $0x80] sm:$0xff] }
  0x1b   : > { %391 = vst [vmem:[%s601_s27 + $0x20] sm:$0xff] %v359_v49  ;;  %v332_v11 = vadd.f32 %v300_v57, %v268_v60  ;;  %v271_v13 = vadd.f32 %v570_v1, %v238_v63  ;;  %v333_v15 = vadd.f32 %v301_v61, %v269_v6  ;;  %v240_v17 = vmul.f32 %v551_v0, %v207_v2  ;;  %v308_v43 = vld [vmem:[%s565_s22 + $0x88] sm:$0xff]  ;;  %v309_v47 = vld [vmem:[%s565_s22 + $0x90] sm:$0xff]  ;;  %v216_v51 = vld [vmem:[%s559_s19 + $0xb8] sm:$0xff] }
  0x1c   : > { %392 = vst [vmem:[%s601_s27 + $0x28] sm:$0xff] %v360_v53  ;;  %v272_v16 = vadd.f32 %v570_v1, %v239_v9  ;;  %v241_v18 = vmul.f32 %v551_v0, %v208_v3  ;;  %v363_v21 = vmax.f32 %v331_v10, 0.0  ;;  %v334_v23 = vadd.f32 %v302_v7, %v270_v12  ;;  %v215_v50 = vld [vmem:[%s559_s19 + $0xb0] sm:$0xff]  ;;  %v310_v55 = vld [vmem:[%s565_s22 + $0x98] sm:$0xff]  ;;  %v311_v56 = vld [vmem:[%s565_s22 + $0xa0] sm:$0xff] }
  0x1d   : > { %393 = vst [vmem:[%s601_s27 + $0x30] sm:$0xff] %v361_v4  ;;  %v364_v22 = vmax.f32 %v332_v11, 0.0  ;;  %v335_v24 = vadd.f32 %v303_v8, %v271_v13  ;;  %v365_v28 = vmax.f32 %v333_v15, 0.0  ;;  %v273_v30 = vadd.f32 %v570_v1, %v240_v17  ;;  %v312_v62 = vld [vmem:[%s565_s22 + $0xa8] sm:$0xff]  ;;  %v313_v11 = vld [vmem:[%s565_s22 + $0xb0] sm:$0xff]  ;;  %v314_v12 = vld [vmem:[%s565_s22 + $0xb8] sm:$0xff] }
  0x1e   : > { %394 = vst [vmem:[%s601_s27 + $0x38] sm:$0xff] %v362_v5  ;;  %v336_v29 = vadd.f32 %v304_v14, %v272_v16  ;;  %v274_v31 = vadd.f32 %v570_v1, %v241_v18  ;;  %v366_v34 = vmax.f32 %v334_v23, 0.0  ;;  %v242_v36 = vmul.f32 %v551_v0, %v209_v19  ;;  %v217_v5 = vld [vmem:[%s559_s19 + $0xc0] sm:$0xff]  ;;  %v218_v6 = vld [vmem:[%s559_s19 + $0xc8] sm:$0xff]  ;;  %v219_v13 = vld [vmem:[%s559_s19 + $0xd0] sm:$0xff] }
  0x1f   : > { %395 = vst [vmem:[%s601_s27 + $0x40] sm:$0xff] %v363_v21  ;;  %v367_v35 = vmax.f32 %v335_v24, 0.0  ;;  %v243_v37 = vmul.f32 %v551_v0, %v210_v20  ;;  %v337_v40 = vadd.f32 %v305_v25, %v273_v30  ;;  %v244_v44 = vmul.f32 %v551_v0, %v211_v27  ;;  %v220_v18 = vld [vmem:[%s559_s19 + $0xd8] sm:$0xff]  ;;  %v221_v19 = vld [vmem:[%s559_s19 + $0xe0] sm:$0xff]  ;;  %v222_v24 = vld [vmem:[%s559_s19 + $0xe8] sm:$0xff] }
  0x20   : > { %396 = vst [vmem:[%s601_s27 + $0x48] sm:$0xff] %v364_v22  ;;  %v368_v39 = vmax.f32 %v336_v29, 0.0  ;;  %v338_v41 = vadd.f32 %v306_v26, %v274_v31  ;;  %v275_v45 = vadd.f32 %v570_v1, %v242_v36  ;;  %v245_v48 = vmul.f32 %v551_v0, %v212_v32  ;;  %v316_v29 = vld [vmem:[%s565_s22 + $0xc8] sm:$0xff]  ;;  %v223_v36 = vld [vmem:[%s559_s19 + $0xf0] sm:$0xff] }
  0x21   : > { %397 = vst [vmem:[%s601_s27 + $0x50] sm:$0xff] %v365_v28  ;;  %v276_v46 = vadd.f32 %v570_v1, %v243_v37  ;;  %v246_v49 = vmul.f32 %v551_v0, %v213_v33  ;;  %v369_v52 = vmax.f32 %v337_v40, 0.0  ;;  %v277_v54 = vadd.f32 %v570_v1, %v244_v44  ;;  %v315_v28 = vld [vmem:[%s565_s22 + $0xc0] sm:$0xff]  ;;  %v317_v33 = vld [vmem:[%s565_s22 + $0xd0] sm:$0xff]  ;;  %v224_v37 = vld [vmem:[%s559_s19 + $0xf8] sm:$0xff] }
  0x22   : > { %398 = vst [vmem:[%s601_s27 + $0x58] sm:$0xff] %v366_v34  ;;  %v370_v53 = vmax.f32 %v338_v41, 0.0  ;;  %v247_v57 = vmul.f32 %v551_v0, %v214_v38  ;;  %v339_v58 = vadd.f32 %v307_v42, %v275_v45  ;;  %v278_v60 = vadd.f32 %v570_v1, %v245_v48  ;;  %v318_v41 = vld [vmem:[%s565_s22 + $0xd8] sm:$0xff]  ;;  %v319_v42 = vld [vmem:[%s565_s22 + $0xe0] sm:$0xff]  ;;  %v320_v48 = vld [vmem:[%s565_s22 + $0xe8] sm:$0xff] }
  0x23   : > { %399 = vst [vmem:[%s601_s27 + $0x60] sm:$0xff] %v367_v35  ;;  %v340_v59 = vadd.f32 %v308_v43, %v276_v46  ;;  %v279_v61 = vadd.f32 %v570_v1, %v246_v49  ;;  %v341_v63 = vadd.f32 %v309_v47, %v277_v54  ;;  %v248_v3 = vmul.f32 %v551_v0, %v215_v50 }
  0x24   : > { %400 = vst [vmem:[%s601_s27 + $0x68] sm:$0xff] %v368_v39  ;;  %v280_v2 = vadd.f32 %v570_v1, %v247_v57  ;;  %v249_v4 = vmul.f32 %v551_v0, %v216_v51  ;;  %v371_v7 = vmax.f32 %v339_v58, 0.0  ;;  %v342_v9 = vadd.f32 %v310_v55, %v278_v60  ;;  %v321_v57 = vld [vmem:[%s565_s22 + $0xf0] sm:$0xff]  ;;  %v322_v58 = vld [vmem:[%s565_s22 + $0xf8] sm:$0xff] }
  0x25   : > { %401 = vst [vmem:[%s601_s27 + $0x70] sm:$0xff] %v369_v52  ;;  %v372_v8 = vmax.f32 %v340_v59, 0.0  ;;  %v343_v10 = vadd.f32 %v311_v56, %v279_v61  ;;  %v373_v14 = vmax.f32 %v341_v63, 0.0  ;;  %v281_v16 = vadd.f32 %v570_v1, %v248_v3 }
  0x26   : > { %402 = vst [vmem:[%s601_s27 + $0x78] sm:$0xff] %v370_v53  ;;  %v344_v15 = vadd.f32 %v312_v62, %v280_v2  ;;  %v282_v17 = vadd.f32 %v570_v1, %v249_v4  ;;  %v374_v20 = vmax.f32 %v342_v9, 0.0  ;;  %v250_v22 = vmul.f32 %v551_v0, %v217_v5 }
  0x27   : > { %403 = vst [vmem:[%s601_s27 + $0x80] sm:$0xff] %v371_v7  ;;  %v375_v21 = vmax.f32 %v343_v10, 0.0  ;;  %v251_v23 = vmul.f32 %v551_v0, %v218_v6  ;;  %v345_v26 = vadd.f32 %v313_v11, %v281_v16  ;;  %v252_v30 = vmul.f32 %v551_v0, %v219_v13 }
  0x28   : > { %404 = vst [vmem:[%s601_s27 + $0x88] sm:$0xff] %v372_v8  ;;  %v376_v25 = vmax.f32 %v344_v15, 0.0  ;;  %v346_v27 = vadd.f32 %v314_v12, %v282_v17  ;;  %v283_v31 = vadd.f32 %v570_v1, %v250_v22  ;;  %v253_v34 = vmul.f32 %v551_v0, %v220_v18 }
  0x29   : > { %405 = vst [vmem:[%s601_s27 + $0x90] sm:$0xff] %v373_v14  ;;  %v284_v32 = vadd.f32 %v570_v1, %v251_v23  ;;  %v254_v35 = vmul.f32 %v551_v0, %v221_v19  ;;  %v377_v38 = vmax.f32 %v345_v26, 0.0  ;;  %v285_v40 = vadd.f32 %v570_v1, %v252_v30 }
  0x2a   : > { %406 = vst [vmem:[%s601_s27 + $0x98] sm:$0xff] %v374_v20  ;;  %v378_v39 = vmax.f32 %v346_v27, 0.0  ;;  %v255_v43 = vmul.f32 %v551_v0, %v222_v24  ;;  %v347_v44 = vadd.f32 %v315_v28, %v283_v31  ;;  %v286_v46 = vadd.f32 %v570_v1, %v253_v34 }
  0x2b   : > { %407 = vst [vmem:[%s601_s27 + $0xa0] sm:$0xff] %v375_v21  ;;  %v348_v45 = vadd.f32 %v316_v29, %v284_v32  ;;  %v287_v47 = vadd.f32 %v570_v1, %v254_v35  ;;  %v349_v49 = vadd.f32 %v317_v33, %v285_v40  ;;  %v256_v51 = vmul.f32 %v551_v0, %v223_v36 }
  0x2c   : > { %408 = vst [vmem:[%s601_s27 + $0xa8] sm:$0xff] %v376_v25  ;;  %v288_v50 = vadd.f32 %v570_v1, %v255_v43  ;;  %v257_v52 = vmul.f32 %v551_v0, %v224_v37  ;;  %v379_v53 = vmax.f32 %v347_v44, 0.0  ;;  %v350_v55 = vadd.f32 %v318_v41, %v286_v46 }
  0x2d   : > { %409 = vst [vmem:[%s601_s27 + $0xb0] sm:$0xff] %v377_v38  ;;  %v380_v54 = vmax.f32 %v348_v45, 0.0  ;;  %v351_v56 = vadd.f32 %v319_v42, %v287_v47  ;;  %v381_v59 = vmax.f32 %v349_v49, 0.0  ;;  %v289_v61 = vadd.f32 %v570_v1, %v256_v51 }
  0x2e   : > { %410 = vst [vmem:[%s601_s27 + $0xb8] sm:$0xff] %v378_v39  ;;  %v352_v60 = vadd.f32 %v320_v48, %v288_v50  ;;  %v290_v0 = vadd.f32 %v570_v1, %v257_v52  ;;  %v382_v62 = vmax.f32 %v350_v55, 0.0 }
  0x2f   : > { %411 = vst [vmem:[%s601_s27 + $0xc0] sm:$0xff] %v379_v53  ;;  %v383_v63 = vmax.f32 %v351_v56, 0.0  ;;  %v353_v3 = vadd.f32 %v321_v57, %v289_v61 }
  0x30   : > { %412 = vst [vmem:[%s601_s27 + $0xc8] sm:$0xff] %v380_v54  ;;  %v384_v2 = vmax.f32 %v352_v60, 0.0  ;;  %v354_v4 = vadd.f32 %v322_v58, %v290_v0 }
  0x31   : > { %413 = vst [vmem:[%s601_s27 + $0xd0] sm:$0xff] %v381_v59  ;;  %v385_v5 = vmax.f32 %v353_v3, 0.0 }
  0x32   : > { %414 = vst [vmem:[%s601_s27 + $0xd8] sm:$0xff] %v382_v62  ;;  %v386_v6 = vmax.f32 %v354_v4, 0.0 }
  0x33   : > { %415 = vst [vmem:[%s601_s27 + $0xe0] sm:$0xff] %v383_v63 }
  0x34   : > { %416 = vst [vmem:[%s601_s27 + $0xe8] sm:$0xff] %v384_v2 }
  0x35   : > { %417 = vst [vmem:[%s601_s27 + $0xf0] sm:$0xff] %v385_v5 }
  0x36   : > { %418 = vst [vmem:[%s601_s27 + $0xf8] sm:$0xff] %v386_v6 }
  0x37 PF: > { %s13_s12 = sadd.s32 1, %s518_s12  }
  0x38   : > { %p10_p4 = scmp.ge.s32.totalorder %s13_s12, 4  }
  0x3a   :  { %12 = sbr.rel (!%p10_p4) target bundleno = 1 (0x1), region = 65 }

// kernel: basic_block_forward.3
= control target key start
LH: loop header
LB: loop body
LE: loop exit
PB: predicated region body
PF: predicated region fallthrough
CT: control target
= control target key end

     0   :  { %s2149_s12 = smov 0   ;;  %s3186_s0 = inlined_call_operand.vmem [shape: f32[2,18,18,128], index: 0, kind: input, shape index: {}]   ;;  %s3187_s1 = inlined_call_operand.vmem [shape: f32[1152,128], index: 1, kind: input, shape index: {}]   ;;  %s3188_s2 = inlined_call_operand.vmem [shape: f32[2,16,16,128], index: 2, kind: output, shape index: {0}]   ;;  %s3189_s3 = inlined_call_operand.vmem [shape: f32[2,2,128], index: 3, kind: output, shape index: {1}]  }
   0x1 LB: > { %s1860_s13 = sadd.s32 4294967295, %s2127_s12   ;;  %p1864_p0 = scmp.ge.s32.totalorder %s2127_s12, 1  ;;  %s2127_s12 = sphi %s2149_s12, %s14_s12  }
   0x2   : > { %p140_p1 = scmp.lt.s32.totalorder %s2127_s12, 3 }
   0x4   : > { %p141_p2 = pnand %p1864_p0, %p140_p1 }
   0x5   : > { %p168_p3 = scmp.lt.s32.totalorder (!%p141_p2), %s1860_s13, 1 }
   0x6   : > { %144 = sbr.rel (%p141_p2) target bundleno = 767 (0x2ff), region = 28 }
   0xb   : > { %v487_v0 = vld [vmem:[%s3187_s1 + $0x78] sm:$0xff]  ;;  %v486_v1 = vld [vmem:[%s3187_s1 + $0x70] sm:$0xff]  ;;  %v485_v2 = vld [vmem:[%s3187_s1 + $0x68] sm:$0xff]  ;;  %s3191_s13 = smov (!%p168_p3, %s1860_s13), 1  ;;  %vm1771_vm0 = vcmask 1040384  }
   0xc   : > { %2064 = vmatpush.msra.mxu1 %v487_v0  ;;  %2065 = vmatpush.msra.mxu2 %v487_v0  ;;  %v484_v3 = vld [vmem:[%s3187_s1 + $0x60] sm:$0xff]  ;;  %v483_v4 = vld [vmem:[%s3187_s1 + $0x58] sm:$0xff]  ;;  %v482_v5 = vld [vmem:[%s3187_s1 + $0x50] sm:$0xff]  ;;  %s2112_s15 = smul.u32 432, %s3191_s13  ;;  %s2063_s16 = sshll.u32 %s3191_s13, 8 }
   0xd   : > { %2066 = vmatpush.msra.mxu3 %v487_v0  ;;  %616 = vmatpush.msra.mxu0 %v487_v0  ;;  %v481_v6 = vld [vmem:[%s3187_s1 + $0x48] sm:$0xff]  ;;  %v480_v7 = vld [vmem:[%s3187_s1 + $0x40] sm:$0xff]  ;;  %v479_v8 = vld [vmem:[%s3187_s1 + $0x38] sm:$0xff]  ;;  %s3070_s19 = scalar_lea.vmem %s3188_s2, %s2063_s16 }
   0xe   : > { %2067 = vmatpush.msra.mxu1 %v486_v1  ;;  %2068 = vmatpush.msra.mxu2 %v486_v1  ;;  %v478_v9 = vld [vmem:[%s3187_s1 + $0x30] sm:$0xff]  ;;  %v477_v10 = vld [vmem:[%s3187_s1 + $0x28] sm:$0xff]  ;;  %v476_v11 = vld [vmem:[%s3187_s1 + $0x20] sm:$0xff]  ;;  %s2212_s22 = scalar_lea.vmem %s3186_s0, %s2112_s15 }
   0xf   : > { %2069 = vmatpush.msra.mxu3 %v486_v1  ;;  %617 = vmatpush.msra.mxu0 %v486_v1  ;;  %v475_v12 = vld [vmem:[%s3187_s1 + $0x18] sm:$0xff]  ;;  %v474_v13 = vld [vmem:[%s3187_s1 + $0x10] sm:$0xff]  ;;  %v473_v14 = vld [vmem:[%s3187_s1 + $0x8] sm:$0xff] }
  0x10   : > { %2070 = vmatpush.msra.mxu1 %v485_v2  ;;  %2071 = vmatpush.msra.mxu2 %v485_v2  ;;  %v472_v15 = vld [vmem:[%s3187_s1] sm:$0xff]  ;;  %v519_v18 = vld [vmem:[%s3187_s1 + $0x178] sm:$0xff]  ;;  %v518_v22 = vld [vmem:[%s3187_s1 + $0x170] sm:$0xff] }
  0x11   : > { %2072 = vmatpush.msra.mxu3 %v485_v2  ;;  %618 = vmatpush.msra.mxu0 %v485_v2  ;;  %v2218_v16 = vld [vmem:[%s2212_s22 + $0x60] sm:$0xff]  ;;  %v503_v20 = vld [vmem:[%s3187_s1 + $0xf8] sm:$0xff]  ;;  %v502_v23 = vld [vmem:[%s3187_s1 + $0xf0] sm:$0xff] }
  0x12   : > { %2073 = vmatpush.msra.mxu1 %v484_v3  ;;  %2074 = vmatpush.msra.mxu2 %v484_v3  ;;  %v2221_v17 = vld [vmem:[%s2212_s22 + $0xc0] sm:$0xff]  ;;  %v535_v21 = vld [vmem:[%s3187_s1 + $0x1f8] sm:$0xff]  ;;  %v534_v24 = vld [vmem:[%s3187_s1 + $0x1f0] sm:$0xff] }
  0x13   : > { %2075 = vmatpush.msra.mxu3 %v484_v3  ;;  %619 = vmatpush.msra.mxu0 %v484_v3  ;;  %v206_v19 = vld [vmem:[%s2212_s22 + $0x120] sm:$0xff]  ;;  %v517_v25 = vld [vmem:[%s3187_s1 + $0x168] sm:$0xff]  ;;  %v551_v29 = vld [vmem:[%s3187_s1 + $0x278] sm:$0xff] }
  0x14   : > { %2076 = vmatpush.msra.mxu1 %v483_v4  ;;  %2077 = vmatpush.msra.mxu2 %v483_v4  ;;  %v182_v26 = vld [vmem:[%s2212_s22] sm:$0xff]  ;;  %v501_v27 = vld [vmem:[%s3187_s1 + $0xe8] sm:$0xff]  ;;  %v550_v35 = vld [vmem:[%s3187_s1 + $0x270] sm:$0xff] }
  0x15   : > { %2078 = vmatpush.msra.mxu3 %v483_v4  ;;  %620 = vmatpush.msra.mxu0 %v483_v4  ;;  %v533_v28 = vld [vmem:[%s3187_s1 + $0x1e8] sm:$0xff]  ;;  %v516_v32 = vld [vmem:[%s3187_s1 + $0x160] sm:$0xff]  ;;  %v515_v37 = vld [vmem:[%s3187_s1 + $0x158] sm:$0xff] }
  0x16   : > { %2079 = vmatpush.msra.mxu1 %v482_v5  ;;  %2080 = vmatpush.msra.mxu2 %v482_v5  ;;  %v2258_v30 = vld [vmem:[%s2212_s22 + $0x68] sm:$0xff]  ;;  %v532_v33 = vld [vmem:[%s3187_s1 + $0x1e0] sm:$0xff]  ;;  %v531_v38 = vld [vmem:[%s3187_s1 + $0x1d8] sm:$0xff] }
  0x17   : > { %2081 = vmatpush.msra.mxu3 %v482_v5  ;;  %621 = vmatpush.msra.mxu0 %v482_v5  ;;  %v2261_v31 = vld [vmem:[%s2212_s22 + $0xc8] sm:$0xff]  ;;  %v500_v36 = vld [vmem:[%s3187_s1 + $0xe0] sm:$0xff]  ;;  %v499_v40 = vld [vmem:[%s3187_s1 + $0xd8] sm:$0xff] }
  0x18   : > { %2082 = vmatpush.msra.mxu1 %v481_v6  ;;  %2083 = vmatpush.msra.mxu2 %v481_v6  ;;  %v207_v34 = vld [vmem:[%s2212_s22 + $0x128] sm:$0xff]  ;;  %v514_v41 = vld [vmem:[%s3187_s1 + $0x150] sm:$0xff]  ;;  %v548_v44 = vld [vmem:[%s3187_s1 + $0x260] sm:$0xff] }
  0x19   : > { %2084 = vmatpush.msra.mxu3 %v481_v6  ;;  %622 = vmatpush.msra.mxu0 %v481_v6  ;;  %v549_v39 = vld [vmem:[%s3187_s1 + $0x268] sm:$0xff]  ;;  %v530_v43 = vld [vmem:[%s3187_s1 + $0x1d0] sm:$0xff]  ;;  %v2304_v46 = vld [vmem:[%s2212_s22 + $0x78] sm:$0xff] }
  0x1a   : > { %2085 = vmatpush.msra.mxu1 %v480_v7  ;;  %2086 = vmatpush.msra.mxu2 %v480_v7  ;;  %v183_v42 = vld [vmem:[%s2212_s22 + $0x8] sm:$0xff]  ;;  %v498_v45 = vld [vmem:[%s3187_s1 + $0xd0] sm:$0xff]  ;;  %v2307_v47 = vld [vmem:[%s2212_s22 + $0xd8] sm:$0xff] }
  0x1b   : > { %2087 = vmatpush.msra.mxu3 %v480_v7  ;;  %623 = vmatpush.msra.mxu0 %v480_v7  ;;  %v513_v48 = vld [vmem:[%s3187_s1 + $0x148] sm:$0xff]  ;;  %v208_v50 = vld [vmem:[%s2212_s22 + $0x138] sm:$0xff]  ;;  %v512_v53 = vld [vmem:[%s3187_s1 + $0x140] sm:$0xff] }
  0x1c   : > { %2088 = vmatpush.msra.mxu1 %v479_v8  ;;  %2089 = vmatpush.msra.mxu2 %v479_v8  ;;  %v529_v49 = vld [vmem:[%s3187_s1 + $0x1c8] sm:$0xff]  ;;  %v547_v51 = vld [vmem:[%s3187_s1 + $0x258] sm:$0xff]  ;;  %v528_v54 = vld [vmem:[%s3187_s1 + $0x1c0] sm:$0xff] }
  0x1d   : > { %2090 = vmatpush.msra.mxu3 %v479_v8  ;;  %624 = vmatpush.msra.mxu0 %v479_v8  ;;  %v497_v52 = vld [vmem:[%s3187_s1 + $0xc8] sm:$0xff]  ;;  %v546_v55 = vld [vmem:[%s3187_s1 + $0x250] sm:$0xff]  ;;  %v496_v56 = vld [vmem:[%s3187_s1 + $0xc0] sm:$0xff] }
  0x1e   : > { %2091 = vmatpush.msra.mxu1 %v478_v9  ;;  %2092 = vmatpush.msra.mxu2 %v478_v9  ;;  %v511_v57 = vld [vmem:[%s3187_s1 + $0x138] sm:$0xff]  ;;  %v545_v60 = vld [vmem:[%s3187_s1 + $0x248] sm:$0xff]  ;;  %v2352_v62 = vld [vmem:[%s2212_s22 + $0x80] sm:$0xff] }
  0x1f   : > { %2093 = vmatpush.msra.mxu3 %v478_v9  ;;  %625 = vmatpush.msra.mxu0 %v478_v9  ;;  %v2340_v58 = vld [vmem:[%s2212_s22 + $0x18] sm:$0xff]  ;;  %v2355_v63 = vld [vmem:[%s2212_s22 + $0xe0] sm:$0xff]  ;;  %v510_v0 = vld [vmem:[%s3187_s1 + $0x130] sm:$0xff] }
  0x20   : > { %2094 = vmatpush.msra.mxu1 %v477_v10  ;;  %2095 = vmatpush.msra.mxu2 %v477_v10  ;;  %v527_v59 = vld [vmem:[%s3187_s1 + $0x1b8] sm:$0xff]  ;;  %v526_v1 = vld [vmem:[%s3187_s1 + $0x1b0] sm:$0xff]  ;;  %v209_v2 = vld [vmem:[%s2212_s22 + $0x140] sm:$0xff] }
  0x21   : > { %2096 = vmatpush.msra.mxu3 %v477_v10  ;;  %626 = vmatpush.msra.mxu0 %v477_v10  ;;  %v495_v61 = vld [vmem:[%s3187_s1 + $0xb8] sm:$0xff]  ;;  %v544_v3 = vld [vmem:[%s3187_s1 + $0x240] sm:$0xff]  ;;  %v494_v4 = vld [vmem:[%s3187_s1 + $0xb0] sm:$0xff] }
  0x22   : > { %2097 = vmatpush.msra.mxu1 %v476_v11  ;;  %2098 = vmatpush.msra.mxu2 %v476_v11  ;;  %v509_v5 = vld [vmem:[%s3187_s1 + $0x128] sm:$0xff]  ;;  %v543_v7 = vld [vmem:[%s3187_s1 + $0x238] sm:$0xff]  ;;  %v508_v9 = vld [vmem:[%s3187_s1 + $0x120] sm:$0xff] }
  0x23   : > { %2099 = vmatpush.msra.mxu3 %v476_v11  ;;  %627 = vmatpush.msra.mxu0 %v476_v11  ;;  %v525_v6 = vld [vmem:[%s3187_s1 + $0x1a8] sm:$0xff]  ;;  %v2389_v10 = vld [vmem:[%s2212_s22 + $0x20] sm:$0xff] }
  0x24   : > { %2100 = vmatpush.msra.mxu1 %v475_v12  ;;  %2101 = vmatpush.msra.mxu2 %v475_v12  ;;  %v493_v8 = vld [vmem:[%s3187_s1 + $0xa8] sm:$0xff]  ;;  %v524_v11 = vld [vmem:[%s3187_s1 + $0x1a0] sm:$0xff] }
  0x25   : > { %2102 = vmatpush.msra.mxu3 %v475_v12  ;;  %628 = vmatpush.msra.mxu0 %v475_v12  ;;  %v542_v12 = vld [vmem:[%s3187_s1 + $0x230] sm:$0xff] }
  0x26   : > { %2103 = vmatpush.msra.mxu1 %v474_v13  ;;  %2104 = vmatpush.msra.mxu2 %v474_v13 }
  0x27   : > { %2105 = vmatpush.msra.mxu3 %v474_v13  ;;  %629 = vmatpush.msra.mxu0 %v474_v13  ;;  %v492_v13 = vld [vmem:[%s3187_s1 + $0xa0] sm:$0xff] }
  0x28   : > { %2106 = vmatpush.msra.mxu1 %v473_v14  ;;  %2107 = vmatpush.msra.mxu2 %v473_v14 }
  0x29   : > { %2108 = vmatpush.msra.mxu3 %v473_v14  ;;  %630 = vmatpush.msra.mxu0 %v473_v14  ;;  %v2401_v14 = vld [vmem:[%s2212_s22 + $0x90] sm:$0xff] }
  0x2a   : > { %2109 = vmatpush.msra.mxu1 %v472_v15  ;;  %2110 = vmatpush.msra.mxu2 %v472_v15 }
  0x2b   : > { %656 = vmatmul.f32.vlgmr.msra.gmra.mxu1 %v2218_v16  ;;  %680 = vmatmul.f32.vlgmr.msra.gmra.mxu2 %v2221_v17 }
  0x2c   : > { %842 = vmatpush.msrb.mxu2 %v519_v18  ;;  %2111 = vmatpush.msra.mxu3 %v472_v15  ;;  %v507_v18 = vld [vmem:[%s3187_s1 + $0x118] sm:$0xff] }
  0x2d   : > { %704 = vmatmul.f32.vlgmr.msra.gmra.mxu3 %v206_v19  ;;  %729 = vmatpush.msrb.mxu1 %v503_v20  ;;  %v523_v19 = vld [vmem:[%s3187_s1 + $0x198] sm:$0xff]  ;;  %v210_v20 = vld [vmem:[%s2212_s22 + $0x150] sm:$0xff] }
  0x2e   : > { %955 = vmatpush.msrb.mxu3 %v535_v21  ;;  %843 = vmatpush.msrb.mxu2 %v518_v22  ;;  %v541_v21 = vld [vmem:[%s3187_s1 + $0x228] sm:$0xff]  ;;  %v491_v22 = vld [vmem:[%s3187_s1 + $0x98] sm:$0xff] }
  0x2f   : > { %730 = vmatpush.msrb.mxu1 %v502_v23  ;;  %631 = vmatpush.msra.mxu0 %v472_v15  ;;  %v2404_v15 = vld [vmem:[%s2212_s22 + $0xf0] sm:$0xff] }
  0x30   : > { %956 = vmatpush.msrb.mxu3 %v534_v24  ;;  %844 = vmatpush.msrb.mxu2 %v517_v25  ;;  %v506_v23 = vld [vmem:[%s3187_s1 + $0x110] sm:$0xff]  ;;  %v540_v25 = vld [vmem:[%s3187_s1 + $0x220] sm:$0xff] }
  0x31   : > { %632 = vmatmul.f32.vlgmr.msra.gmra.mxu0 %v182_v26  ;;  %731 = vmatpush.msrb.mxu1 %v501_v27  ;;  %v522_v24 = vld [vmem:[%s3187_s1 + $0x190] sm:$0xff]  ;;  %v505_v27 = vld [vmem:[%s3187_s1 + $0x108] sm:$0xff] }
  0x32   : > { %957 = vmatpush.msrb.mxu3 %v533_v28  ;;  %1068 = vmatpush.msrb.mxu0 %v551_v29  ;;  %v490_v26 = vld [vmem:[%s3187_s1 + $0x90] sm:$0xff]  ;;  %v521_v29 = vld [vmem:[%s3187_s1 + $0x188] sm:$0xff] }
  0x33   : > { %659 = vmatmul.f32.gmra.mxu1 %v2258_v30  ;;  %683 = vmatmul.f32.gmra.mxu2 %v2261_v31  ;;  %v2438_v28 = vld [vmem:[%s2212_s22 + $0x30] sm:$0xff] }
  0x34   : > { %845 = vmatpush.msrb.mxu2 %v516_v32  ;;  %958 = vmatpush.msrb.mxu3 %v532_v33  ;;  %v539_v32 = vld [vmem:[%s3187_s1 + $0x218] sm:$0xff]  ;;  %v489_v33 = vld [vmem:[%s3187_s1 + $0x88] sm:$0xff] }
  0x35   : > { %707 = vmatmul.f32.gmra.mxu3 %v207_v34  ;;  %1069 = vmatpush.msrb.mxu0 %v550_v35  ;;  %v2450_v34 = vld [vmem:[%s2212_s22 + $0x98] sm:$0xff] }
  0x36   : > { %732 = vmatpush.msrb.mxu1 %v500_v36  ;;  %846 = vmatpush.msrb.mxu2 %v515_v37  ;;  %v2453_v35 = vld [vmem:[%s2212_s22 + $0xf8] sm:$0xff]  ;;  %v504_v36 = vld [vmem:[%s3187_s1 + $0x100] sm:$0xff] }
  0x37   : > { %959 = vmatpush.msrb.mxu3 %v531_v38  ;;  %1070 = vmatpush.msrb.mxu0 %v549_v39  ;;  %v520_v37 = vld [vmem:[%s3187_s1 + $0x180] sm:$0xff]  ;;  %v211_v38 = vld [vmem:[%s2212_s22 + $0x158] sm:$0xff]  ;;  %v538_v39 = vld [vmem:[%s3187_s1 + $0x210] sm:$0xff] }
  0x38   : > { %733 = vmatpush.msrb.mxu1 %v499_v40  ;;  %847 = vmatpush.msrb.mxu2 %v514_v41  ;;  %v488_v40 = vld [vmem:[%s3187_s1 + $0x80] sm:$0xff]  ;;  %v583_v41 = vld [vmem:[%s3187_s1 + $0x378] sm:$0xff] }
  0x39   : > { %635 = vmatmul.f32.gmra.mxu0 %v183_v42  ;;  %960 = vmatpush.msrb.mxu3 %v530_v43  ;;  %v537_v42 = vld [vmem:[%s3187_s1 + $0x208] sm:$0xff]  ;;  %v599_v43 = vld [vmem:[%s3187_s1 + $0x3f8] sm:$0xff] }
  0x3a   : > { %1071 = vmatpush.msrb.mxu0 %v548_v44  ;;  %734 = vmatpush.msrb.mxu1 %v498_v45  ;;  %v567_v44 = vld [vmem:[%s3187_s1 + $0x2f8] sm:$0xff] }
  0x3b   : > { %662 = vmatmul.f32.gmra.mxu1 %v2304_v46  ;;  %686 = vmatmul.f32.gmra.mxu2 %v2307_v47  ;;  %v2484_v45 = vld [vmem:[%s2212_s22 + $0x38] sm:$0xff] }
  0x3c   : > { %848 = vmatpush.msrb.mxu2 %v513_v48  ;;  %961 = vmatpush.msrb.mxu3 %v529_v49  ;;  %v536_v48 = vld [vmem:[%s3187_s1 + $0x200] sm:$0xff]  ;;  %v2490_v49 = vld [vmem:[%s2212_s22 + $0xa8] sm:$0xff] }
  0x3d   : > { %710 = vmatmul.f32.gmra.mxu3 %v208_v50  ;;  %1072 = vmatpush.msrb.mxu0 %v547_v51  ;;  %v2493_v50 = vld [vmem:[%s2212_s22 + $0x108] sm:$0xff]  ;;  %v615_v51 = vld [vmem:[%s3187_s1 + $0x478] sm:$0xff] }
  0x3e   : > { %735 = vmatpush.msrb.mxu1 %v497_v52  ;;  %849 = vmatpush.msrb.mxu2 %v512_v53  ;;  %v212_v52 = vld [vmem:[%s2212_s22 + $0x168] sm:$0xff]  ;;  %v582_v53 = vld [vmem:[%s3187_s1 + $0x370] sm:$0xff] }
  0x3f   : > { %962 = vmatpush.msrb.mxu3 %v528_v54  ;;  %1073 = vmatpush.msrb.mxu0 %v546_v55  ;;  %v598_v54 = vld [vmem:[%s3187_s1 + $0x3f0] sm:$0xff] }
  0x40   : > { %736 = vmatpush.msrb.mxu1 %v496_v56  ;;  %850 = vmatpush.msrb.mxu2 %v511_v57  ;;  %v566_v55 = vld [vmem:[%s3187_s1 + $0x2f0] sm:$0xff]  ;;  %v188_v56 = vld [vmem:[%s2212_s22 + $0x48] sm:$0xff] }
  0x41   : > { %638 = vmatmul.f32.gmra.mxu0 %v2340_v58  ;;  %963 = vmatpush.msrb.mxu3 %v527_v59  ;;  %v2513_v57 = vld [vmem:[%s2212_s22 + $0xb0] sm:$0xff] }
  0x42   : > { %1074 = vmatpush.msrb.mxu0 %v545_v60  ;;  %737 = vmatpush.msrb.mxu1 %v495_v61  ;;  %v2516_v59 = vld [vmem:[%s2212_s22 + $0x110] sm:$0xff] }
  0x43   : > { %665 = vmatmul.f32.gmra.mxu1 %v2352_v62  ;;  %689 = vmatmul.f32.gmra.mxu2 %v2355_v63  ;;  %v2519_v60 = vld [vmem:[%s2212_s22 + $0x170] sm:$0xff] }
  0x44   : > { %851 = vmatpush.msrb.mxu2 %v510_v0  ;;  %964 = vmatpush.msrb.mxu3 %v526_v1  ;;  %v614_v61 = vld [vmem:[%s3187_s1 + $0x470] sm:$0xff]  ;;  %v214_v1 = vld [vmem:[%s2212_s22 + $0x1] sm:$0xff] }
  0x45   : > { %713 = vmatmul.f32.gmra.mxu3 %v209_v2  ;;  %1075 = vmatpush.msrb.mxu0 %v544_v3  ;;  %v189_v0 = vld [vmem:[%s2212_s22 + $0x50] sm:$0xff]  ;;  %v246_v2 = vld [vmem:[%s2212_s22 + $0x2] sm:$0xff] }
  0x46   : > { %738 = vmatpush.msrb.mxu1 %v494_v4  ;;  %852 = vmatpush.msrb.mxu2 %v509_v5  ;;  %v581_v3 = vld [vmem:[%s3187_s1 + $0x368] sm:$0xff] }
  0x47   : > { %965 = vmatpush.msrb.mxu3 %v525_v6  ;;  %1076 = vmatpush.msrb.mxu0 %v543_v7  ;;  %v597_v4 = vld [vmem:[%s3187_s1 + $0x3e8] sm:$0xff]  ;;  %v1901_v6 = vld [vmem:[%s2212_s22 + $0x19] sm:$0xff] }
  0x48   : > { %739 = vmatpush.msrb.mxu1 %v493_v8  ;;  %853 = vmatpush.msrb.mxu2 %v508_v9  ;;  %v565_v5 = vld [vmem:[%s3187_s1 + $0x2e8] sm:$0xff] }
  0x49   : > { %641 = vmatmul.f32.gmra.mxu0 %v2389_v10  ;;  %966 = vmatpush.msrb.mxu3 %v524_v11  ;;  %v215_v7 = vld [vmem:[%s2212_s22 + $0x9] sm:$0xff]  ;;  %v1902_v9 = vld [vmem:[%s2212_s22 + $0x21] sm:$0xff] }
  0x4a   : > { %1077 = vmatpush.msrb.mxu0 %v542_v12  ;;  %740 = vmatpush.msrb.mxu1 %v492_v13  ;;  %v247_v8 = vld [vmem:[%s2212_s22 + $0xa] sm:$0xff]  ;;  %v248_v11 = vld [vmem:[%s2212_s22 + $0x1a] sm:$0xff] }
  0x4b   : > { %668 = vmatmul.f32.gmra.mxu1 %v2401_v14  ;;  %692 = vmatmul.f32.gmra.mxu2 %v2404_v15  ;;  %v580_v12 = vld [vmem:[%s3187_s1 + $0x360] sm:$0xff] }
  0x4c   : > { %854 = vmatpush.msrb.mxu2 %v507_v18  ;;  %967 = vmatpush.msrb.mxu3 %v523_v19  ;;  %v564_v13 = vld [vmem:[%s3187_s1 + $0x2e0] sm:$0xff]  ;;  %v2560_v18 = vld [vmem:[%s2212_s22 + $0x31] sm:$0xff] }
  0x4d   : > { %716 = vmatmul.f32.gmra.mxu3 %v210_v20  ;;  %1078 = vmatpush.msrb.mxu0 %v541_v21  ;;  %v249_v19 = vld [vmem:[%s2212_s22 + $0x22] sm:$0xff]  ;;  %v2569_v21 = vld [vmem:[%s2212_s22 + $0x39] sm:$0xff] }
  0x4e   : > { %741 = vmatpush.msrb.mxu1 %v491_v22  ;;  %855 = vmatpush.msrb.mxu2 %v506_v23  ;;  %v612_v20 = vld [vmem:[%s3187_s1 + $0x460] sm:$0xff]  ;;  %v250_v22 = vld [vmem:[%s2212_s22 + $0x32] sm:$0xff] }
  0x4f   : > { %968 = vmatpush.msrb.mxu3 %v522_v24  ;;  %1079 = vmatpush.msrb.mxu0 %v540_v25  ;;  %v579_v23 = vld [vmem:[%s3187_s1 + $0x358] sm:$0xff]  ;;  %v1905_v25 = vld [vmem:[%s2212_s22 + $0x49] sm:$0xff] }
  0x50   : > { %742 = vmatpush.msrb.mxu1 %v490_v26  ;;  %856 = vmatpush.msrb.mxu2 %v505_v27  ;;  %v595_v24 = vld [vmem:[%s3187_s1 + $0x3d8] sm:$0xff] }
  0x51   : > { %644 = vmatmul.f32.gmra.mxu0 %v2438_v28  ;;  %969 = vmatpush.msrb.mxu3 %v521_v29  ;;  %v563_v26 = vld [vmem:[%s3187_s1 + $0x2d8] sm:$0xff] }
  0x52   : > { %1080 = vmatpush.msrb.mxu0 %v539_v32  ;;  %743 = vmatpush.msrb.mxu1 %v489_v33  ;;  %v251_v27 = vld [vmem:[%s2212_s22 + $0x3a] sm:$0xff]  ;;  %v1906_v29 = vld [vmem:[%s2212_s22 + $0x51] sm:$0xff] }
  0x53   : > { %671 = vmatmul.f32.gmra.mxu1 %v2450_v34  ;;  %695 = vmatmul.f32.gmra.mxu2 %v2453_v35  ;;  %v252_v32 = vld [vmem:[%s2212_s22 + $0x4a] sm:$0xff] }
  0x54   : > { %857 = vmatpush.msrb.mxu2 %v504_v36  ;;  %970 = vmatpush.msrb.mxu3 %v520_v37  ;;  %v578_v33 = vld [vmem:[%s3187_s1 + $0x350] sm:$0xff]  ;;  %v1907_v37 = vld [vmem:[%s2212_s22 + $0x61] sm:$0xff] }
  0x55   : > { %719 = vmatmul.f32.gmra.mxu3 %v211_v38  ;;  %1081 = vmatpush.msrb.mxu0 %v538_v39  ;;  %v594_v36 = vld [vmem:[%s3187_s1 + $0x3d0] sm:$0xff] }
  0x56   : > { %744 = vmatpush.msrb.mxu1 %v488_v40  ;;  %1294 = vmatpush.msra.mxu2 %v583_v41  ;;  %v562_v38 = vld [vmem:[%s3187_s1 + $0x2d0] sm:$0xff] }
  0x57   : > { %1082 = vmatpush.msrb.mxu0 %v537_v42  ;;  %1407 = vmatpush.msra.mxu3 %v599_v43  ;;  %v253_v39 = vld [vmem:[%s2212_s22 + $0x52] sm:$0xff]  ;;  %v1908_v40 = vld [vmem:[%s2212_s22 + $0x69] sm:$0xff] }
  0x58   : > { %1181 = vmatpush.msra.mxu1 %v567_v44  ;;  %1295 = vmatpush.msra.mxu2 %v582_v53  ;;  %v254_v42 = vld [vmem:[%s2212_s22 + $0x62] sm:$0xff]  ;;  %v255_v53 = vld [vmem:[%s2212_s22 + $0x6a] sm:$0xff] }
  0x59   : > { %647 = vmatmul.f32.gmra.mxu0 %v2484_v45  ;;  %1408 = vmatpush.msra.mxu3 %v598_v54  ;;  %v577_v43 = vld [vmem:[%s3187_s1 + $0x348] sm:$0xff] }
  0x5a   : > { %1083 = vmatpush.msrb.mxu0 %v536_v48  ;;  %1182 = vmatpush.msra.mxu1 %v566_v55  ;;  %v1909_v48 = vld [vmem:[%s2212_s22 + $0x79] sm:$0xff]  ;;  %v609_v54 = vld [vmem:[%s3187_s1 + $0x448] sm:$0xff] }
  0x5b   : > { %674 = vmatmul.f32.gmra.mxu1 %v2490_v49  ;;  %698 = vmatmul.f32.gmra.mxu2 %v2493_v50 }
  0x5c   : > { %1520 = vmatpush.msra.mxu0 %v615_v51  ;;  %1296 = vmatpush.msra.mxu2 %v581_v3  ;;  %v561_v51 = vld [vmem:[%s3187_s1 + $0x2c8] sm:$0xff]  ;;  %v592_v3 = vld [vmem:[%s3187_s1 + $0x3c0] sm:$0xff] }
  0x5d   : > { %722 = vmatmul.f32.gmra.mxu3 %v212_v52  ;;  %1183 = vmatpush.msra.mxu1 %v565_v5 }
  0x5e   : > { %1521 = vmatpush.msra.mxu0 %v614_v61  ;;  %1409 = vmatpush.msra.mxu3 %v597_v4  ;;  %v1910_v61 = vld [vmem:[%s2212_s22 + $0x81] sm:$0xff] }
  0x5f   : > { %1297 = vmatpush.msra.mxu2 %v580_v12  ;;  %1184 = vmatpush.msra.mxu1 %v564_v13 }
  0x61   : > { %650 = vmatmul.f32.gmra.mxu0 %v188_v56  ;;  %1298 = vmatpush.msra.mxu2 %v579_v23 }
  0x62   : > { %1185 = vmatpush.msra.mxu1 %v563_v26  ;;  %v559_v26 = vld [vmem:[%s3187_s1 + $0x2b8] sm:$0xff] }
  0x63   : > { %677 = vmatmul.f32.gmra.mxu1 %v2513_v57  ;;  %701 = vmatmul.f32.gmra.mxu2 %v2516_v59 }
  0x64   : > { %1299 = vmatpush.msra.mxu2 %v578_v33  ;;  %1186 = vmatpush.msra.mxu1 %v562_v38 }
  0x65   : > { %725 = vmatmul.f32.gmra.mxu3 %v2519_v60 }
  0x66   : > { %1300 = vmatpush.msra.mxu2 %v577_v43  ;;  %1187 = vmatpush.msra.mxu1 %v561_v51  ;;  %v1915_v43 = vld [vmem:[%s2212_s22 + $0xc1] sm:$0xff] }
  0x69   : > { %653 = vmatmul.f32.gmra.mxu0 %v189_v0 }
  0x6b   : > { %745 = vmatmul.f32.vlgmr.msrb.gmra.mxu1 %v214_v1  ;;  %858 = vmatmul.f32.vlgmr.msrb.gmra.mxu2 %v246_v2  ;;  %v256_v2 = vld [vmem:[%s2212_s22 + $0x7a] sm:$0xff] }
  0x6d   : > { %971 = vmatmul.f32.vlgmr.msrb.gmra.mxu3 %v2340_v58  ;;  %v613_v58 = vld [vmem:[%s3187_s1 + $0x468] sm:$0xff] }
  0x6e   : > { %1522 = vmatpush.msra.mxu0 %v613_v58  ;;  %v257_v58 = vld [vmem:[%s2212_s22 + $0x82] sm:$0xff] }
  0x70   : > { %1523 = vmatpush.msra.mxu0 %v612_v20  ;;  %v258_v20 = vld [vmem:[%s2212_s22 + $0x92] sm:$0xff] }
  0x71   : > { %1084 = vmatmul.f32.vlgmr.msrb.gmra.mxu0 %v1901_v6 }
  0x73   : > { %748 = vmatmul.f32.gmra.mxu1 %v215_v7  ;;  %861 = vmatmul.f32.gmra.mxu2 %v247_v8  ;;  %v560_v7 = vld [vmem:[%s3187_s1 + $0x2c0] sm:$0xff] }
  0x74   : > { %1188 = vmatpush.msra.mxu1 %v560_v7 }
  0x75   : > { %974 = vmatmul.f32.gmra.mxu3 %v2389_v10  ;;  %v596_v10 = vld [vmem:[%s3187_s1 + $0x3e0] sm:$0xff] }
  0x76   : > { %1410 = vmatpush.msra.mxu3 %v596_v10  ;;  %v1912_v10 = vld [vmem:[%s2212_s22 + $0x99] sm:$0xff]  ;;  %1189 = vmatpush.msra.mxu1 %v559_v26 }
  0x78   : > { %1411 = vmatpush.msra.mxu3 %v595_v24 }
  0x79   : > { %1087 = vmatmul.f32.gmra.mxu0 %v1902_v9 }
  0x7a   : > { %1412 = vmatpush.msra.mxu3 %v594_v36  ;;  %v1914_v36 = vld [vmem:[%s2212_s22 + $0xb1] sm:$0xff] }
  0x7b   : > { %751 = vmatmul.f32.gmra.mxu1 %v1901_v6  ;;  %864 = vmatmul.f32.gmra.mxu2 %v248_v11  ;;  %v1911_v6 = vld [vmem:[%s2212_s22 + $0x91] sm:$0xff] }
  0x7d   : > { %977 = vmatmul.f32.gmra.mxu3 %v2438_v28  ;;  %v611_v28 = vld [vmem:[%s3187_s1 + $0x458] sm:$0xff] }
  0x7e   : > { %1524 = vmatpush.msra.mxu0 %v611_v28 }
  0x81   : > { %1090 = vmatmul.f32.gmra.mxu0 %v2560_v18 }
  0x83   : > { %754 = vmatmul.f32.gmra.mxu1 %v1902_v9  ;;  %867 = vmatmul.f32.gmra.mxu2 %v249_v19  ;;  %v608_v9 = vld [vmem:[%s3187_s1 + $0x440] sm:$0xff] }
  0x85   : > { %980 = vmatmul.f32.gmra.mxu3 %v2484_v45 }
  0x89   : > { %1093 = vmatmul.f32.gmra.mxu0 %v2569_v21 }
  0x8b   : > { %757 = vmatmul.f32.gmra.mxu1 %v2560_v18  ;;  %870 = vmatmul.f32.gmra.mxu2 %v250_v22  ;;  %v591_v22 = vld [vmem:[%s3187_s1 + $0x3b8] sm:$0xff] }
  0x8d   : > { %983 = vmatmul.f32.gmra.mxu3 %v188_v56 }
  0x91   : > { %1096 = vmatmul.f32.gmra.mxu0 %v1905_v25 }
  0x93   : > { %760 = vmatmul.f32.gmra.mxu1 %v2569_v21  ;;  %873 = vmatmul.f32.gmra.mxu2 %v251_v27 }
  0x95   : > { %986 = vmatmul.f32.gmra.mxu3 %v189_v0 }
  0x99   : > { %1099 = vmatmul.f32.gmra.mxu0 %v1906_v29 }
  0x9b   : > { %763 = vmatmul.f32.gmra.mxu1 %v1905_v25  ;;  %876 = vmatmul.f32.gmra.mxu2 %v252_v32  ;;  %v1913_v25 = vld [vmem:[%s2212_s22 + $0xa9] sm:$0xff] }
  0x9d   : > { %989 = vmatmul.f32.gmra.mxu3 %v2218_v16  ;;  %v610_v16 = vld [vmem:[%s3187_s1 + $0x450] sm:$0xff] }
  0x9e   : > { %1525 = vmatpush.msra.mxu0 %v610_v16  ;;  %v590_v16 = vld [vmem:[%s3187_s1 + $0x3b0] sm:$0xff] }
  0xa0   : > { %1526 = vmatpush.msra.mxu0 %v609_v54 }
  0xa1   : > { %1102 = vmatmul.f32.gmra.mxu0 %v1907_v37 }
  0xa2   : > { %1527 = vmatpush.msra.mxu0 %v608_v9 }
  0xa3   : > { %766 = vmatmul.f32.gmra.mxu1 %v1906_v29  ;;  %879 = vmatmul.f32.gmra.mxu2 %v253_v39  ;;  %v607_v29 = vld [vmem:[%s3187_s1 + $0x438] sm:$0xff]  ;;  %v260_v39 = vld [vmem:[%s2212_s22 + $0xaa] sm:$0xff] }
  0xa4   : > { %1528 = vmatpush.msra.mxu0 %v607_v29 }
  0xa5   : > { %992 = vmatmul.f32.gmra.mxu3 %v2258_v30  ;;  %v593_v30 = vld [vmem:[%s3187_s1 + $0x3c8] sm:$0xff] }
  0xa6   : > { %1413 = vmatpush.msra.mxu3 %v593_v30  ;;  %v558_v30 = vld [vmem:[%s3187_s1 + $0x2b0] sm:$0xff] }
  0xa7   : > { %1190 = vmatpush.msra.mxu1 %v558_v30 }
  0xa8   : > { %v2608_v41 = vpop.f32.mrf.mxu1  ;;  %1414 = vmatpush.msra.mxu3 %v592_v3 }
  0xa9   : > { %1105 = vmatmul.f32.gmra.mxu0 %v1908_v40 }
  0xaa   : > { %1415 = vmatpush.msra.mxu3 %v591_v22  ;;  %v557_v22 = vld [vmem:[%s3187_s1 + $0x2a8] sm:$0xff] }
  0xab   : > { %769 = vmatmul.f32.gmra.mxu1 %v1907_v37  ;;  %882 = vmatmul.f32.gmra.mxu2 %v254_v42 }
  0xac   : > { %1416 = vmatpush.msra.mxu3 %v590_v16  ;;  %1191 = vmatpush.msra.mxu1 %v557_v22  ;;  %v1918_v16 = vld [vmem:[%s2212_s22 + $0xe1] sm:$0xff] }
  0xad   : > { %995 = vmatmul.f32.gmra.mxu3 %v2304_v46 }
  0xae   : > { %v2618_v44 = vpop.f32.mrf.mxu2  ;;  %v2620_v45 = vpop.f32.mrf.mxu0 }
  0xb0   : > { %v2626_v52 = vpop.f32.mrf.mxu1  ;;  %v2628_v46 = vpop.f32.mrf.mxu3 }
  0xb1   : > { %1108 = vmatmul.f32.gmra.mxu0 %v1909_v48 }
  0xb3   : > { %772 = vmatmul.f32.gmra.mxu1 %v1908_v40  ;;  %885 = vmatmul.f32.gmra.mxu2 %v255_v53  ;;  %v606_v53 = vld [vmem:[%s3187_s1 + $0x430] sm:$0xff] }
  0xb4   : > { %1529 = vmatpush.msra.mxu0 %v606_v53  ;;  %v264_v53 = vld [vmem:[%s2212_s22 + $0xda] sm:$0xff] }
  0xb5   : > { %998 = vmatmul.f32.gmra.mxu3 %v2352_v62  ;;  %v576_v62 = vld [vmem:[%s3187_s1 + $0x340] sm:$0xff] }
  0xb6   : > { %v2635_v55 = vpop.f32.mrf.mxu2  ;;  %v2637_v56 = vpop.f32.mrf.mxu0  ;;  %1301 = vmatpush.msra.mxu2 %v576_v62 }
  0xb8   : > { %v2640_v0 = vpop.f32.mrf.mxu1  ;;  %v2642_v1 = vpop.f32.mrf.mxu3 }
  0xb9   : > { %1111 = vmatmul.f32.gmra.mxu0 %v1910_v61 }
  0xbb   : > { %775 = vmatmul.f32.gmra.mxu1 %v1909_v48  ;;  %888 = vmatmul.f32.gmra.mxu2 %v256_v2  ;;  %v1916_v2 = vld [vmem:[%s2212_s22 + $0xc9] sm:$0xff] }
  0xbd   : > { %1001 = vmatmul.f32.gmra.mxu3 %v2401_v14 }
  0xbe   : > { %v2652_v4 = vpop.f32.mrf.mxu2  ;;  %v2654_v5 = vpop.f32.mrf.mxu0 }
  0xc0   : > { %v2660_v8 = vpop.f32.mrf.mxu1  ;;  %v2662_v14 = vpop.f32.mrf.mxu3 }
  0xc1   : > { %1114 = vmatmul.f32.gmra.mxu0 %v1911_v6 }
  0xc3   : > { %778 = vmatmul.f32.gmra.mxu1 %v1910_v61  ;;  %891 = vmatmul.f32.gmra.mxu2 %v257_v58  ;;  %v589_v58 = vld [vmem:[%s3187_s1 + $0x3a8] sm:$0xff] }
  0xc4   : > { %1417 = vmatpush.msra.mxu3 %v589_v58  ;;  %v2778_v58 = vld [vmem:[%s2212_s22 + $0xf1] sm:$0xff] }
  0xc5   : > { %1004 = vmatmul.f32.gmra.mxu3 %v2450_v34  ;;  %v575_v34 = vld [vmem:[%s3187_s1 + $0x338] sm:$0xff] }
  0xc6   : > { %v2669_v11 = vpop.f32.mrf.mxu2  ;;  %v2671_v12 = vpop.f32.mrf.mxu0  ;;  %1302 = vmatpush.msra.mxu2 %v575_v34 }
  0xc8   : > { %v2674_v13 = vpop.f32.mrf.mxu1  ;;  %v2676_v19 = vpop.f32.mrf.mxu3 }
  0xc9   : > { %1117 = vmatmul.f32.gmra.mxu0 %v1912_v10 }
  0xcb   : > { %781 = vmatmul.f32.gmra.mxu1 %v1911_v6  ;;  %894 = vmatmul.f32.gmra.mxu2 %v258_v20  ;;  %v262_v6 = vld [vmem:[%s2212_s22 + $0xc2] sm:$0xff]  ;;  %v1917_v20 = vld [vmem:[%s2212_s22 + $0xd9] sm:$0xff] }
  0xcd   : > { %1007 = vmatmul.f32.gmra.mxu3 %v2490_v49  ;;  %v259_v49 = vld [vmem:[%s2212_s22 + $0x9a] sm:$0xff] }
  0xce   : > { %v2686_v23 = vpop.f32.mrf.mxu2  ;;  %v2688_v24 = vpop.f32.mrf.mxu0 }
  0xd0   : > { %v2694_v27 = vpop.f32.mrf.mxu1  ;;  %v2696_v28 = vpop.f32.mrf.mxu3 }
  0xd1   : > { %1120 = vmatmul.f32.gmra.mxu0 %v1913_v25 }
  0xd3   : > { %784 = vmatmul.f32.gmra.mxu1 %v1912_v10  ;;  %897 = vmatmul.f32.gmra.mxu2 %v259_v49  ;;  %v263_v49 = vld [vmem:[%s2212_s22 + $0xca] sm:$0xff] }
  0xd5   : > { %1010 = vmatmul.f32.gmra.mxu3 %v2513_v57  ;;  %v574_v57 = vld [vmem:[%s3187_s1 + $0x330] sm:$0xff] }
  0xd6   : > { %v2703_v32 = vpop.f32.mrf.mxu2  ;;  %v2705_v33 = vpop.f32.mrf.mxu0  ;;  %1303 = vmatpush.msra.mxu2 %v574_v57 }
  0xd8   : > { %v2708_v37 = vpop.f32.mrf.mxu1  ;;  %v2710_v38 = vpop.f32.mrf.mxu3 }
  0xd9   : > { %1123 = vmatmul.f32.gmra.mxu0 %v1914_v36 }
  0xdb   : > { %787 = vmatmul.f32.gmra.mxu1 %v1913_v25  ;;  %900 = vmatmul.f32.gmra.mxu2 %v260_v39 }
  0xdd   : > { %1013 = vmatmul.f32.gmra.mxu3 %v2221_v17  ;;  %v261_v17 = vld [vmem:[%s2212_s22 + $0xb2] sm:$0xff] }
  0xde   : > { %v2720_v40 = vpop.f32.mrf.mxu2  ;;  %v2722_v42 = vpop.f32.mrf.mxu0 }
  0xe0   : > { %v2728_v48 = vpop.f32.mrf.mxu1  ;;  %v2730_v51 = vpop.f32.mrf.mxu3 }
  0xe1   : > { %1126 = vmatmul.f32.gmra.mxu0 %v1915_v43 }
  0xe3   : > { %790 = vmatmul.f32.gmra.mxu1 %v1914_v36  ;;  %903 = vmatmul.f32.gmra.mxu2 %v261_v17  ;;  %v605_v36 = vld [vmem:[%s3187_s1 + $0x428] sm:$0xff] }
  0xe4   : > { %1530 = vmatpush.msra.mxu0 %v605_v36 }
  0xe5   : > { %1016 = vmatmul.f32.gmra.mxu3 %v2261_v31  ;;  %v573_v31 = vld [vmem:[%s3187_s1 + $0x328] sm:$0xff] }
  0xe6   : > { %v2737_v54 = vpop.f32.mrf.mxu2  ;;  %v2739_v61 = vpop.f32.mrf.mxu0  ;;  %1304 = vmatpush.msra.mxu2 %v573_v31 }
  0xe8   : > { %v2742_v62 = vpop.f32.mrf.mxu3  ;;  %v746_v3 = vpop.f32.mrf.mxu1 }
  0xe9   : > { %1129 = vmatmul.f32.gmra.mxu0 %v1916_v2  ;;  %v747_v7 = vadd.f32 %v746_v3, %v2620_v45 }
  0xeb   : > { %793 = vmatmul.f32.gmra.mxu1 %v1915_v43  ;;  %906 = vmatmul.f32.gmra.mxu2 %v262_v6  ;;  %v588_v6 = vld [vmem:[%s3187_s1 + $0x3a0] sm:$0xff] }
  0xec   : > { %1418 = vmatpush.msra.mxu3 %v588_v6  ;;  %v555_v6 = vld [vmem:[%s3187_s1 + $0x298] sm:$0xff] }
  0xed   : > { %1019 = vmatmul.f32.gmra.mxu3 %v2307_v47 }
  0xee   : > { %v859_v9 = vpop.f32.mrf.mxu2  ;;  %v1085_v10 = vpop.f32.mrf.mxu0 }
  0xef   : > { %v860_v34 = vadd.f32 %v859_v9, %v747_v7 }
  0xf0   : > { %v749_v25 = vpop.f32.mrf.mxu1  ;;  %v972_v26 = vpop.f32.mrf.mxu3 }
  0xf1   : > { %v973_v47 = vadd.f32 %v972_v26, %v860_v34  ;;  %1132 = vmatmul.f32.gmra.mxu0 %v1917_v20  ;;  %v750_v29 = vadd.f32 %v749_v25, %v2637_v56  ;;  %v604_v26 = vld [vmem:[%s3187_s1 + $0x420] sm:$0xff] }
  0xf2   : > { %1531 = vmatpush.msra.mxu0 %v604_v26 }
  0xf3   : > { %v2758_v45 = vadd.f32 %v1085_v10, %v973_v47  ;;  %796 = vmatmul.f32.gmra.mxu1 %v1916_v2  ;;  %909 = vmatmul.f32.gmra.mxu2 %v263_v49  ;;  %v556_v10 = vld [vmem:[%s3187_s1 + $0x2a0] sm:$0xff] }
  0xf4   : > { %1192 = vmatpush.msra.mxu1 %v556_v10 }
  0xf5   : > { %1022 = vmatmul.f32.gmra.mxu3 %v2355_v63  ;;  %v572_v63 = vld [vmem:[%s3187_s1 + $0x320] sm:$0xff] }
  0xf6   : > { %v862_v39 = vpop.f32.mrf.mxu2  ;;  %v1088_v57 = vpop.f32.mrf.mxu0  ;;  %1305 = vmatpush.msra.mxu2 %v572_v63  ;;  %v2809_v63 = vld [vmem:[%s2212_s22 + $0x109] sm:$0xff]  ;;  %1193 = vmatpush.msra.mxu1 %v555_v6  ;;  %v269_v6 = vld [vmem:[%s2212_s22 + $0x112] sm:$0xff] }
  0xf7   : > { %v863_v43 = vadd.f32 %v862_v39, %v750_v29  ;;  %v2793_v29 = vld [vmem:[%s2212_s22 + $0xf9] sm:$0xff] }
  0xf8   : > { %v752_v30 = vpop.f32.mrf.mxu1  ;;  %v975_v17 = vpop.f32.mrf.mxu3 }
  0xf9   : > { %v976_v3 = vadd.f32 %v975_v17, %v863_v43  ;;  %1135 = vmatmul.f32.gmra.mxu0 %v1918_v16  ;;  %v753_v56 = vadd.f32 %v752_v30, %v2654_v5  ;;  %v265_v5 = vld [vmem:[%s2212_s22 + $0xe2] sm:$0xff]  ;;  %v266_v43 = vld [vmem:[%s2212_s22 + $0xf2] sm:$0xff] }
  0xfa   : > { %v587_v17 = vld [vmem:[%s3187_s1 + $0x398] sm:$0xff] }
  0xfb   : > { %v2767_v2 = vadd.f32 %v1088_v57, %v976_v3  ;;  %799 = vmatmul.f32.gmra.mxu1 %v1917_v20  ;;  %912 = vmatmul.f32.gmra.mxu2 %v264_v53 }
  0xfc   : > { %1419 = vmatpush.msra.mxu3 %v587_v17 }
  0xfd   : > { %1025 = vmatmul.f32.gmra.mxu3 %v2404_v15 }
  0xfe   : > { %v865_v31 = vpop.f32.mrf.mxu2  ;;  %v1091_v7 = vpop.f32.mrf.mxu0 }
  0xff   : > { %v866_v9 = vadd.f32 %v865_v31, %v753_v56 }
 0x100   : > { %v755_v20 = vpop.f32.mrf.mxu1  ;;  %v978_v34 = vpop.f32.mrf.mxu3 }
 0x101   : > { %v979_v15 = vadd.f32 %v978_v34, %v866_v9  ;;  %1138 = vmatmul.f32.gmra.mxu0 %v2778_v58  ;;  %v756_v25 = vadd.f32 %v755_v20, %v2671_v12  ;;  %v603_v20 = vld [vmem:[%s3187_s1 + $0x418] sm:$0xff] }
 0x102   : > { %1532 = vmatpush.msra.mxu0 %v603_v20 }
 0x103   : > { %v2785_v22 = vadd.f32 %v1091_v7, %v979_v15  ;;  %802 = vmatmul.f32.gmra.mxu1 %v1918_v16  ;;  %915 = vmatmul.f32.gmra.mxu2 %v265_v5  ;;  %v2825_v15 = vld [vmem:[%s2212_s22 + $0x111] sm:$0xff] }
 0x105   : > { %1028 = vmatmul.f32.gmra.mxu3 %v2453_v35  ;;  %v571_v35 = vld [vmem:[%s3187_s1 + $0x318] sm:$0xff] }
 0x106   : > { %v868_v49 = vpop.f32.mrf.mxu2  ;;  %v1094_v47 = vpop.f32.mrf.mxu0  ;;  %1306 = vmatpush.msra.mxu2 %v571_v35 }
 0x107   : > { %v869_v36 = vadd.f32 %v868_v49, %v756_v25 }
 0x108   : > { %v758_v39 = vpop.f32.mrf.mxu1  ;;  %v981_v57 = vpop.f32.mrf.mxu3 }
 0x109   : > { %v982_v16 = vadd.f32 %v981_v57, %v869_v36  ;;  %1141 = vmatmul.f32.gmra.mxu0 %v2793_v29  ;;  %v759_v30 = vadd.f32 %v758_v39, %v2688_v24  ;;  %v267_v24 = vld [vmem:[%s2212_s22 + $0xfa] sm:$0xff] }
 0x10b   : > { %v2797_v12 = vadd.f32 %v1094_v47, %v982_v16  ;;  %805 = vmatmul.f32.gmra.mxu1 %v2778_v58  ;;  %918 = vmatmul.f32.gmra.mxu2 %v266_v43  ;;  %v268_v47 = vld [vmem:[%s2212_s22 + $0x10a] sm:$0xff] }
 0x10c   : > { %v586_v43 = vld [vmem:[%s3187_s1 + $0x390] sm:$0xff] }
 0x10d   : > { %1031 = vmatmul.f32.gmra.mxu3 %v2493_v50 }
 0x10e   : > { %v871_v53 = vpop.f32.mrf.mxu2  ;;  %v1097_v3 = vpop.f32.mrf.mxu0  ;;  %1420 = vmatpush.msra.mxu3 %v586_v43 }
 0x10f   : > { %v872_v56 = vadd.f32 %v871_v53, %v759_v30  ;;  %v2841_v30 = vld [vmem:[%s2212_s22 + $0x121] sm:$0xff]  ;;  %v554_v53 = vld [vmem:[%s3187_s1 + $0x290] sm:$0xff] }
 0x110   : > { %v761_v31 = vpop.f32.mrf.mxu1  ;;  %v984_v7 = vpop.f32.mrf.mxu3  ;;  %1194 = vmatpush.msra.mxu1 %v554_v53  ;;  %v553_v53 = vld [vmem:[%s3187_s1 + $0x288] sm:$0xff] }
 0x111   : > { %v985_v50 = vadd.f32 %v984_v7, %v872_v56  ;;  %1144 = vmatmul.f32.gmra.mxu0 %v2809_v63  ;;  %v762_v10 = vadd.f32 %v761_v31, %v2705_v33  ;;  %v1891_v33 = vld [vmem:[%s2212_s22 + $0x120] sm:$0xff]  ;;  %v1892_v31 = vld [vmem:[%s2212_s22 + $0x128] sm:$0xff] }
 0x112   : > { %1195 = vmatpush.msra.mxu1 %v553_v53  ;;  %v2905_v53 = vld [vmem:[%s2212_s22 + $0x151] sm:$0xff] }
 0x113   : > { %v2816_v9 = vadd.f32 %v1097_v3, %v985_v50  ;;  %808 = vmatmul.f32.gmra.mxu1 %v2793_v29  ;;  %921 = vmatmul.f32.gmra.mxu2 %v267_v24  ;;  %v602_v50 = vld [vmem:[%s3187_s1 + $0x410] sm:$0xff] }
 0x114   : > { %1533 = vmatpush.msra.mxu0 %v602_v50  ;;  %v601_v50 = vld [vmem:[%s3187_s1 + $0x408] sm:$0xff] }
 0x115   : > { %1034 = vmatmul.f32.gmra.mxu3 %v2516_v59  ;;  %v570_v59 = vld [vmem:[%s3187_s1 + $0x310] sm:$0xff] }
 0x116   : > { %v874_v34 = vpop.f32.mrf.mxu2  ;;  %v1100_v5 = vpop.f32.mrf.mxu0  ;;  %1307 = vmatpush.msra.mxu2 %v570_v59  ;;  %1534 = vmatpush.msra.mxu0 %v601_v50 }
 0x117   : > { %v875_v25 = vadd.f32 %v874_v34, %v762_v10  ;;  %v2857_v34 = vld [vmem:[%s2212_s22 + $0x129] sm:$0xff] }
 0x118   : > { %v764_v26 = vpop.f32.mrf.mxu1  ;;  %v987_v49 = vpop.f32.mrf.mxu3 }
 0x119   : > { %v988_v36 = vadd.f32 %v987_v49, %v875_v25  ;;  %1147 = vmatmul.f32.gmra.mxu0 %v2825_v15  ;;  %v765_v57 = vadd.f32 %v764_v26, %v2722_v42  ;;  %v270_v49 = vld [vmem:[%s2212_s22 + $0x122] sm:$0xff] }
 0x11b   : > { %v2830_v39 = vadd.f32 %v1100_v5, %v988_v36  ;;  %811 = vmatmul.f32.gmra.mxu1 %v2809_v63  ;;  %924 = vmatmul.f32.gmra.mxu2 %v268_v47  ;;  %v1893_v36 = vld [vmem:[%s2212_s22 + $0x138] sm:$0xff] }
 0x11d   : > { %1037 = vmatmul.f32.gmra.mxu3 %v1891_v33  ;;  %v569_v33 = vld [vmem:[%s3187_s1 + $0x308] sm:$0xff] }
 0x11e   : > { %v877_v16 = vpop.f32.mrf.mxu2  ;;  %v1103_v35 = vpop.f32.mrf.mxu0  ;;  %1308 = vmatpush.msra.mxu2 %v569_v33  ;;  %v1895_v33 = vld [vmem:[%s2212_s22 + $0x150] sm:$0xff] }
 0x11f   : > { %v878_v17 = vadd.f32 %v877_v16, %v765_v57  ;;  %v585_v57 = vld [vmem:[%s3187_s1 + $0x388] sm:$0xff] }
 0x120   : > { %v767_v3 = vpop.f32.mrf.mxu1  ;;  %v990_v56 = vpop.f32.mrf.mxu3  ;;  %1421 = vmatpush.msra.mxu3 %v585_v57 }
 0x121   : > { %v991_v42 = vadd.f32 %v990_v56, %v878_v17  ;;  %1150 = vmatmul.f32.gmra.mxu0 %v2841_v30  ;;  %v768_v24 = vadd.f32 %v767_v3, %v2739_v61 }
 0x123   : > { %v2849_v7 = vadd.f32 %v1103_v35, %v991_v42  ;;  %814 = vmatmul.f32.gmra.mxu1 %v2825_v15  ;;  %927 = vmatmul.f32.gmra.mxu2 %v269_v6  ;;  %v2873_v35 = vld [vmem:[%s2212_s22 + $0x139] sm:$0xff]  ;;  %v271_v6 = vld [vmem:[%s2212_s22 + $0x12a] sm:$0xff] }
 0x124   : > { %v1894_v42 = vld [vmem:[%s2212_s22 + $0x140] sm:$0xff] }
 0x125   : > { %1040 = vmatmul.f32.gmra.mxu3 %v1892_v31 }
 0x126   : > { %v880_v10 = vpop.f32.mrf.mxu2  ;;  %v1106_v20 = vpop.f32.mrf.mxu0 }
 0x127   : > { %v881_v5 = vadd.f32 %v880_v10, %v768_v24 }
 0x128   : > { %v770_v25 = vpop.f32.mrf.mxu1  ;;  %v993_v26 = vpop.f32.mrf.mxu3 }
 0x129   : > { %v994_v47 = vadd.f32 %v993_v26, %v881_v5  ;;  %1153 = vmatmul.f32.gmra.mxu0 %v2857_v34  ;;  %v771_v59 = vadd.f32 %v770_v25, %v2608_v41  ;;  %v2889_v5 = vld [vmem:[%s2212_s22 + $0x141] sm:$0xff] }
 0x12b   : > { %v2862_v61 = vadd.f32 %v1106_v20, %v994_v47  ;;  %817 = vmatmul.f32.gmra.mxu1 %v2841_v30  ;;  %930 = vmatmul.f32.gmra.mxu2 %v270_v49  ;;  %v272_v47 = vld [vmem:[%s2212_s22 + $0x13a] sm:$0xff] }
 0x12d   : > { %1043 = vmatmul.f32.gmra.mxu3 %v1893_v36 }
 0x12e   : > { %v883_v43 = vpop.f32.mrf.mxu2  ;;  %v1109_v16 = vpop.f32.mrf.mxu0 }
 0x12f   : > { %v884_v17 = vadd.f32 %v883_v43, %v771_v59  ;;  %v568_v59 = vld [vmem:[%s3187_s1 + $0x300] sm:$0xff] }
 0x130   : > { %v773_v3 = vpop.f32.mrf.mxu1  ;;  %v996_v56 = vpop.f32.mrf.mxu3  ;;  %1309 = vmatpush.msra.mxu2 %v568_v59  ;;  %v584_v43 = vld [vmem:[%s3187_s1 + $0x380] sm:$0xff]  ;;  %v274_v59 = vld [vmem:[%s2212_s22 + $0x152] sm:$0xff] }
 0x131   : > { %v997_v41 = vadd.f32 %v996_v56, %v884_v17  ;;  %1156 = vmatmul.f32.gmra.mxu0 %v2873_v35  ;;  %v774_v24 = vadd.f32 %v773_v3, %v2626_v52  ;;  %1422 = vmatpush.msra.mxu3 %v584_v43  ;;  %v552_v56 = vld [vmem:[%s3187_s1 + $0x280] sm:$0xff] }
 0x132   : > { %1196 = vmatpush.msra.mxu1 %v552_v56  ;;  %v2931_v56 = vld [vmem:[%s2212_s22 + $0x169] sm:$0xff] }
 0x133   : > { %v2881_v31 = vadd.f32 %v1109_v16, %v997_v41  ;;  %820 = vmatmul.f32.gmra.mxu1 %v2857_v34  ;;  %933 = vmatmul.f32.gmra.mxu2 %v271_v6 }
 0x135   : > { %1046 = vmatmul.f32.gmra.mxu3 %v1894_v42  ;;  %v273_v42 = vld [vmem:[%s2212_s22 + $0x142] sm:$0xff] }
 0x136   : > { %v886_v10 = vpop.f32.mrf.mxu2  ;;  %v1112_v20 = vpop.f32.mrf.mxu0 }
 0x137   : > { %v887_v25 = vadd.f32 %v886_v10, %v774_v24  ;;  %v1896_v24 = vld [vmem:[%s2212_s22 + $0x158] sm:$0xff] }
 0x138   : > { %v776_v26 = vpop.f32.mrf.mxu1  ;;  %v999_v49 = vpop.f32.mrf.mxu3 }
 0x139   : > { %v1000_v36 = vadd.f32 %v999_v49, %v887_v25  ;;  %1159 = vmatmul.f32.gmra.mxu0 %v2889_v5  ;;  %v777_v57 = vadd.f32 %v776_v26, %v2640_v0  ;;  %v2921_v49 = vld [vmem:[%s2212_s22 + $0x159] sm:$0xff] }
 0x13b   : > { %v2894_v52 = vadd.f32 %v1112_v20, %v1000_v36  ;;  %823 = vmatmul.f32.gmra.mxu1 %v2873_v35  ;;  %936 = vmatmul.f32.gmra.mxu2 %v272_v47  ;;  %v600_v20 = vld [vmem:[%s3187_s1 + $0x400] sm:$0xff] }
 0x13c   : > { %1535 = vmatpush.msra.mxu0 %v600_v20 }
 0x13d   : > { %1049 = vmatmul.f32.gmra.mxu3 %v1895_v33 }
 0x13e   : > { %v889_v16 = vpop.f32.mrf.mxu2  ;;  %v1115_v17 = vpop.f32.mrf.mxu0 }
 0x13f   : > { %v890_v3 = vadd.f32 %v889_v16, %v777_v57 }
 0x140   : > { %v779_v6 = vpop.f32.mrf.mxu1  ;;  %v1002_v41 = vpop.f32.mrf.mxu3 }
 0x141   : > { %v1003_v0 = vadd.f32 %v1002_v41, %v890_v3  ;;  %1162 = vmatmul.f32.gmra.mxu0 %v2905_v53  ;;  %v780_v10 = vadd.f32 %v779_v6, %v2660_v8  ;;  %v1897_v8 = vld [vmem:[%s2212_s22 + $0x168] sm:$0xff] }
 0x143   : > { %v2913_v50 = vadd.f32 %v1115_v17, %v1003_v0  ;;  %826 = vmatmul.f32.gmra.mxu1 %v2889_v5  ;;  %939 = vmatmul.f32.gmra.mxu2 %v273_v42  ;;  %v275_v0 = vld [vmem:[%s2212_s22 + $0x15a] sm:$0xff] }
 0x145   : > { %1052 = vmatmul.f32.gmra.mxu3 %v1896_v24 }
 0x146   : > { %v892_v25 = vpop.f32.mrf.mxu2  ;;  %v1118_v26 = vpop.f32.mrf.mxu0 }
 0x147   : > { %v893_v47 = vadd.f32 %v892_v25, %v780_v10 }
 0x148   : > { %v782_v36 = vpop.f32.mrf.mxu1  ;;  %v1005_v33 = vpop.f32.mrf.mxu3 }
 0x149   : > { %v1006_v57 = vadd.f32 %v1005_v33, %v893_v47  ;;  %1165 = vmatmul.f32.gmra.mxu0 %v2921_v49  ;;  %v783_v16 = vadd.f32 %v782_v36, %v2674_v13 }
 0x14b   : > { %v2926_v43 = vadd.f32 %v1118_v26, %v1006_v57  ;;  %829 = vmatmul.f32.gmra.mxu1 %v2905_v53  ;;  %942 = vmatmul.f32.gmra.mxu2 %v274_v59  ;;  %v2941_v26 = vld [vmem:[%s2212_s22 + $0x171] sm:$0xff] }
 0x14c   : > { %v276_v59 = vld [vmem:[%s2212_s22 + $0x16a] sm:$0xff] }
 0x14d   : > { %1055 = vmatmul.f32.gmra.mxu3 %v1897_v8  ;;  %v1899_v8 = vld [vmem:[%s2212_s22 + $0x180] sm:$0xff] }
 0x14e   : > { %v895_v17 = vpop.f32.mrf.mxu2  ;;  %v1121_v3 = vpop.f32.mrf.mxu0 }
 0x14f   : > { %v896_v6 = vadd.f32 %v895_v17, %v783_v16 }
 0x150   : > { %v785_v41 = vpop.f32.mrf.mxu1  ;;  %v1008_v42 = vpop.f32.mrf.mxu3 }
 0x151   : > { %v1009_v24 = vadd.f32 %v1008_v42, %v896_v6  ;;  %1168 = vmatmul.f32.gmra.mxu0 %v2931_v56  ;;  %v786_v13 = vadd.f32 %v785_v41, %v2694_v27 }
 0x153   : > { %v2935_v10 = vadd.f32 %v1121_v3, %v1009_v24  ;;  %832 = vmatmul.f32.gmra.mxu1 %v2921_v49  ;;  %945 = vmatmul.f32.gmra.mxu2 %v275_v0  ;;  %v2951_v3 = vld [vmem:[%s2212_s22 + $0x181] sm:$0xff]  ;;  %v277_v0 = vld [vmem:[%s2212_s22 + $0x172] sm:$0xff] }
 0x155   : > { %1058 = vmatmul.f32.gmra.mxu3 %v2519_v60 }
 0x156   : > { %v898_v20 = vpop.f32.mrf.mxu2  ;;  %v1124_v25 = vpop.f32.mrf.mxu0 }
 0x157   : > { %v899_v47 = vadd.f32 %v898_v20, %v786_v13  ;;  %v1900_v13 = vld [vmem:[%s2212_s22 + $0x188] sm:$0xff] }
 0x158   : > { %v788_v36 = vpop.f32.mrf.mxu1  ;;  %v1011_v33 = vpop.f32.mrf.mxu3 }
 0x159   : > { %v1012_v57 = vadd.f32 %v1011_v33, %v899_v47  ;;  %1171 = vmatmul.f32.gmra.mxu0 %v2941_v26  ;;  %v789_v60 = vadd.f32 %v788_v36, %v2708_v37  ;;  %v1932_v36 = vld [vmem:[%s2212_s22 + $0x189] sm:$0xff] }
 0x15b   : > { %v2946_v16 = vadd.f32 %v1124_v25, %v1012_v57  ;;  %835 = vmatmul.f32.gmra.mxu1 %v2931_v56  ;;  %948 = vmatmul.f32.gmra.mxu2 %v276_v59 }
 0x15d   : > { %1061 = vmatmul.f32.gmra.mxu3 %v1899_v8  ;;  %v1933_v8 = vld [vmem:[%s2212_s22 + $0x1a] sm:$0xff] }
 0x15e   : > { %v901_v27 = vpop.f32.mrf.mxu2  ;;  %v1127_v17 = vpop.f32.mrf.mxu0 }
 0x15f   : > { %v902_v6 = vadd.f32 %v901_v27, %v789_v60  ;;  %v1965_v60 = vld [vmem:[%s2212_s22 + $0x30] sm:$0xff] }
 0x160   : > { %v791_v41 = vpop.f32.mrf.mxu1  ;;  %v1014_v42 = vpop.f32.mrf.mxu3 }
 0x161   : > { %v1015_v24 = vadd.f32 %v1014_v42, %v902_v6  ;;  %1174 = vmatmul.f32.gmra.mxu0 %v2951_v3  ;;  %v792_v37 = vadd.f32 %v791_v41, %v2728_v48  ;;  %v2029_v42 = vld [vmem:[%s2212_s22 + $0x32] sm:$0xff] }
 0x163   : > { %v2956_v20 = vadd.f32 %v1127_v17, %v1015_v24  ;;  %838 = vmatmul.f32.gmra.mxu1 %v2941_v26  ;;  %951 = vmatmul.f32.gmra.mxu2 %v277_v0 }
 0x165   : > { %1064 = vmatmul.f32.gmra.mxu3 %v1900_v13 }
 0x166   : > { %v904_v25 = vpop.f32.mrf.mxu2  ;;  %v1130_v47 = vpop.f32.mrf.mxu0 }
 0x167   : > { %v905_v33 = vadd.f32 %v904_v25, %v792_v37  ;;  %v1934_v37 = vld [vmem:[%s2212_s22 + $0x22] sm:$0xff]  ;;  %v1966_v25 = vld [vmem:[%s2212_s22 + $0x38] sm:$0xff] }
 0x168   : > { %v794_v59 = vpop.f32.mrf.mxu1  ;;  %v1017_v57 = vpop.f32.mrf.mxu3 }
 0x169   : > { %v1018_v27 = vadd.f32 %v1017_v57, %v905_v33  ;;  %1177 = vmatmul.f32.gmra.mxu0 %v1932_v36  ;;  %v795_v48 = vadd.f32 %v794_v59, %v2618_v44  ;;  %v2030_v59 = vld [vmem:[%s2212_s22 + $0x3a] sm:$0xff] }
 0x16b   : > { %v2963_v17 = vadd.f32 %v1130_v47, %v1018_v27  ;;  %1197 = vmatmul.f32.vlgmr.msra.gmra.mxu1 %v1933_v8  ;;  %1310 = vmatmul.f32.vlgmr.msra.gmra.mxu2 %v1965_v60  ;;  %v1967_v27 = vld [vmem:[%s2212_s22 + $0x48] sm:$0xff] }
 0x16d   : > { %1423 = vmatmul.f32.vlgmr.msra.gmra.mxu3 %v2560_v18 }
 0x16e   : > { %v907_v6 = vpop.f32.mrf.mxu2  ;;  %v1133_v41 = vpop.f32.mrf.mxu0 }
 0x16f   : > { %v908_v0 = vadd.f32 %v907_v6, %v795_v48  ;;  %v1999_v6 = vld [vmem:[%s2212_s22 + $0x49] sm:$0xff] }
 0x170   : > { %v797_v24 = vpop.f32.mrf.mxu1  ;;  %v1020_v13 = vpop.f32.mrf.mxu3 }
 0x171   : > { %v1021_v33 = vadd.f32 %v1020_v13, %v908_v0  ;;  %1536 = vmatmul.f32.vlgmr.msra.gmra.mxu0 %v2029_v42  ;;  %v798_v44 = vadd.f32 %v797_v24, %v2635_v55  ;;  %v2031_v24 = vld [vmem:[%s2212_s22 + $0x4a] sm:$0xff] }
 0x173   : > { %v2970_v47 = vadd.f32 %v1133_v41, %v1021_v33  ;;  %1200 = vmatmul.f32.gmra.mxu1 %v1934_v37  ;;  %1313 = vmatmul.f32.gmra.mxu2 %v1966_v25  ;;  %v1968_v33 = vld [vmem:[%s2212_s22 + $0x50] sm:$0xff] }
 0x175   : > { %1426 = vmatmul.f32.gmra.mxu3 %v2569_v21 }
 0x176   : > { %v910_v18 = vpop.f32.mrf.mxu2  ;;  %v1136_v36 = vpop.f32.mrf.mxu0 }
 0x177   : > { %v911_v57 = vadd.f32 %v910_v18, %v798_v44  ;;  %v2000_v18 = vld [vmem:[%s2212_s22 + $0x51] sm:$0xff] }
 0x178   : > { %v800_v8 = vpop.f32.mrf.mxu1  ;;  %v1023_v60 = vpop.f32.mrf.mxu3 }
 0x179   : > { %v1024_v48 = vadd.f32 %v1023_v60, %v911_v57  ;;  %1539 = vmatmul.f32.gmra.mxu0 %v2030_v59  ;;  %v801_v55 = vadd.f32 %v800_v8, %v2652_v4  ;;  %v2032_v8 = vld [vmem:[%s2212_s22 + $0x52] sm:$0xff] }
 0x17b   : > { %v2977_v41 = vadd.f32 %v1136_v36, %v1024_v48  ;;  %1203 = vmatmul.f32.gmra.mxu1 %v2029_v42  ;;  %1316 = vmatmul.f32.gmra.mxu2 %v1967_v27 }
 0x17d   : > { %1429 = vmatmul.f32.gmra.mxu3 %v1999_v6  ;;  %v1969_v6 = vld [vmem:[%s2212_s22 + $0x60] sm:$0xff] }
 0x17e   : > { %v913_v21 = vpop.f32.mrf.mxu2  ;;  %v1139_v0 = vpop.f32.mrf.mxu0 }
 0x17f   : > { %v914_v13 = vadd.f32 %v913_v21, %v801_v55  ;;  %v2001_v21 = vld [vmem:[%s2212_s22 + $0x61] sm:$0xff] }
 0x180   : > { %v803_v37 = vpop.f32.mrf.mxu1  ;;  %v1026_v25 = vpop.f32.mrf.mxu3 }
 0x181   : > { %v1027_v44 = vadd.f32 %v1026_v25, %v914_v13  ;;  %1542 = vmatmul.f32.gmra.mxu0 %v2031_v24  ;;  %v804_v4 = vadd.f32 %v803_v37, %v2669_v11  ;;  %v2033_v37 = vld [vmem:[%s2212_s22 + $0x62] sm:$0xff] }
 0x183   : > { %v2983_v36 = vadd.f32 %v1139_v0, %v1027_v44  ;;  %1206 = vmatmul.f32.gmra.mxu1 %v2030_v59  ;;  %1319 = vmatmul.f32.gmra.mxu2 %v1968_v33 }
 0x185   : > { %1432 = vmatmul.f32.gmra.mxu3 %v2000_v18  ;;  %v1970_v18 = vld [vmem:[%s2212_s22 + $0x68] sm:$0xff] }
 0x186   : > { %v916_v42 = vpop.f32.mrf.mxu2  ;;  %v1142_v57 = vpop.f32.mrf.mxu0 }
 0x187   : > { %v917_v60 = vadd.f32 %v916_v42, %v804_v4  ;;  %v2002_v42 = vld [vmem:[%s2212_s22 + $0x69] sm:$0xff] }
 0x188   : > { %v806_v27 = vpop.f32.mrf.mxu1  ;;  %v1029_v48 = vpop.f32.mrf.mxu3 }
 0x189   : > { %v1030_v55 = vadd.f32 %v1029_v48, %v917_v60  ;;  %1545 = vmatmul.f32.gmra.mxu0 %v2032_v8  ;;  %v807_v11 = vadd.f32 %v806_v27, %v2686_v23  ;;  %v2034_v27 = vld [vmem:[%s2212_s22 + $0x6a] sm:$0xff] }
 0x18b   : > { %v2989_v0 = vadd.f32 %v1142_v57, %v1030_v55  ;;  %1209 = vmatmul.f32.gmra.mxu1 %v2031_v24  ;;  %1322 = vmatmul.f32.gmra.mxu2 %v1969_v6 }
 0x18d   : > { %1435 = vmatmul.f32.gmra.mxu3 %v2001_v21  ;;  %v1971_v21 = vld [vmem:[%s2212_s22 + $0x78] sm:$0xff] }
 0x18e   : > { %v919_v59 = vpop.f32.mrf.mxu2  ;;  %v1145_v13 = vpop.f32.mrf.mxu0 }
 0x18f   : > { %v920_v25 = vadd.f32 %v919_v59, %v807_v11  ;;  %v2003_v59 = vld [vmem:[%s2212_s22 + $0x79] sm:$0xff] }
 0x190   : > { %v809_v33 = vpop.f32.mrf.mxu1  ;;  %v1032_v44 = vpop.f32.mrf.mxu3 }
 0x191   : > { %v1033_v4 = vadd.f32 %v1032_v44, %v920_v25  ;;  %1548 = vmatmul.f32.gmra.mxu0 %v2033_v37  ;;  %v810_v23 = vadd.f32 %v809_v33, %v2703_v32  ;;  %v2035_v33 = vld [vmem:[%s2212_s22 + $0x7a] sm:$0xff] }
 0x193   : > { %v2995_v57 = vadd.f32 %v1145_v13, %v1033_v4  ;;  %1212 = vmatmul.f32.gmra.mxu1 %v2032_v8  ;;  %1325 = vmatmul.f32.gmra.mxu2 %v1970_v18 }
 0x195   : > { %1438 = vmatmul.f32.gmra.mxu3 %v2002_v42  ;;  %v1972_v42 = vld [vmem:[%s2212_s22 + $0x80] sm:$0xff] }
 0x196   : > { %v922_v24 = vpop.f32.mrf.mxu2  ;;  %v1148_v60 = vpop.f32.mrf.mxu0 }
 0x197   : > { %v923_v48 = vadd.f32 %v922_v24, %v810_v23  ;;  %v2004_v24 = vld [vmem:[%s2212_s22 + $0x81] sm:$0xff] }
 0x198   : > { %v812_v6 = vpop.f32.mrf.mxu1  ;;  %v1035_v55 = vpop.f32.mrf.mxu3 }
 0x199   : > { %v1036_v11 = vadd.f32 %v1035_v55, %v923_v48  ;;  %1551 = vmatmul.f32.gmra.mxu0 %v2034_v27  ;;  %v813_v32 = vadd.f32 %v812_v6, %v2720_v40  ;;  %v2036_v6 = vld [vmem:[%s2212_s22 + $0x82] sm:$0xff] }
 0x19b   : > { %v3001_v13 = vadd.f32 %v1148_v60, %v1036_v11  ;;  %1215 = vmatmul.f32.gmra.mxu1 %v2033_v37  ;;  %1328 = vmatmul.f32.gmra.mxu2 %v1971_v21 }
 0x19d   : > { %1441 = vmatmul.f32.gmra.mxu3 %v2003_v59  ;;  %v1973_v59 = vld [vmem:[%s2212_s22 + $0x90] sm:$0xff] }
 0x19e   : > { %v925_v8 = vpop.f32.mrf.mxu2  ;;  %v1151_v25 = vpop.f32.mrf.mxu0 }
 0x19f   : > { %v926_v44 = vadd.f32 %v925_v8, %v813_v32  ;;  %v2005_v8 = vld [vmem:[%s2212_s22 + $0x91] sm:$0xff] }
 0x1a0   : > { %v815_v18 = vpop.f32.mrf.mxu1  ;;  %v1038_v4 = vpop.f32.mrf.mxu3 }
 0x1a1   : > { %v1039_v23 = vadd.f32 %v1038_v4, %v926_v44  ;;  %1554 = vmatmul.f32.gmra.mxu0 %v2035_v33  ;;  %v816_v40 = vadd.f32 %v815_v18, %v2737_v54  ;;  %v2037_v18 = vld [vmem:[%s2212_s22 + $0x92] sm:$0xff] }
 0x1a3   : > { %v3007_v60 = vadd.f32 %v1151_v25, %v1039_v23  ;;  %1218 = vmatmul.f32.gmra.mxu1 %v2034_v27  ;;  %1331 = vmatmul.f32.gmra.mxu2 %v1972_v42 }
 0x1a5   : > { %1444 = vmatmul.f32.gmra.mxu3 %v2004_v24  ;;  %v1974_v24 = vld [vmem:[%s2212_s22 + $0x98] sm:$0xff] }
 0x1a6   : > { %v928_v37 = vpop.f32.mrf.mxu2  ;;  %v1154_v48 = vpop.f32.mrf.mxu0 }
 0x1a7   : > { %v929_v55 = vadd.f32 %v928_v37, %v816_v40  ;;  %v2006_v37 = vld [vmem:[%s2212_s22 + $0x99] sm:$0xff] }
 0x1a8   : > { %v818_v21 = vpop.f32.mrf.mxu1  ;;  %v1041_v11 = vpop.f32.mrf.mxu3 }
 0x1a9   : > { %v1042_v32 = vadd.f32 %v1041_v11, %v929_v55  ;;  %1557 = vmatmul.f32.gmra.mxu0 %v2036_v6  ;;  %v819_v54 = vadd.f32 %v818_v21, %v2628_v46  ;;  %v2038_v21 = vld [vmem:[%s2212_s22 + $0x9a] sm:$0xff] }
 0x1ab   : > { %v3013_v25 = vadd.f32 %v1154_v48, %v1042_v32  ;;  %1221 = vmatmul.f32.gmra.mxu1 %v2035_v33  ;;  %1334 = vmatmul.f32.gmra.mxu2 %v1973_v59 }
 0x1ad   : > { %1447 = vmatmul.f32.gmra.mxu3 %v2005_v8  ;;  %v1975_v8 = vld [vmem:[%s2212_s22 + $0xa8] sm:$0xff] }
 0x1ae   : > { %v931_v27 = vpop.f32.mrf.mxu2  ;;  %v1157_v44 = vpop.f32.mrf.mxu0 }
 0x1af   : > { %v932_v4 = vadd.f32 %v931_v27, %v819_v54  ;;  %v2007_v27 = vld [vmem:[%s2212_s22 + $0xa9] sm:$0xff] }
 0x1b0   : > { %v821_v42 = vpop.f32.mrf.mxu1  ;;  %v1044_v23 = vpop.f32.mrf.mxu3 }
 0x1b1   : > { %v1045_v40 = vadd.f32 %v1044_v23, %v932_v4  ;;  %1560 = vmatmul.f32.gmra.mxu0 %v2037_v18  ;;  %v822_v46 = vadd.f32 %v821_v42, %v2642_v1  ;;  %v2039_v42 = vld [vmem:[%s2212_s22 + $0xaa] sm:$0xff] }
 0x1b3   : > { %v3019_v48 = vadd.f32 %v1157_v44, %v1045_v40  ;;  %1224 = vmatmul.f32.gmra.mxu1 %v2036_v6  ;;  %1337 = vmatmul.f32.gmra.mxu2 %v1974_v24 }
 0x1b5   : > { %1450 = vmatmul.f32.gmra.mxu3 %v2006_v37  ;;  %v1976_v37 = vld [vmem:[%s2212_s22 + $0xb0] sm:$0xff] }
 0x1b6   : > { %v934_v33 = vpop.f32.mrf.mxu2  ;;  %v1160_v55 = vpop.f32.mrf.mxu0 }
 0x1b7   : > { %v935_v11 = vadd.f32 %v934_v33, %v822_v46  ;;  %v2008_v33 = vld [vmem:[%s2212_s22 + $0xb1] sm:$0xff] }
 0x1b8   : > { %v824_v59 = vpop.f32.mrf.mxu1  ;;  %v1047_v32 = vpop.f32.mrf.mxu3 }
 0x1b9   : > { %v1048_v54 = vadd.f32 %v1047_v32, %v935_v11  ;;  %1563 = vmatmul.f32.gmra.mxu0 %v2038_v21  ;;  %v825_v1 = vadd.f32 %v824_v59, %v2662_v14  ;;  %v2040_v59 = vld [vmem:[%s2212_s22 + $0xb2] sm:$0xff] }
 0x1bb   : > { %v3025_v44 = vadd.f32 %v1160_v55, %v1048_v54  ;;  %1227 = vmatmul.f32.gmra.mxu1 %v2037_v18  ;;  %1340 = vmatmul.f32.gmra.mxu2 %v1975_v8 }
 0x1bd   : > { %1453 = vmatmul.f32.gmra.mxu3 %v2007_v27  ;;  %v1977_v27 = vld [vmem:[%s2212_s22 + $0xc0] sm:$0xff] }
 0x1be   : > { %v937_v6 = vpop.f32.mrf.mxu2  ;;  %v1163_v4 = vpop.f32.mrf.mxu0 }
 0x1bf   : > { %v938_v23 = vadd.f32 %v937_v6, %v825_v1  ;;  %v2009_v6 = vld [vmem:[%s2212_s22 + $0xc1] sm:$0xff] }
 0x1c0   : > { %v827_v24 = vpop.f32.mrf.mxu1  ;;  %v1050_v40 = vpop.f32.mrf.mxu3 }
 0x1c1   : > { %v1051_v46 = vadd.f32 %v1050_v40, %v938_v23  ;;  %1566 = vmatmul.f32.gmra.mxu0 %v2039_v42  ;;  %v828_v14 = vadd.f32 %v827_v24, %v2676_v19  ;;  %v2041_v24 = vld [vmem:[%s2212_s22 + $0xc2] sm:$0xff] }
 0x1c3   : > { %v3031_v55 = vadd.f32 %v1163_v4, %v1051_v46  ;;  %1230 = vmatmul.f32.gmra.mxu1 %v2038_v21  ;;  %1343 = vmatmul.f32.gmra.mxu2 %v1976_v37 }
 0x1c5   : > { %1456 = vmatmul.f32.gmra.mxu3 %v2008_v33  ;;  %v1978_v33 = vld [vmem:[%s2212_s22 + $0xc8] sm:$0xff] }
 0x1c6   : > { %v940_v18 = vpop.f32.mrf.mxu2  ;;  %v1166_v11 = vpop.f32.mrf.mxu0 }
 0x1c7   : > { %v941_v32 = vadd.f32 %v940_v18, %v828_v14  ;;  %v2010_v18 = vld [vmem:[%s2212_s22 + $0xc9] sm:$0xff] }
 0x1c8   : > { %v830_v8 = vpop.f32.mrf.mxu1  ;;  %v1053_v54 = vpop.f32.mrf.mxu3 }
 0x1c9   : > { %v1054_v1 = vadd.f32 %v1053_v54, %v941_v32  ;;  %1569 = vmatmul.f32.gmra.mxu0 %v2040_v59  ;;  %v831_v19 = vadd.f32 %v830_v8, %v2696_v28  ;;  %v2042_v8 = vld [vmem:[%s2212_s22 + $0xca] sm:$0xff] }
 0x1cb   : > { %v3037_v4 = vadd.f32 %v1166_v11, %v1054_v1  ;;  %1233 = vmatmul.f32.gmra.mxu1 %v2039_v42  ;;  %1346 = vmatmul.f32.gmra.mxu2 %v1977_v27 }
 0x1cd   : > { %1459 = vmatmul.f32.gmra.mxu3 %v2009_v6  ;;  %v1979_v6 = vld [vmem:[%s2212_s22 + $0xd8] sm:$0xff] }
 0x1ce   : > { %v943_v21 = vpop.f32.mrf.mxu2  ;;  %v1169_v23 = vpop.f32.mrf.mxu0 }
 0x1cf   : > { %v944_v40 = vadd.f32 %v943_v21, %v831_v19  ;;  %v2011_v21 = vld [vmem:[%s2212_s22 + $0xd9] sm:$0xff] }
 0x1d0   : > { %v833_v37 = vpop.f32.mrf.mxu1  ;;  %v1056_v46 = vpop.f32.mrf.mxu3 }
 0x1d1   : > { %v1057_v14 = vadd.f32 %v1056_v46, %v944_v40  ;;  %1572 = vmatmul.f32.gmra.mxu0 %v2041_v24  ;;  %v834_v28 = vadd.f32 %v833_v37, %v2710_v38  ;;  %v2043_v37 = vld [vmem:[%s2212_s22 + $0xda] sm:$0xff] }
 0x1d3   : > { %v3043_v11 = vadd.f32 %v1169_v23, %v1057_v14  ;;  %1236 = vmatmul.f32.gmra.mxu1 %v2040_v59  ;;  %1349 = vmatmul.f32.gmra.mxu2 %v1978_v33 }
 0x1d5   : > { %1462 = vmatmul.f32.gmra.mxu3 %v2010_v18  ;;  %v1980_v18 = vld [vmem:[%s2212_s22 + $0xe0] sm:$0xff] }
 0x1d6   : > { %v946_v42 = vpop.f32.mrf.mxu2  ;;  %v1172_v32 = vpop.f32.mrf.mxu0 }
 0x1d7   : > { %v947_v54 = vadd.f32 %v946_v42, %v834_v28  ;;  %v2012_v42 = vld [vmem:[%s2212_s22 + $0xe1] sm:$0xff] }
 0x1d8   : > { %v836_v27 = vpop.f32.mrf.mxu1  ;;  %v1059_v1 = vpop.f32.mrf.mxu3 }
 0x1d9   : > { %v1060_v19 = vadd.f32 %v1059_v1, %v947_v54  ;;  %1575 = vmatmul.f32.gmra.mxu0 %v2042_v8  ;;  %v837_v38 = vadd.f32 %v836_v27, %v2730_v51  ;;  %v2044_v27 = vld [vmem:[%s2212_s22 + $0xe2] sm:$0xff] }
 0x1db   : > { %v3049_v23 = vadd.f32 %v1172_v32, %v1060_v19  ;;  %1239 = vmatmul.f32.gmra.mxu1 %v2041_v24  ;;  %1352 = vmatmul.f32.gmra.mxu2 %v1979_v6 }
 0x1dd   : > { %1465 = vmatmul.f32.gmra.mxu3 %v2011_v21  ;;  %v1981_v21 = vld [vmem:[%s2212_s22 + $0xf0] sm:$0xff] }
 0x1de   : > { %v949_v59 = vpop.f32.mrf.mxu2  ;;  %v1175_v40 = vpop.f32.mrf.mxu0 }
 0x1df   : > { %v950_v46 = vadd.f32 %v949_v59, %v837_v38 }
 0x1e0   : > { %v839_v33 = vpop.f32.mrf.mxu1  ;;  %v1062_v14 = vpop.f32.mrf.mxu3 }
 0x1e1   : > { %v1063_v28 = vadd.f32 %v1062_v14, %v950_v46  ;;  %1578 = vmatmul.f32.gmra.mxu0 %v2043_v37  ;;  %v840_v24 = vadd.f32 %v839_v33, %v2742_v62  ;;  %v2045_v46 = vld [vmem:[%s2212_s22 + $0xf2] sm:$0xff] }
 0x1e3   : > { %v3055_v54 = vadd.f32 %v1175_v40, %v1063_v28  ;;  %1242 = vmatmul.f32.gmra.mxu1 %v2042_v8  ;;  %1355 = vmatmul.f32.gmra.mxu2 %v1980_v18  ;;  %v1982_v28 = vld [vmem:[%s2212_s22 + $0xf8] sm:$0xff] }
 0x1e5   : > { %1468 = vmatmul.f32.gmra.mxu3 %v2012_v42 }
 0x1e6   : > { %v952_v51 = vpop.f32.mrf.mxu2  ;;  %v1178_v32 = vpop.f32.mrf.mxu0 }
 0x1e7   : > { %v953_v1 = vadd.f32 %v952_v51, %v840_v24  ;;  %v2046_v51 = vld [vmem:[%s2212_s22 + $0xfa] sm:$0xff] }
 0x1e8   : > { %v1065_v6 = vpop.f32.mrf.mxu3  ;;  %v1198_v19 = vpop.f32.mrf.mxu1 }
 0x1e9   : > { %v1066_v38 = vadd.f32 %v1065_v6, %v953_v1  ;;  %1581 = vmatmul.f32.gmra.mxu0 %v2044_v27  ;;  %v1199_v8 = vadd.f32 %v1198_v19, %v2758_v45  ;;  %v1983_v19 = vld [vmem:[%s2212_s22 + $0x108] sm:$0xff] }
 0x1eb   : > { %v3060_v59 = vadd.f32 %v1178_v32, %v1066_v38  ;;  %1245 = vmatmul.f32.gmra.mxu1 %v2043_v37  ;;  %1358 = vmatmul.f32.gmra.mxu2 %v1981_v21 }
 0x1ed   : > { %1471 = vmatmul.f32.gmra.mxu3 %v2778_v58 }
 0x1ee   : > { %v1311_v62 = vpop.f32.mrf.mxu2  ;;  %v1537_v40 = vpop.f32.mrf.mxu0 }
 0x1ef   : > { %v1312_v33 = vadd.f32 %v1311_v62, %v1199_v8 }
 0x1f0   : > { %v1201_v14 = vpop.f32.mrf.mxu1  ;;  %v1424_v18 = vpop.f32.mrf.mxu3 }
 0x1f1   : > { %v1425_v42 = vadd.f32 %v1424_v18, %v1312_v33  ;;  %1584 = vmatmul.f32.gmra.mxu0 %v2045_v46  ;;  %v1202_v58 = vadd.f32 %v1201_v14, %v2767_v2  ;;  %v2047_v33 = vld [vmem:[%s2212_s22 + $0x10a] sm:$0xff] }
 0x1f3   : > { %v1538_v45 = vadd.f32 %v1537_v40, %v1425_v42  ;;  %1248 = vmatmul.f32.gmra.mxu1 %v2044_v27  ;;  %1361 = vmatmul.f32.gmra.mxu2 %v1982_v28 }
 0x1f5   : > { %1633 = vst [vmem:[%s3070_s19] sm:$0xff] %v1538_v45  ;;  %1474 = vmatmul.f32.gmra.mxu3 %v2793_v29  ;;  %v1702_v27 = vmul.f32 %v1538_v45, %v1538_v45 }
 0x1f6   : > { %v1314_v37 = vpop.f32.mrf.mxu2  ;;  %v1540_v24 = vpop.f32.mrf.mxu0 }
 0x1f7   : > { %v1315_v32 = vadd.f32 %v1314_v37, %v1202_v58  ;;  %v1984_v58 = vld [vmem:[%s2212_s22 + $0x110] sm:$0xff] }
 0x1f8   : > { %v1204_v1 = vpop.f32.mrf.mxu1  ;;  %v1427_v6 = vpop.f32.mrf.mxu3 }
 0x1f9   : > { %v1428_v21 = vadd.f32 %v1427_v6, %v1315_v32  ;;  %1587 = vmatmul.f32.gmra.mxu0 %v2046_v51  ;;  %v1205_v2 = vadd.f32 %v1204_v1, %v2785_v22  ;;  %v2048_v1 = vld [vmem:[%s2212_s22 + $0x112] sm:$0xff] }
 0x1fb   : > { %v1541_v38 = vadd.f32 %v1540_v24, %v1428_v21  ;;  %1251 = vmatmul.f32.gmra.mxu1 %v2045_v46  ;;  %1364 = vmatmul.f32.gmra.mxu2 %v1983_v19 }
 0x1fd   : > { %1634 = vst [vmem:[%s3070_s19 + $0x8] sm:$0xff] %v1541_v38  ;;  %v1665_v8 = vadd.f32 %v1541_v38, %v1538_v45  ;;  %v1703_v29 = vmul.f32 %v1541_v38, %v1541_v38  ;;  %1477 = vmatmul.f32.gmra.mxu3 %v2809_v63 }
 0x1fe   : > { %v1317_v62 = vpop.f32.mrf.mxu2  ;;  %v1543_v40 = vpop.f32.mrf.mxu0 }
 0x1ff   : > { %v1734_v14 = vadd.f32 %v1703_v29, %v1702_v27  ;;  %v1318_v18 = vadd.f32 %v1317_v62, %v1205_v2  ;;  %v1985_v27 = vld [vmem:[%s2212_s22 + $0x120] sm:$0xff] }
 0x200   : > { %v1207_v28 = vpop.f32.mrf.mxu1  ;;  %v1430_v42 = vpop.f32.mrf.mxu3 }
 0x201   : > { %v1431_v46 = vadd.f32 %v1430_v42, %v1318_v18  ;;  %1590 = vmatmul.f32.gmra.mxu0 %v2047_v33  ;;  %v1208_v22 = vadd.f32 %v1207_v28, %v2797_v12 }
 0x203   : > { %v1544_v37 = vadd.f32 %v1543_v40, %v1431_v46  ;;  %1254 = vmatmul.f32.gmra.mxu1 %v2046_v51  ;;  %1367 = vmatmul.f32.gmra.mxu2 %v1984_v58  ;;  %v2049_v40 = vld [vmem:[%s2212_s22 + $0x122] sm:$0xff] }
 0x204   : > { %v1986_v58 = vld [vmem:[%s2212_s22 + $0x128] sm:$0xff] }
 0x205   : > { %1635 = vst [vmem:[%s3070_s19 + $0x10] sm:$0xff] %v1544_v37  ;;  %v1666_v45 = vadd.f32 %v1665_v8, %v1544_v37  ;;  %v1704_v63 = vmul.f32 %v1544_v37, %v1544_v37  ;;  %1480 = vmatmul.f32.gmra.mxu3 %v2825_v15 }
 0x206   : > { %v1320_v24 = vpop.f32.mrf.mxu2  ;;  %v1546_v32 = vpop.f32.mrf.mxu0 }
 0x207   : > { %v1735_v6 = vadd.f32 %v1734_v14, %v1704_v63  ;;  %v1321_v19 = vadd.f32 %v1320_v24, %v1208_v22  ;;  %v2050_v63 = vld [vmem:[%s2212_s22 + $0x12a] sm:$0xff] }
 0x208   : > { %v1210_v21 = vpop.f32.mrf.mxu1  ;;  %v1433_v38 = vpop.f32.mrf.mxu3 }
 0x209   : > { %v1434_v2 = vadd.f32 %v1433_v38, %v1321_v19  ;;  %1593 = vmatmul.f32.gmra.mxu0 %v2048_v1  ;;  %v1211_v12 = vadd.f32 %v1210_v21, %v2816_v9  ;;  %v1987_v21 = vld [vmem:[%s2212_s22 + $0x138] sm:$0xff] }
 0x20b   : > { %v1547_v51 = vadd.f32 %v1546_v32, %v1434_v2  ;;  %1257 = vmatmul.f32.gmra.mxu1 %v2047_v33  ;;  %1370 = vmatmul.f32.gmra.mxu2 %v1985_v27 }
 0x20d   : > { %1636 = vst [vmem:[%s3070_s19 + $0x18] sm:$0xff] %v1547_v51  ;;  %v1667_v8 = vadd.f32 %v1666_v45, %v1547_v51  ;;  %v1705_v15 = vmul.f32 %v1547_v51, %v1547_v51  ;;  %1483 = vmatmul.f32.gmra.mxu3 %v2841_v30 }
 0x20e   : > { %v1323_v29 = vpop.f32.mrf.mxu2  ;;  %v1549_v62 = vpop.f32.mrf.mxu0 }
 0x20f   : > { %v1736_v14 = vadd.f32 %v1735_v6, %v1705_v15  ;;  %v1324_v18 = vadd.f32 %v1323_v29, %v1211_v12  ;;  %v2051_v12 = vld [vmem:[%s2212_s22 + $0x13a] sm:$0xff] }
 0x210   : > { %v1213_v28 = vpop.f32.mrf.mxu1  ;;  %v1436_v42 = vpop.f32.mrf.mxu3 }
 0x211   : > { %v1437_v46 = vadd.f32 %v1436_v42, %v1324_v18  ;;  %1596 = vmatmul.f32.gmra.mxu0 %v2049_v40  ;;  %v1214_v9 = vadd.f32 %v1213_v28, %v2830_v39 }
 0x213   : > { %v1550_v33 = vadd.f32 %v1549_v62, %v1437_v46  ;;  %1260 = vmatmul.f32.gmra.mxu1 %v2048_v1  ;;  %1373 = vmatmul.f32.gmra.mxu2 %v1986_v58  ;;  %v2052_v46 = vld [vmem:[%s2212_s22 + $0x142] sm:$0xff] }
 0x215   : > { %1637 = vst [vmem:[%s3070_s19 + $0x20] sm:$0xff] %v1550_v33  ;;  %v1668_v37 = vadd.f32 %v1667_v8, %v1550_v33  ;;  %v1706_v30 = vmul.f32 %v1550_v33, %v1550_v33  ;;  %1486 = vmatmul.f32.gmra.mxu3 %v2857_v34 }
 0x216   : > { %v1326_v22 = vpop.f32.mrf.mxu2  ;;  %v1552_v45 = vpop.f32.mrf.mxu0 }
 0x217   : > { %v1737_v24 = vadd.f32 %v1736_v14, %v1706_v30  ;;  %v1327_v32 = vadd.f32 %v1326_v22, %v1214_v9  ;;  %v1988_v14 = vld [vmem:[%s2212_s22 + $0x140] sm:$0xff]  ;;  %v1989_v22 = vld [vmem:[%s2212_s22 + $0x150] sm:$0xff] }
 0x218   : > { %v1216_v6 = vpop.f32.mrf.mxu1  ;;  %v1439_v19 = vpop.f32.mrf.mxu3 }
 0x219   : > { %v1440_v38 = vadd.f32 %v1439_v19, %v1327_v32  ;;  %1599 = vmatmul.f32.gmra.mxu0 %v2050_v63  ;;  %v1217_v39 = vadd.f32 %v1216_v6, %v2849_v7  ;;  %v2053_v19 = vld [vmem:[%s2212_s22 + $0x152] sm:$0xff] }
 0x21b   : > { %v1553_v1 = vadd.f32 %v1552_v45, %v1440_v38  ;;  %1263 = vmatmul.f32.gmra.mxu1 %v2049_v40  ;;  %1376 = vmatmul.f32.gmra.mxu2 %v1987_v21 }
 0x21d   : > { %1638 = vst [vmem:[%s3070_s19 + $0x28] sm:$0xff] %v1553_v1  ;;  %v1669_v27 = vadd.f32 %v1668_v37, %v1553_v1  ;;  %v1707_v34 = vmul.f32 %v1553_v1, %v1553_v1  ;;  %1489 = vmatmul.f32.gmra.mxu3 %v2873_v35 }
 0x21e   : > { %v1329_v2 = vpop.f32.mrf.mxu2  ;;  %v1555_v51 = vpop.f32.mrf.mxu0 }
 0x21f   : > { %v1738_v8 = vadd.f32 %v1737_v24, %v1707_v34  ;;  %v1330_v15 = vadd.f32 %v1329_v2, %v1217_v39 }
 0x220   : > { %v1219_v29 = vpop.f32.mrf.mxu1  ;;  %v1442_v62 = vpop.f32.mrf.mxu3 }
 0x221   : > { %v1443_v18 = vadd.f32 %v1442_v62, %v1330_v15  ;;  %1602 = vmatmul.f32.gmra.mxu0 %v2051_v12  ;;  %v1220_v7 = vadd.f32 %v1219_v29, %v2862_v61  ;;  %v2054_v15 = vld [vmem:[%s2212_s22 + $0x15a] sm:$0xff] }
 0x223   : > { %v1556_v40 = vadd.f32 %v1555_v51, %v1443_v18  ;;  %1266 = vmatmul.f32.gmra.mxu1 %v2050_v63  ;;  %1379 = vmatmul.f32.gmra.mxu2 %v1988_v14 }
 0x225   : > { %1639 = vst [vmem:[%s3070_s19 + $0x30] sm:$0xff] %v1556_v40  ;;  %v1670_v28 = vadd.f32 %v1669_v27, %v1556_v40  ;;  %v1708_v35 = vmul.f32 %v1556_v40, %v1556_v40  ;;  %1492 = vmatmul.f32.gmra.mxu3 %v2889_v5  ;;  %v1990_v27 = vld [vmem:[%s2212_s22 + $0x158] sm:$0xff]  ;;  %v1991_v40 = vld [vmem:[%s2212_s22 + $0x168] sm:$0xff] }
 0x226   : > { %v1332_v42 = vpop.f32.mrf.mxu2  ;;  %v1558_v58 = vpop.f32.mrf.mxu0 }
 0x227   : > { %v1739_v33 = vadd.f32 %v1738_v8, %v1708_v35  ;;  %v1333_v9 = vadd.f32 %v1332_v42, %v1220_v7 }
 0x228   : > { %v1222_v37 = vpop.f32.mrf.mxu1  ;;  %v1445_v30 = vpop.f32.mrf.mxu3 }
 0x229   : > { %v1446_v45 = vadd.f32 %v1445_v30, %v1333_v9  ;;  %1605 = vmatmul.f32.gmra.mxu0 %v2052_v46  ;;  %v1223_v61 = vadd.f32 %v1222_v37, %v2881_v31 }
 0x22b   : > { %v1559_v63 = vadd.f32 %v1558_v58, %v1446_v45  ;;  %1269 = vmatmul.f32.gmra.mxu1 %v2051_v12  ;;  %1382 = vmatmul.f32.gmra.mxu2 %v1989_v22  ;;  %v1992_v22 = vld [vmem:[%s2212_s22 + $0x170] sm:$0xff] }
 0x22d   : > { %1640 = vst [vmem:[%s3070_s19 + $0x38] sm:$0xff] %v1559_v63  ;;  %v1671_v24 = vadd.f32 %v1670_v28, %v1559_v63  ;;  %v1709_v5 = vmul.f32 %v1559_v63, %v1559_v63  ;;  %1495 = vmatmul.f32.gmra.mxu3 %v2905_v53 }
 0x22e   : > { %v1335_v32 = vpop.f32.mrf.mxu2  ;;  %v1561_v6 = vpop.f32.mrf.mxu0 }
 0x22f   : > { %v1740_v21 = vadd.f32 %v1739_v33, %v1709_v5  ;;  %v1336_v38 = vadd.f32 %v1335_v32, %v1223_v61  ;;  %v2056_v32 = vld [vmem:[%s2212_s22 + $0x172] sm:$0xff] }
 0x230   : > { %v1225_v1 = vpop.f32.mrf.mxu1  ;;  %v1448_v39 = vpop.f32.mrf.mxu3 }
 0x231   : > { %v1449_v34 = vadd.f32 %v1448_v39, %v1336_v38  ;;  %1608 = vmatmul.f32.gmra.mxu0 %v2053_v19  ;;  %v1226_v31 = vadd.f32 %v1225_v1, %v2894_v52  ;;  %v1993_v1 = vld [vmem:[%s2212_s22 + $0x180] sm:$0xff] }
 0x233   : > { %v1562_v2 = vadd.f32 %v1561_v6, %v1449_v34  ;;  %1272 = vmatmul.f32.gmra.mxu1 %v2052_v46  ;;  %1385 = vmatmul.f32.gmra.mxu2 %v1990_v27  ;;  %v2055_v46 = vld [vmem:[%s2212_s22 + $0x16a] sm:$0xff] }
 0x235   : > { %1641 = vst [vmem:[%s3070_s19 + $0x40] sm:$0xff] %v1562_v2  ;;  %v1672_v51 = vadd.f32 %v1671_v24, %v1562_v2  ;;  %v1710_v53 = vmul.f32 %v1562_v2, %v1562_v2  ;;  %1498 = vmatmul.f32.gmra.mxu3 %v2921_v49 }
 0x236   : > { %v1338_v12 = vpop.f32.mrf.mxu2  ;;  %v1564_v8 = vpop.f32.mrf.mxu0 }
 0x237   : > { %v1741_v29 = vadd.f32 %v1740_v21, %v1710_v53  ;;  %v1339_v62 = vadd.f32 %v1338_v12, %v1226_v31 }
 0x238   : > { %v1228_v14 = vpop.f32.mrf.mxu1  ;;  %v1451_v18 = vpop.f32.mrf.mxu3 }
 0x239   : > { %v1452_v7 = vadd.f32 %v1451_v18, %v1339_v62  ;;  %1611 = vmatmul.f32.gmra.mxu0 %v2054_v15  ;;  %v1229_v52 = vadd.f32 %v1228_v14, %v2913_v50  ;;  %v2026_v14 = vld [vmem:[%s2212_s22 + $0x189] sm:$0xff] }
 0x23b   : > { %v1565_v28 = vadd.f32 %v1564_v8, %v1452_v7  ;;  %1275 = vmatmul.f32.gmra.mxu1 %v2053_v19  ;;  %1388 = vmatmul.f32.gmra.mxu2 %v1991_v40 }
 0x23d   : > { %1642 = vst [vmem:[%s3070_s19 + $0x48] sm:$0xff] %v1565_v28  ;;  %v1673_v35 = vadd.f32 %v1672_v51, %v1565_v28  ;;  %v1711_v49 = vmul.f32 %v1565_v28, %v1565_v28  ;;  %1501 = vmatmul.f32.gmra.mxu3 %v2931_v56  ;;  %v2057_v51 = vld [vmem:[%s2212_s22 + $0x182] sm:$0xff] }
 0x23e   : > { %v1341_v42 = vpop.f32.mrf.mxu2  ;;  %v1567_v58 = vpop.f32.mrf.mxu0 }
 0x23f   : > { %v1742_v33 = vadd.f32 %v1741_v29, %v1711_v49  ;;  %v1342_v9 = vadd.f32 %v1341_v42, %v1229_v52  ;;  %v1994_v29 = vld [vmem:[%s2212_s22 + $0x188] sm:$0xff] }
 0x240   : > { %v1231_v37 = vpop.f32.mrf.mxu1  ;;  %v1454_v30 = vpop.f32.mrf.mxu3  ;;  %v2058_v52 = vld [vmem:[%s2212_s22 + $0x18a] sm:$0xff] }
 0x241   : > { %v1455_v45 = vadd.f32 %v1454_v30, %v1342_v9  ;;  %1614 = vmatmul.f32.gmra.mxu0 %v2055_v46  ;;  %v1232_v50 = vadd.f32 %v1231_v37, %v2926_v43  ;;  %v2027_v9 = vld [vmem:[%s2212_s22 + $0x199] sm:$0xff] }
 0x243   : > { %v1568_v63 = vadd.f32 %v1567_v58, %v1455_v45  ;;  %1278 = vmatmul.f32.gmra.mxu1 %v2054_v15  ;;  %1391 = vmatmul.f32.gmra.mxu2 %v1992_v22 }
 0x245   : > { %1643 = vst [vmem:[%s3070_s19 + $0x50] sm:$0xff] %v1568_v63  ;;  %v1674_v61 = vadd.f32 %v1673_v35, %v1568_v63  ;;  %v1712_v56 = vmul.f32 %v1568_v63, %v1568_v63  ;;  %1504 = vmatmul.f32.gmra.mxu3 %v2941_v26 }
 0x246   : > { %v1344_v24 = vpop.f32.mrf.mxu2  ;;  %v1570_v5 = vpop.f32.mrf.mxu0 }
 0x247   : > { %v1743_v6 = vadd.f32 %v1742_v33, %v1712_v56  ;;  %v1345_v19 = vadd.f32 %v1344_v24, %v1232_v50  ;;  %v2059_v50 = vld [vmem:[%s2212_s22 + $0x19a] sm:$0xff] }
 0x248   : > { %v1234_v21 = vpop.f32.mrf.mxu1  ;;  %v1457_v38 = vpop.f32.mrf.mxu3 }
 0x249   : > { %v1458_v39 = vadd.f32 %v1457_v38, %v1345_v19  ;;  %1617 = vmatmul.f32.gmra.mxu0 %v2056_v32  ;;  %v1235_v43 = vadd.f32 %v1234_v21, %v2935_v10  ;;  %v2028_v19 = vld [vmem:[%s2212_s22 + $0x1a1] sm:$0xff] }
 0x24b   : > { %v1571_v27 = vadd.f32 %v1570_v5, %v1458_v39  ;;  %1281 = vmatmul.f32.gmra.mxu1 %v2055_v46  ;;  %1394 = vmatmul.f32.gmra.mxu2 %v1993_v1  ;;  %v1995_v46 = vld [vmem:[%s2212_s22 + $0x198] sm:$0xff] }
 0x24d   : > { %1644 = vst [vmem:[%s3070_s19 + $0x58] sm:$0xff] %v1571_v27  ;;  %v1675_v26 = vadd.f32 %v1674_v61, %v1571_v27  ;;  %v1713_v34 = vmul.f32 %v1571_v27, %v1571_v27  ;;  %1507 = vmatmul.f32.gmra.mxu3 %v2951_v3 }
 0x24e   : > { %v1347_v2 = vpop.f32.mrf.mxu2  ;;  %v1573_v31 = vpop.f32.mrf.mxu0 }
 0x24f   : > { %v1744_v53 = vadd.f32 %v1743_v6, %v1713_v34  ;;  %v1348_v12 = vadd.f32 %v1347_v2, %v1235_v43  ;;  %v2060_v43 = vld [vmem:[%s2212_s22 + $0x1a2] sm:$0xff] }
 0x250   : > { %v1237_v8 = vpop.f32.mrf.mxu1  ;;  %v1460_v15 = vpop.f32.mrf.mxu3 }
 0x251   : > { %v1461_v62 = vadd.f32 %v1460_v15, %v1348_v12  ;;  %1620 = vmatmul.f32.gmra.mxu0 %v2057_v51  ;;  %v1238_v3 = vadd.f32 %v1237_v8, %v2946_v16 }
 0x253   : > { %v1574_v10 = vadd.f32 %v1573_v31, %v1461_v62  ;;  %1284 = vmatmul.f32.gmra.mxu1 %v2056_v32  ;;  %1397 = vmatmul.f32.gmra.mxu2 %v1994_v29  ;;  %v1996_v32 = vld [vmem:[%s2212_s22 + $0x1a0] sm:$0xff]  ;;  %s1868_s22 = sshll.u32 %s3191_s13, 1 }
 0x254   : > { %s181_s23 = scalar_lea.vmem %s3189_s3, %s1868_s22 }
 0x255   : > { %1645 = vst [vmem:[%s3070_s19 + $0x60] sm:$0xff] %v1574_v10  ;;  %v1676_v18 = vadd.f32 %v1675_v26, %v1574_v10  ;;  %v1714_v40 = vmul.f32 %v1574_v10, %v1574_v10  ;;  %1510 = vmatmul.f32.gmra.mxu3 %v2026_v14 }
 0x256   : > { %v1350_v7 = vpop.f32.mrf.mxu2  ;;  %v1576_v28 = vpop.f32.mrf.mxu0 }
 0x257   : > { %v1745_v35 = vadd.f32 %v1744_v53, %v1714_v40  ;;  %v1351_v49 = vadd.f32 %v1350_v7, %v1238_v3 }
 0x258   : > { %v1240_v42 = vpop.f32.mrf.mxu1  ;;  %v1463_v58 = vpop.f32.mrf.mxu3 }
 0x259   : > { %v1464_v33 = vadd.f32 %v1463_v58, %v1351_v49  ;;  %1623 = vmatmul.f32.gmra.mxu0 %v2058_v52  ;;  %v1241_v16 = vadd.f32 %v1240_v42, %v2956_v20 }
 0x25b   : > { %v1577_v37 = vadd.f32 %v1576_v28, %v1464_v33  ;;  %1287 = vmatmul.f32.gmra.mxu1 %v2057_v51  ;;  %1400 = vmatmul.f32.gmra.mxu2 %v1995_v46 }
 0x25d   : > { %1646 = vst [vmem:[%s3070_s19 + $0x68] sm:$0xff] %v1577_v37  ;;  %v1677_v30 = vadd.f32 %v1676_v18, %v1577_v37  ;;  %v1715_v22 = vmul.f32 %v1577_v37, %v1577_v37  ;;  %1513 = vmatmul.f32.gmra.mxu3 %v2027_v9 }
 0x25e   : > { %v1353_v45 = vpop.f32.mrf.mxu2  ;;  %v1579_v63 = vpop.f32.mrf.mxu0 }
 0x25f   : > { %v1746_v61 = vadd.f32 %v1745_v35, %v1715_v22  ;;  %v1354_v56 = vadd.f32 %v1353_v45, %v1241_v16 }
 0x260   : > { %v1243_v24 = vpop.f32.mrf.mxu1  ;;  %v1466_v5 = vpop.f32.mrf.mxu3 }
 0x261   : > { %v1467_v6 = vadd.f32 %v1466_v5, %v1354_v56  ;;  %1626 = vmatmul.f32.gmra.mxu0 %v2059_v50  ;;  %v1244_v20 = vadd.f32 %v1243_v24, %v2963_v17 }
 0x263   : > { %v1580_v21 = vadd.f32 %v1579_v63, %v1467_v6  ;;  %1290 = vmatmul.f32.gmra.mxu1 %v2058_v52  ;;  %1403 = vmatmul.f32.gmra.mxu2 %v1996_v32 }
 0x265   : > { %1647 = vst [vmem:[%s3070_s19 + $0x70] sm:$0xff] %v1580_v21  ;;  %v1678_v38 = vadd.f32 %v1677_v30, %v1580_v21  ;;  %v1716_v1 = vmul.f32 %v1580_v21, %v1580_v21  ;;  %1516 = vmatmul.f32.gmra.mxu3 %v2028_v19 }
 0x266   : > { %v1356_v39 = vpop.f32.mrf.mxu2  ;;  %v1582_v27 = vpop.f32.mrf.mxu0 }
 0x267   : > { %v1747_v26 = vadd.f32 %v1746_v61, %v1716_v1  ;;  %v1357_v34 = vadd.f32 %v1356_v39, %v1244_v20 }
 0x268   : > { %v1246_v2 = vpop.f32.mrf.mxu1  ;;  %v1469_v31 = vpop.f32.mrf.mxu3 }
 0x269   : > { %v1470_v51 = vadd.f32 %v1469_v31, %v1357_v34  ;;  %1629 = vmatmul.f32.gmra.mxu0 %v2060_v43  ;;  %v1247_v12 = vadd.f32 %v1246_v2, %v2970_v47 }
 0x26b   : > { %v1583_v53 = vadd.f32 %v1582_v27, %v1470_v51 }
 0x26d   : > { %1648 = vst [vmem:[%s3070_s19 + $0x78] sm:$0xff] %v1583_v53  ;;  %v1679_v17 = vadd.f32 %v1678_v38, %v1583_v53  ;;  %v1717_v8 = vmul.f32 %v1583_v53, %v1583_v53 }
 0x26e   : > { %v1359_v15 = vpop.f32.mrf.mxu2  ;;  %v1585_v29 = vpop.f32.mrf.mxu0 }
 0x26f   : > { %v1748_v62 = vadd.f32 %v1747_v26, %v1717_v8  ;;  %v1360_v14 = vadd.f32 %v1359_v15, %v1247_v12 }
 0x270   : > { %v1249_v10 = vpop.f32.mrf.mxu1  ;;  %v1472_v3 = vpop.f32.mrf.mxu3 }
 0x271   : > { %v1473_v18 = vadd.f32 %v1472_v3, %v1360_v14  ;;  %v1250_v7 = vadd.f32 %v1249_v10, %v2977_v41 }
 0x273   : > { %v1586_v40 = vadd.f32 %v1585_v29, %v1473_v18 }
 0x275   : > { %1649 = vst [vmem:[%s3070_s19 + $0x80] sm:$0xff] %v1586_v40  ;;  %v1680_v28 = vadd.f32 %v1679_v17, %v1586_v40  ;;  %v1718_v52 = vmul.f32 %v1586_v40, %v1586_v40 }
 0x276   : > { %v1362_v35 = vpop.f32.mrf.mxu2  ;;  %v1588_v49 = vpop.f32.mrf.mxu0 }
 0x277   : > { %v1749_v47 = vadd.f32 %v1748_v62, %v1718_v52  ;;  %v1363_v42 = vadd.f32 %v1362_v35, %v1250_v7 }
 0x278   : > { %v1252_v58 = vpop.f32.mrf.mxu1  ;;  %v1475_v46 = vpop.f32.mrf.mxu3 }
 0x279   : > { %v1476_v33 = vadd.f32 %v1475_v46, %v1363_v42  ;;  %v1253_v37 = vadd.f32 %v1252_v58, %v2983_v36 }
 0x27b   : > { %v1589_v9 = vadd.f32 %v1588_v49, %v1476_v33 }
 0x27d   : > { %1650 = vst [vmem:[%s3070_s19 + $0x88] sm:$0xff] %v1589_v9  ;;  %v1681_v16 = vadd.f32 %v1680_v28, %v1589_v9  ;;  %v1719_v30 = vmul.f32 %v1589_v9, %v1589_v9 }
 0x27e   : > { %v1365_v22 = vpop.f32.mrf.mxu2  ;;  %v1591_v45 = vpop.f32.mrf.mxu0 }
 0x27f   : > { %v1750_v41 = vadd.f32 %v1749_v47, %v1719_v30  ;;  %v1366_v63 = vadd.f32 %v1365_v22, %v1253_v37 }
 0x280   : > { %v1255_v50 = vpop.f32.mrf.mxu1  ;;  %v1478_v61 = vpop.f32.mrf.mxu3 }
 0x281   : > { %v1479_v56 = vadd.f32 %v1478_v61, %v1366_v63  ;;  %v1256_v5 = vadd.f32 %v1255_v50, %v2989_v0 }
 0x283   : > { %v1592_v24 = vadd.f32 %v1591_v45, %v1479_v56 }
 0x285   : > { %1651 = vst [vmem:[%s3070_s19 + $0x90] sm:$0xff] %v1592_v24  ;;  %v1682_v32 = vadd.f32 %v1681_v16, %v1592_v24  ;;  %v1720_v6 = vmul.f32 %v1592_v24, %v1592_v24 }
 0x286   : > { %v1368_v19 = vpop.f32.mrf.mxu2  ;;  %v1594_v21 = vpop.f32.mrf.mxu0 }
 0x287   : > { %v1751_v36 = vadd.f32 %v1750_v41, %v1720_v6  ;;  %v1369_v20 = vadd.f32 %v1368_v19, %v1256_v5 }
 0x288   : > { %v1258_v38 = vpop.f32.mrf.mxu1  ;;  %v1481_v1 = vpop.f32.mrf.mxu3 }
 0x289   : > { %v1482_v39 = vadd.f32 %v1481_v1, %v1369_v20  ;;  %v1259_v43 = vadd.f32 %v1258_v38, %v2995_v57 }
 0x28b   : > { %v1595_v27 = vadd.f32 %v1594_v21, %v1482_v39 }
 0x28d   : > { %1652 = vst [vmem:[%s3070_s19 + $0x98] sm:$0xff] %v1595_v27  ;;  %v1683_v26 = vadd.f32 %v1682_v32, %v1595_v27  ;;  %v1721_v34 = vmul.f32 %v1595_v27, %v1595_v27 }
 0x28e   : > { %v1371_v2 = vpop.f32.mrf.mxu2  ;;  %v1597_v31 = vpop.f32.mrf.mxu0 }
 0x28f   : > { %v1752_v0 = vadd.f32 %v1751_v36, %v1721_v34  ;;  %v1372_v51 = vadd.f32 %v1371_v2, %v1259_v43 }
 0x290   : > { %v1261_v53 = vpop.f32.mrf.mxu1  ;;  %v1484_v12 = vpop.f32.mrf.mxu3 }
 0x291   : > { %v1485_v17 = vadd.f32 %v1484_v12, %v1372_v51  ;;  %v1262_v15 = vadd.f32 %v1261_v53, %v3001_v13 }
 0x293   : > { %v1598_v8 = vadd.f32 %v1597_v31, %v1485_v17 }
 0x295   : > { %1653 = vst [vmem:[%s3070_s19 + $0xa0] sm:$0xff] %v1598_v8  ;;  %v1684_v29 = vadd.f32 %v1683_v26, %v1598_v8  ;;  %v1722_v62 = vmul.f32 %v1598_v8, %v1598_v8 }
 0x296   : > { %v1374_v14 = vpop.f32.mrf.mxu2  ;;  %v1600_v10 = vpop.f32.mrf.mxu0 }
 0x297   : > { %v1753_v57 = vadd.f32 %v1752_v0, %v1722_v62  ;;  %v1375_v3 = vadd.f32 %v1374_v14, %v1262_v15 }
 0x298   : > { %v1264_v18 = vpop.f32.mrf.mxu1  ;;  %v1487_v40 = vpop.f32.mrf.mxu3 }
 0x299   : > { %v1488_v7 = vadd.f32 %v1487_v40, %v1375_v3  ;;  %v1265_v52 = vadd.f32 %v1264_v18, %v3007_v60 }
 0x29b   : > { %v1601_v28 = vadd.f32 %v1600_v10, %v1488_v7 }
 0x29d   : > { %1654 = vst [vmem:[%s3070_s19 + $0xa8] sm:$0xff] %v1601_v28  ;;  %v1685_v35 = vadd.f32 %v1684_v29, %v1601_v28  ;;  %v1723_v49 = vmul.f32 %v1601_v28, %v1601_v28 }
 0x29e   : > { %v1377_v47 = vpop.f32.mrf.mxu2  ;;  %v1603_v42 = vpop.f32.mrf.mxu0 }
 0x29f   : > { %v1754_v13 = vadd.f32 %v1753_v57, %v1723_v49  ;;  %v1378_v58 = vadd.f32 %v1377_v47, %v1265_v52 }
 0x2a0   : > { %v1267_v46 = vpop.f32.mrf.mxu1  ;;  %v1490_v33 = vpop.f32.mrf.mxu3 }
 0x2a1   : > { %v1491_v9 = vadd.f32 %v1490_v33, %v1378_v58  ;;  %v1268_v16 = vadd.f32 %v1267_v46, %v3013_v25 }
 0x2a3   : > { %v1604_v37 = vadd.f32 %v1603_v42, %v1491_v9 }
 0x2a5   : > { %1655 = vst [vmem:[%s3070_s19 + $0xb0] sm:$0xff] %v1604_v37  ;;  %v1686_v30 = vadd.f32 %v1685_v35, %v1604_v37  ;;  %v1724_v22 = vmul.f32 %v1604_v37, %v1604_v37 }
 0x2a6   : > { %v1380_v45 = vpop.f32.mrf.mxu2  ;;  %v1606_v41 = vpop.f32.mrf.mxu0 }
 0x2a7   : > { %v1755_v60 = vadd.f32 %v1754_v13, %v1724_v22  ;;  %v1381_v63 = vadd.f32 %v1380_v45, %v1268_v16 }
 0x2a8   : > { %v1270_v50 = vpop.f32.mrf.mxu1  ;;  %v1493_v61 = vpop.f32.mrf.mxu3 }
 0x2a9   : > { %v1494_v56 = vadd.f32 %v1493_v61, %v1381_v63  ;;  %v1271_v5 = vadd.f32 %v1270_v50, %v3019_v48 }
 0x2ab   : > { %v1607_v24 = vadd.f32 %v1606_v41, %v1494_v56 }
 0x2ad   : > { %1656 = vst [vmem:[%s3070_s19 + $0xb8] sm:$0xff] %v1607_v24  ;;  %v1687_v32 = vadd.f32 %v1686_v30, %v1607_v24  ;;  %v1725_v6 = vmul.f32 %v1607_v24, %v1607_v24 }
 0x2ae   : > { %v1383_v19 = vpop.f32.mrf.mxu2  ;;  %v1609_v21 = vpop.f32.mrf.mxu0 }
 0x2af   : > { %v1756_v25 = vadd.f32 %v1755_v60, %v1725_v6  ;;  %v1384_v36 = vadd.f32 %v1383_v19, %v1271_v5 }
 0x2b0   : > { %v1273_v20 = vpop.f32.mrf.mxu1  ;;  %v1496_v38 = vpop.f32.mrf.mxu3 }
 0x2b1   : > { %v1497_v1 = vadd.f32 %v1496_v38, %v1384_v36  ;;  %v1274_v27 = vadd.f32 %v1273_v20, %v3025_v44 }
 0x2b3   : > { %v1610_v39 = vadd.f32 %v1609_v21, %v1497_v1 }
 0x2b5   : > { %1657 = vst [vmem:[%s3070_s19 + $0xc0] sm:$0xff] %v1610_v39  ;;  %v1688_v43 = vadd.f32 %v1687_v32, %v1610_v39  ;;  %v1726_v26 = vmul.f32 %v1610_v39, %v1610_v39 }
 0x2b6   : > { %v1386_v34 = vpop.f32.mrf.mxu2  ;;  %v1612_v2 = vpop.f32.mrf.mxu0 }
 0x2b7   : > { %v1757_v48 = vadd.f32 %v1756_v25, %v1726_v26  ;;  %v1387_v31 = vadd.f32 %v1386_v34, %v1274_v27 }
 0x2b8   : > { %v1276_v0 = vpop.f32.mrf.mxu1  ;;  %v1499_v51 = vpop.f32.mrf.mxu3 }
 0x2b9   : > { %v1500_v53 = vadd.f32 %v1499_v51, %v1387_v31  ;;  %v1277_v17 = vadd.f32 %v1276_v0, %v3031_v55 }
 0x2bb   : > { %v1613_v12 = vadd.f32 %v1612_v2, %v1500_v53 }
 0x2bd   : > { %1658 = vst [vmem:[%s3070_s19 + $0xc8] sm:$0xff] %v1613_v12  ;;  %v1689_v8 = vadd.f32 %v1688_v43, %v1613_v12  ;;  %v1727_v15 = vmul.f32 %v1613_v12, %v1613_v12 }
 0x2be   : > { %v1389_v29 = vpop.f32.mrf.mxu2  ;;  %v1615_v62 = vpop.f32.mrf.mxu0 }
 0x2bf   : > { %v1758_v44 = vadd.f32 %v1757_v48, %v1727_v15  ;;  %v1390_v14 = vadd.f32 %v1389_v29, %v1277_v17 }
 0x2c0   : > { %v1279_v10 = vpop.f32.mrf.mxu1  ;;  %v1502_v57 = vpop.f32.mrf.mxu3 }
 0x2c1   : > { %v1503_v3 = vadd.f32 %v1502_v57, %v1390_v14  ;;  %v1280_v40 = vadd.f32 %v1279_v10, %v3037_v4 }
 0x2c3   : > { %v1616_v18 = vadd.f32 %v1615_v62, %v1503_v3 }
 0x2c5   : > { %1659 = vst [vmem:[%s3070_s19 + $0xd0] sm:$0xff] %v1616_v18  ;;  %v1690_v7 = vadd.f32 %v1689_v8, %v1616_v18  ;;  %v1728_v28 = vmul.f32 %v1616_v18, %v1616_v18 }
 0x2c6   : > { %v1392_v52 = vpop.f32.mrf.mxu2  ;;  %v1618_v35 = vpop.f32.mrf.mxu0 }
 0x2c7   : > { %v1759_v55 = vadd.f32 %v1758_v44, %v1728_v28  ;;  %v1393_v49 = vadd.f32 %v1392_v52, %v1280_v40 }
 0x2c8   : > { %v1282_v47 = vpop.f32.mrf.mxu1  ;;  %v1505_v42 = vpop.f32.mrf.mxu3 }
 0x2c9   : > { %v1506_v13 = vadd.f32 %v1505_v42, %v1393_v49  ;;  %v1283_v46 = vadd.f32 %v1282_v47, %v3043_v11 }
 0x2cb   : > { %v1619_v58 = vadd.f32 %v1618_v35, %v1506_v13 }
 0x2cd   : > { %1660 = vst [vmem:[%s3070_s19 + $0xd8] sm:$0xff] %v1619_v58  ;;  %v1691_v33 = vadd.f32 %v1690_v7, %v1619_v58  ;;  %v1729_v9 = vmul.f32 %v1619_v58, %v1619_v58 }
 0x2ce   : > { %v1395_v37 = vpop.f32.mrf.mxu2  ;;  %v1621_v16 = vpop.f32.mrf.mxu0 }
 0x2cf   : > { %v1760_v4 = vadd.f32 %v1759_v55, %v1729_v9  ;;  %v1396_v30 = vadd.f32 %v1395_v37, %v1283_v46 }
 0x2d0   : > { %v1285_v22 = vpop.f32.mrf.mxu1  ;;  %v1508_v45 = vpop.f32.mrf.mxu3 }
 0x2d1   : > { %v1509_v41 = vadd.f32 %v1508_v45, %v1396_v30  ;;  %v1286_v63 = vadd.f32 %v1285_v22, %v3049_v23 }
 0x2d3   : > { %v1622_v60 = vadd.f32 %v1621_v16, %v1509_v41 }
 0x2d5   : > { %1661 = vst [vmem:[%s3070_s19 + $0xe0] sm:$0xff] %v1622_v60  ;;  %v1692_v50 = vadd.f32 %v1691_v33, %v1622_v60  ;;  %v1730_v61 = vmul.f32 %v1622_v60, %v1622_v60 }
 0x2d6   : > { %v1398_v56 = vpop.f32.mrf.mxu2  ;;  %v1624_v24 = vpop.f32.mrf.mxu0 }
 0x2d7   : > { %v1761_v11 = vadd.f32 %v1760_v4, %v1730_v61  ;;  %v1399_v5 = vadd.f32 %v1398_v56, %v1286_v63 }
 0x2d8   : > { %v1288_v32 = vpop.f32.mrf.mxu1  ;;  %v1511_v6 = vpop.f32.mrf.mxu3 }
 0x2d9   : > { %v1512_v19 = vadd.f32 %v1511_v6, %v1399_v5  ;;  %v1289_v25 = vadd.f32 %v1288_v32, %v3055_v54 }
 0x2db   : > { %v1625_v21 = vadd.f32 %v1624_v24, %v1512_v19 }
 0x2dd   : > { %1662 = vst [vmem:[%s3070_s19 + $0xe8] sm:$0xff] %v1625_v21  ;;  %v1693_v36 = vadd.f32 %v1692_v50, %v1625_v21  ;;  %v1731_v20 = vmul.f32 %v1625_v21, %v1625_v21 }
 0x2de   : > { %v1401_v38 = vpop.f32.mrf.mxu2  ;;  %v1627_v1 = vpop.f32.mrf.mxu0 }
 0x2df   : > { %v1762_v23 = vadd.f32 %v1761_v11, %v1731_v20  ;;  %v1402_v39 = vadd.f32 %v1401_v38, %v1289_v25 }
 0x2e0   : > { %v1514_v27 = vpop.f32.mrf.mxu3  ;;  %v1291_v26 = vpop.f32.mrf.mxu1 }
 0x2e1   : > { %v1515_v43 = vadd.f32 %v1514_v27, %v1402_v39  ;;  %v1292_v2 = vadd.f32 %v1291_v26, %v3060_v59 }
 0x2e3   : > { %v1628_v34 = vadd.f32 %v1627_v1, %v1515_v43 }
 0x2e5   : > { %1663 = vst [vmem:[%s3070_s19 + $0xf0] sm:$0xff] %v1628_v34  ;;  %v1694_v48 = vadd.f32 %v1693_v36, %v1628_v34  ;;  %v1732_v31 = vmul.f32 %v1628_v34, %v1628_v34 }
 0x2e6   : > { %v1404_v0 = vpop.f32.mrf.mxu2  ;;  %v1630_v12 = vpop.f32.mrf.mxu0 }
 0x2e7   : > { %v1763_v51 = vadd.f32 %v1762_v23, %v1732_v31  ;;  %v1405_v54 = vadd.f32 %v1404_v0, %v1292_v2 }
 0x2e8   : > { %v1517_v53 = vpop.f32.mrf.mxu3 }
 0x2e9   : > { %v1518_v17 = vadd.f32 %v1517_v53, %v1405_v54 }
 0x2eb   : > { %v1631_v8 = vadd.f32 %v1630_v12, %v1518_v17 }
 0x2ed   : > { %1664 = vst [vmem:[%s3070_s19 + $0xf8] sm:$0xff] %v1631_v8  ;;  %v1695_v15 = vadd.f32 %v1694_v48, %v1631_v8  ;;  %v1733_v29 = vmul.f32 %v1631_v8, %v1631_v8 }
 0x2ef   : > { %v1696_v62 = vrot.slane %v1695_v15, 4  ;;  %v1764_v44 = vadd.f32 %v1763_v51, %v1733_v29 }
 0x2f1   : > { %v1697_v14 = vadd.f32 %v1696_v62, %v1695_v15  ;;  %v1765_v10 = vrot.slane %v1764_v44, 4 }
 0x2f3   : > { %v1698_v57 = vrot.slane %v1697_v14, 2  ;;  %v1766_v59 = vadd.f32 %v1765_v10, %v1764_v44 }
 0x2f5   : > { %v1699_v3 = vadd.f32 %v1698_v57, %v1697_v14  ;;  %v1767_v18 = vrot.slane %v1766_v59, 2 }
 0x2f7   : > { %v1700_v40 = vrot.slane %v1699_v3, 1  ;;  %v1768_v7 = vadd.f32 %v1767_v18, %v1766_v59 }
 0x2f9   : > { %v1769_v28 = vrot.slane %v1768_v7, 1  ;;  %v1701_v52 = vadd.f32 %v1700_v40, %v1699_v3 }
 0x2fb   : > { %v1770_v35 = vadd.f32 %v1769_v28, %v1768_v7 }
 0x2fd   : > { %v1772_v55 = vsel %vm1771_vm0, %v1701_v52, %v1770_v35 }
 0x2fe   : > { %1773 = vst [vmem:[%s181_s23] sm:$0x3] %v1772_v55 }
 0x2ff PF: > { %s14_s12 = sadd.s32 1, %s2127_s12  }
 0x300   : > { %p11_p4 = scmp.ge.s32.totalorder %s14_s12, 4  }
 0x302   :  { %13 = sbr.rel (!%p11_p4) target bundleno = 1 (0x1), region = 72 }

// kernel: basic_block_forward.4
= control target key start
LH: loop header
LB: loop body
LE: loop exit
PB: predicated region body
PF: predicated region fallthrough
CT: control target
= control target key end

     0   :  { %s2233_s15 = smov 0   ;;  %s3275_s0 = inlined_call_operand.vmem [shape: f32[2,16,16,128], index: 0, kind: input, shape index: {}]   ;;  %s3276_s1 = inlined_call_operand.vmem [shape: f32[1152,128], index: 1, kind: input, shape index: {}]   ;;  %s3277_s2 = inlined_call_operand.vmem [shape: f32[2,128], index: 2, kind: input, shape index: {}]   ;;  %s3278_s3 = inlined_call_operand.vmem [shape: f32[2,16,16,128], index: 3, kind: output, shape index: {0}]   ;;  %s3279_s4 = inlined_call_operand.vmem [shape: f32[2,2,128], index: 4, kind: output, shape index: {1}]  }
   0x1 LB: > { %s2123_s16 = sadd.s32 4294967295, %s2205_s15   ;;  %p2127_p0 = scmp.ge.s32.totalorder %s2205_s15, 1  ;;  %s2205_s15 = sphi %s2233_s15, %s15_s15  }
   0x2   : > { %p165_p1 = scmp.lt.s32.totalorder %s2205_s15, 3 }
   0x4   : > { %p166_p2 = pnand %p2127_p0, %p165_p1 }
   0x5   : > { %p195_p3 = scmp.lt.s32.totalorder (!%p166_p2), %s2123_s16, 1 }
   0x6   : > { %169 = sbr.rel (%p166_p2) target bundleno = 785 (0x311), region = 32 }
   0xb   : > { %v750_v0 = vld [vmem:[%s3276_s1 + $0x78] sm:$0xff]  ;;  %v749_v1 = vld [vmem:[%s3276_s1 + $0x70] sm:$0xff]  ;;  %v2207_v2 = vmov 0.0   ;;  %v748_v3 = vld [vmem:[%s3276_s1 + $0x68] sm:$0xff]  ;;  %s3281_s16 = smov (!%p195_p3, %s2123_s16), 1  ;;  %vm2034_vm0 = vcmask 1040384  }
   0xc   : > { %2137 = vmatpush.msra.mxu1 %v750_v0  ;;  %2138 = vmatpush.msra.mxu2 %v750_v0  ;;  %357 = vst [vmem:[#allocation2 + $0x80] sm:$0xff] %v2207_v2  ;;  %v747_v4 = vld [vmem:[%s3276_s1 + $0x60] sm:$0xff]  ;;  %s2135_s25 = sshll.u32 %s3281_s16, 8  ;;  %v746_v5 = vld [vmem:[%s3276_s1 + $0x58] sm:$0xff]  ;;  %v745_v9 = vld [vmem:[%s3276_s1 + $0x50] sm:$0xff] }
   0xd   : > { %2139 = vmatpush.msra.mxu3 %v750_v0  ;;  %879 = vmatpush.msra.mxu0 %v750_v0  ;;  %341 = vst [vmem:[#allocation2] sm:$0xff] %v2207_v2  ;;  %s2268_s30 = scalar_lea.vmem %s3275_s0, %s2135_s25  ;;  %v2275_v7 = vld [vmem:[%s3277_s2] ss:$0 sm:$0xff]  ;;  %v2280_v8 = vld [vmem:[%s3277_s2 + $0x1] ss:$0 sm:$0xff]  ;;  %v744_v11 = vld [vmem:[%s3276_s1 + $0x48] sm:$0xff]  ;;  %s3203_s6 = scalar_lea.vmem %s3278_s3, %s2135_s25 }
   0xe   : > { %2140 = vmatpush.msra.mxu1 %v749_v1  ;;  %2141 = vmatpush.msra.mxu2 %v749_v1  ;;  %342 = vst [vmem:[#allocation2 + $0x8] sm:$0xff] %v2207_v2  ;;  %v217_v6 = vld [vmem:[%s2268_s30 + $0x30] sm:$0xff]  ;;  %v743_v13 = vld [vmem:[%s3276_s1 + $0x40] sm:$0xff]  ;;  %v742_v15 = vld [vmem:[%s3276_s1 + $0x38] sm:$0xff]  ;;  %s2132_s25 = sshll.u32 %s3281_s16, 1 }
   0xf   : > { %2142 = vmatpush.msra.mxu3 %v749_v1  ;;  %880 = vmatpush.msra.mxu0 %v749_v1  ;;  %343 = vst [vmem:[#allocation2 + $0x10] sm:$0xff] %v2207_v2  ;;  %v250_v10 = vmul.f32 %v2275_v7, %v217_v6  ;;  %v741_v16 = vld [vmem:[%s3276_s1 + $0x30] sm:$0xff]  ;;  %v740_v17 = vld [vmem:[%s3276_s1 + $0x28] sm:$0xff]  ;;  %v739_v18 = vld [vmem:[%s3276_s1 + $0x20] sm:$0xff]  ;;  %s208_s9 = scalar_lea.vmem %s3279_s4, %s2132_s25 }
  0x10   : > { %2143 = vmatpush.msra.mxu1 %v748_v3  ;;  %2144 = vmatpush.msra.mxu2 %v748_v3  ;;  %344 = vst [vmem:[#allocation2 + $0x18] sm:$0xff] %v2207_v2  ;;  %v738_v19 = vld [vmem:[%s3276_s1 + $0x18] sm:$0xff]  ;;  %v737_v20 = vld [vmem:[%s3276_s1 + $0x10] sm:$0xff]  ;;  %v736_v21 = vld [vmem:[%s3276_s1 + $0x8] sm:$0xff] }
  0x11   : > { %2145 = vmatpush.msra.mxu3 %v748_v3  ;;  %881 = vmatpush.msra.mxu0 %v748_v3  ;;  %345 = vst [vmem:[#allocation2 + $0x20] sm:$0xff] %v2207_v2  ;;  %v283_v12 = vadd.f32 %v2280_v8, %v250_v10  ;;  %v225_v22 = vld [vmem:[%s2268_s30 + $0x70] sm:$0xff]  ;;  %v735_v23 = vld [vmem:[%s3276_s1] sm:$0xff]  ;;  %v782_v26 = vld [vmem:[%s3276_s1 + $0x178] sm:$0xff] }
  0x12   : > { %2146 = vmatpush.msra.mxu1 %v747_v4  ;;  %2147 = vmatpush.msra.mxu2 %v747_v4  ;;  %348 = vst [vmem:[#allocation2 + $0x38] sm:$0xff] %v2207_v2  ;;  %v233_v24 = vld [vmem:[%s2268_s30 + $0xb0] sm:$0xff]  ;;  %v218_v27 = vld [vmem:[%s2268_s30 + $0x38] sm:$0xff]  ;;  %v258_v28 = vmul.f32 %v2275_v7, %v225_v22  ;;  %v219_v37 = vld [vmem:[%s2268_s30 + $0x40] sm:$0xff] }
  0x13   : > { %2148 = vmatpush.msra.mxu3 %v747_v4  ;;  %882 = vmatpush.msra.mxu0 %v747_v4  ;;  %349 = vst [vmem:[#allocation2 + $0x40] sm:$0xff] %v2207_v2  ;;  %v2299_v14 = vmax.f32 %v283_v12, 0.0  ;;  %v766_v29 = vld [vmem:[%s3276_s1 + $0xf8] sm:$0xff]  ;;  %v266_v31 = vmul.f32 %v2275_v7, %v233_v24  ;;  %v781_v33 = vld [vmem:[%s3276_s1 + $0x170] sm:$0xff]  ;;  %v251_v35 = vmul.f32 %v2275_v7, %v218_v27  ;;  %v780_v40 = vld [vmem:[%s3276_s1 + $0x168] sm:$0xff] }
  0x14   : > { %2149 = vmatpush.msra.mxu1 %v746_v5  ;;  %2150 = vmatpush.msra.mxu2 %v746_v5  ;;  %352 = vst [vmem:[#allocation2 + $0x58] sm:$0xff] %v2207_v2  ;;  %v226_v30 = vld [vmem:[%s2268_s30 + $0x78] sm:$0xff]  ;;  %v765_v36 = vld [vmem:[%s3276_s1 + $0xf0] sm:$0xff]  ;;  %v227_v41 = vld [vmem:[%s2268_s30 + $0x80] sm:$0xff]  ;;  %v2384_v42 = vadd.f32 %v2280_v8, %v258_v28  ;;  %v252_v50 = vmul.f32 %v2275_v7, %v219_v37 }
  0x15   : > { %2151 = vmatpush.msra.mxu3 %v746_v5  ;;  %883 = vmatpush.msra.mxu0 %v746_v5  ;;  %353 = vst [vmem:[#allocation2 + $0x60] sm:$0xff] %v2207_v2  ;;  %v798_v32 = vld [vmem:[%s3276_s1 + $0x1f8] sm:$0xff]  ;;  %v797_v38 = vld [vmem:[%s3276_s1 + $0x1f0] sm:$0xff]  ;;  %v259_v39 = vmul.f32 %v2275_v7, %v226_v30  ;;  %v446_v43 = vld [vmem:[#allocation2 + $0x7] sm:$0xff]  ;;  %v2393_v47 = vadd.f32 %v2280_v8, %v266_v31 }
  0x16   : > { %2152 = vmatpush.msra.mxu1 %v745_v9  ;;  %2153 = vmatpush.msra.mxu2 %v745_v9  ;;  %356 = vst [vmem:[#allocation2 + $0x78] sm:$0xff] %v2207_v2  ;;  %v234_v34 = vld [vmem:[%s2268_s30 + $0xb8] sm:$0xff]  ;;  %v764_v45 = vld [vmem:[%s3276_s1 + $0xe8] sm:$0xff]  ;;  %v235_v46 = vld [vmem:[%s2268_s30 + $0xc0] sm:$0xff]  ;;  %v284_v52 = vadd.f32 %v2280_v8, %v251_v35  ;;  %v260_v54 = vmul.f32 %v2275_v7, %v227_v41  ;;  %v323_v62 = vmax.f32 %v2384_v42, 0.0 }
  0x17   : > { %2154 = vmatpush.msra.mxu3 %v745_v9  ;;  %884 = vmatpush.msra.mxu0 %v745_v9  ;;  %360 = vst [vmem:[#allocation2 + $0x98] sm:$0xff] %v2207_v2  ;;  %v267_v44 = vmul.f32 %v2275_v7, %v234_v34  ;;  %v796_v48 = vld [vmem:[%s3276_s1 + $0x1e8] sm:$0xff]  ;;  %v814_v49 = vld [vmem:[%s3276_s1 + $0x278] sm:$0xff]  ;;  %v779_v53 = vld [vmem:[%s3276_s1 + $0x160] sm:$0xff]  ;;  %v2415_v57 = vadd.f32 %v2280_v8, %v259_v39  ;;  %v331_v5 = vmax.f32 %v2393_v47, 0.0 }
  0x18   : > { %2155 = vmatpush.msra.mxu1 %v744_v11  ;;  %2156 = vmatpush.msra.mxu2 %v744_v11  ;;  %361 = vst [vmem:[#allocation2 + $0xa0] sm:$0xff] %v2207_v2  ;;  %v220_v51 = vld [vmem:[%s2268_s30 + $0x48] sm:$0xff]  ;;  %v763_v55 = vld [vmem:[%s3276_s1 + $0xe0] sm:$0xff]  ;;  %v813_v59 = vld [vmem:[%s3276_s1 + $0x270] sm:$0xff]  ;;  %v268_v60 = vmul.f32 %v2275_v7, %v235_v46  ;;  %v285_v6 = vadd.f32 %v2280_v8, %v252_v50 }
  0x19   : > { %2157 = vmatpush.msra.mxu3 %v744_v11  ;;  %885 = vmatpush.msra.mxu0 %v744_v11  ;;  %420 = vst [vmem:[#allocation2 + $0x88] sm:$0xff] %v2299_v14  ;;  %v228_v56 = vld [vmem:[%s2268_s30 + $0x88] sm:$0xff]  ;;  %v795_v58 = vld [vmem:[%s3276_s1 + $0x1e0] sm:$0xff]  ;;  %v2428_v63 = vadd.f32 %v2280_v8, %v267_v44  ;;  %v778_v0 = vld [vmem:[%s3276_s1 + $0x158] sm:$0xff]  ;;  %v253_v3 = vmul.f32 %v2275_v7, %v220_v51 }
  0x1a   : > { %2158 = vmatpush.msra.mxu1 %v743_v13  ;;  %2159 = vmatpush.msra.mxu2 %v743_v13  ;;  %364 = vst [vmem:[#allocation2 + $0xb8] sm:$0xff] %v2207_v2  ;;  %v211_v61 = vld [vmem:[%s2268_s30] sm:$0xff]  ;;  %v762_v1 = vld [vmem:[%s3276_s1 + $0xd8] sm:$0xff]  ;;  %v236_v4 = vld [vmem:[%s2268_s30 + $0xc8] sm:$0xff]  ;;  %v261_v11 = vmul.f32 %v2275_v7, %v228_v56 }
  0x1b   : > { %2160 = vmatpush.msra.mxu3 %v743_v13  ;;  %886 = vmatpush.msra.mxu0 %v743_v13  ;;  %365 = vst [vmem:[#allocation2 + $0xc0] sm:$0xff] %v2207_v2  ;;  %v794_v9 = vld [vmem:[%s3276_s1 + $0x1d8] sm:$0xff]  ;;  %v812_v10 = vld [vmem:[%s3276_s1 + $0x268] sm:$0xff]  ;;  %v221_v12 = vld [vmem:[%s2268_s30 + $0x50] sm:$0xff]  ;;  %v2450_v13 = vmax.f32 %v284_v52, 0.0  ;;  %v269_v24 = vmul.f32 %v2275_v7, %v236_v4  ;;  %v332_v27 = vmax.f32 %v2428_v63, 0.0  ;;  %v286_v28 = vadd.f32 %v2280_v8, %v253_v3 }
  0x1c   : > { %2161 = vmatpush.msra.mxu1 %v742_v15  ;;  %2162 = vmatpush.msra.mxu2 %v742_v15  ;;  %368 = vst [vmem:[#allocation2 + $0xd8] sm:$0xff] %v2207_v2  ;;  %v793_v22 = vld [vmem:[%s3276_s1 + $0x1d0] sm:$0xff]  ;;  %v776_v30 = vld [vmem:[%s3276_s1 + $0x148] sm:$0xff]  ;;  %v254_v31 = vmul.f32 %v2275_v7, %v221_v12  ;;  %v294_v34 = vadd.f32 %v2280_v8, %v261_v11  ;;  %v775_v41 = vld [vmem:[%s3276_s1 + $0x140] sm:$0xff] }
  0x1d   : > { %2163 = vmatpush.msra.mxu3 %v742_v15  ;;  %887 = vmatpush.msra.mxu0 %v742_v15  ;;  %369 = vst [vmem:[#allocation2 + $0xe0] sm:$0xff] %v2207_v2  ;;  %v2453_v15 = vadd.f32 %v2280_v8, %v260_v54  ;;  %v792_v35 = vld [vmem:[%s3276_s1 + $0x1c8] sm:$0xff]  ;;  %v791_v42 = vld [vmem:[%s3276_s1 + $0x1c0] sm:$0xff]  ;;  %v302_v46 = vadd.f32 %v2280_v8, %v269_v24  ;;  %v213_v50 = vld [vmem:[%s2268_s30 + $0x10] sm:$0xff]  ;;  %v2512_v51 = vmax.f32 %v286_v28, 0.0 }
  0x1e   : > { %2164 = vmatpush.msra.mxu1 %v741_v16  ;;  %2165 = vmatpush.msra.mxu2 %v741_v16  ;;  %372 = vst [vmem:[#allocation2 + $0xf8] sm:$0xff] %v2207_v2  ;;  %v760_v37 = vld [vmem:[%s3276_s1 + $0xc8] sm:$0xff]  ;;  %v287_v52 = vadd.f32 %v2280_v8, %v254_v31  ;;  %v238_v54 = vld [vmem:[%s2268_s30 + $0xd8] sm:$0xff]  ;;  %v759_v4 = vld [vmem:[%s3276_s1 + $0xc0] sm:$0xff] }
  0x1f   : > { %2166 = vmatpush.msra.mxu3 %v741_v16  ;;  %888 = vmatpush.msra.mxu0 %v741_v16  ;;  %373 = vst [vmem:[#allocation2 + $0x100] sm:$0xff] %v2207_v2  ;;  %v447_v16 = vld [vmem:[#allocation2 + $0xf] sm:$0xff]  ;;  %v325_v39 = vmax.f32 %v2453_v15, 0.0  ;;  %v790_v11 = vld [vmem:[%s3276_s1 + $0x1b8] sm:$0xff] }
  0x20   : > { %2167 = vmatpush.msra.mxu1 %v740_v17  ;;  %2168 = vmatpush.msra.mxu2 %v740_v17  ;;  %376 = vst [vmem:[#allocation2 + $0x118] sm:$0xff] %v2207_v2  ;;  %v2344_v25 = vld [vmem:[#allocation2 + $0x87] sm:$0xff]  ;;  %v2529_v3 = vmax.f32 %v287_v52, 0.0 }
  0x21   : > { %2169 = vmatpush.msra.mxu3 %v740_v17  ;;  %889 = vmatpush.msra.mxu0 %v740_v17  ;;  %377 = vst [vmem:[#allocation2 + $0x120] sm:$0xff] %v2207_v2  ;;  %v777_v17 = vld [vmem:[%s3276_s1 + $0x150] sm:$0xff]  ;;  %v808_v12 = vld [vmem:[%s3276_s1 + $0x248] sm:$0xff] }
  0x22   : > { %2170 = vmatpush.msra.mxu1 %v739_v18  ;;  %2171 = vmatpush.msra.mxu2 %v739_v18  ;;  %380 = vst [vmem:[#allocation2 + $0x138] sm:$0xff] %v2207_v2 }
  0x23   : > { %2172 = vmatpush.msra.mxu3 %v739_v18  ;;  %381 = vst [vmem:[#allocation2 + $0x140] sm:$0xff] %v2207_v2  ;;  %890 = vmatpush.msra.mxu0 %v739_v18  ;;  %v244_v18 = vmul.f32 %v2275_v7, %v211_v61 }
  0x24   : > { %2173 = vmatpush.msra.mxu1 %v738_v19  ;;  %2174 = vmatpush.msra.mxu2 %v738_v19  ;;  %384 = vst [vmem:[#allocation2 + $0x158] sm:$0xff] %v2207_v2 }
  0x25   : > { %2175 = vmatpush.msra.mxu3 %v738_v19  ;;  %385 = vst [vmem:[#allocation2 + $0x160] sm:$0xff] %v2207_v2  ;;  %891 = vmatpush.msra.mxu0 %v738_v19  ;;  %v229_v19 = vld [vmem:[%s2268_s30 + $0x90] sm:$0xff] }
  0x26   : > { %2176 = vmatpush.msra.mxu1 %v737_v20  ;;  %2177 = vmatpush.msra.mxu2 %v737_v20  ;;  %388 = vst [vmem:[#allocation2 + $0x178] sm:$0xff] %v2207_v2 }
  0x27   : > { %2178 = vmatpush.msra.mxu3 %v737_v20  ;;  %389 = vst [vmem:[#allocation2 + $0x180] sm:$0xff] %v2207_v2  ;;  %892 = vmatpush.msra.mxu0 %v737_v20  ;;  %v324_v20 = vmax.f32 %v2415_v57, 0.0 }
  0x28   : > { %2179 = vmatpush.msra.mxu1 %v736_v21  ;;  %2180 = vmatpush.msra.mxu2 %v736_v21  ;;  %392 = vst [vmem:[#allocation2 + $0x198] sm:$0xff] %v2207_v2 }
  0x29   : > { %2181 = vmatpush.msra.mxu3 %v736_v21  ;;  %393 = vst [vmem:[#allocation2 + $0x1a0] sm:$0xff] %v2207_v2  ;;  %893 = vmatpush.msra.mxu0 %v736_v21  ;;  %v301_v21 = vadd.f32 %v2280_v8, %v268_v60  ;;  %v246_v60 = vmul.f32 %v2275_v7, %v213_v50 }
  0x2a   : > { %2182 = vmatpush.msra.mxu1 %v735_v23  ;;  %2183 = vmatpush.msra.mxu2 %v735_v23  ;;  %396 = vst [vmem:[#allocation2 + $0x1b8] sm:$0xff] %v2207_v2 }
  0x2b   : > { %919 = vmatmul.f32.vlgmr.msra.gmra.mxu1 %v2344_v25  ;;  %397 = vst [vmem:[#allocation2 + $0x1c0] sm:$0xff] %v2207_v2  ;;  %2184 = vmatpush.msra.mxu3 %v735_v23 }
  0x2c   : > { %1105 = vmatpush.msrb.mxu2 %v782_v26  ;;  %400 = vst [vmem:[#allocation2 + $0x1d8] sm:$0xff] %v2207_v2  ;;  %992 = vmatpush.msrb.mxu1 %v766_v29  ;;  %v212_v26 = vld [vmem:[%s2268_s30 + $0x8] sm:$0xff]  ;;  %v761_v29 = vld [vmem:[%s3276_s1 + $0xd0] sm:$0xff] }
  0x2d   : > { %401 = vst [vmem:[#allocation2 + $0x1e0] sm:$0xff] %v2207_v2  ;;  %1218 = vmatpush.msrb.mxu3 %v798_v32  ;;  %894 = vmatpush.msra.mxu0 %v735_v23  ;;  %v811_v23 = vld [vmem:[%s3276_s1 + $0x260] sm:$0xff]  ;;  %v237_v32 = vld [vmem:[%s2268_s30 + $0xd0] sm:$0xff]  ;;  %v245_v44 = vmul.f32 %v2275_v7, %v212_v26 }
  0x2e   : > { %1106 = vmatpush.msrb.mxu2 %v781_v33  ;;  %404 = vst [vmem:[#allocation2 + $0x1f8] sm:$0xff] %v2207_v2  ;;  %993 = vmatpush.msrb.mxu1 %v765_v36  ;;  %v2481_v33 = vmax.f32 %v285_v6, 0.0  ;;  %v810_v36 = vld [vmem:[%s3276_s1 + $0x258] sm:$0xff]  ;;  %v270_v47 = vmul.f32 %v2275_v7, %v237_v32  ;;  %v223_v26 = vld [vmem:[%s2268_s30 + $0x60] sm:$0xff] }
  0x2f   : > { %405 = vst [vmem:[#allocation2 + $0x200] sm:$0xff] %v2207_v2  ;;  %1219 = vmatpush.msrb.mxu3 %v797_v38  ;;  %895 = vmatmul.f32.vlgmr.msra.gmra.mxu0 %v446_v43  ;;  %v262_v38 = vmul.f32 %v2275_v7, %v229_v19  ;;  %v809_v43 = vld [vmem:[%s3276_s1 + $0x250] sm:$0xff]  ;;  %v279_v19 = vadd.f32 %v2280_v8, %v246_v60  ;;  %v214_v32 = vld [vmem:[%s2268_s30 + $0x18] sm:$0xff] }
  0x30   : > { %1107 = vmatpush.msrb.mxu2 %v780_v40  ;;  %408 = vst [vmem:[#allocation2 + $0x218] sm:$0xff] %v2207_v2  ;;  %994 = vmatpush.msrb.mxu1 %v764_v45  ;;  %v277_v40 = vadd.f32 %v2280_v8, %v244_v18  ;;  %v333_v45 = vmax.f32 %v301_v21, 0.0  ;;  %v303_v63 = vadd.f32 %v2280_v8, %v270_v47  ;;  %v773_v18 = vld [vmem:[%s3276_s1 + $0x130] sm:$0xff] }
  0x31   : > { %409 = vst [vmem:[#allocation2 + $0x220] sm:$0xff] %v2207_v2  ;;  %1220 = vmatpush.msrb.mxu3 %v796_v48  ;;  %1331 = vmatpush.msrb.mxu0 %v814_v49  ;;  %v222_v48 = vld [vmem:[%s2268_s30 + $0x58] sm:$0xff]  ;;  %v295_v56 = vadd.f32 %v2280_v8, %v262_v38  ;;  %v789_v21 = vld [vmem:[%s3276_s1 + $0x1b0] sm:$0xff] }
  0x32   : > { %410 = vst [vmem:[#allocation2 + $0x228] sm:$0xff] %v2207_v2  ;;  %1108 = vmatpush.msrb.mxu2 %v779_v53  ;;  %995 = vmatpush.msrb.mxu1 %v763_v55  ;;  %v230_v49 = vld [vmem:[%s2268_s30 + $0x98] sm:$0xff]  ;;  %v255_v53 = vmul.f32 %v2275_v7, %v222_v48  ;;  %v2518_v55 = vmax.f32 %v294_v34, 0.0  ;;  %v239_v34 = vld [vmem:[%s2268_s30 + $0xe0] sm:$0xff]  ;;  %v788_v48 = vld [vmem:[%s3276_s1 + $0x1a8] sm:$0xff] }
  0x33   : > { %411 = vst [vmem:[#allocation2 + $0x230] sm:$0xff] %v2207_v2  ;;  %1221 = vmatpush.msrb.mxu3 %v795_v58  ;;  %1332 = vmatpush.msrb.mxu0 %v813_v59  ;;  %v263_v57 = vmul.f32 %v2275_v7, %v230_v49  ;;  %v2522_v58 = vmax.f32 %v277_v40, 0.0  ;;  %v278_v59 = vadd.f32 %v2280_v8, %v245_v44  ;;  %v772_v44 = vld [vmem:[%s3276_s1 + $0x128] sm:$0xff]  ;;  %v806_v49 = vld [vmem:[%s3276_s1 + $0x238] sm:$0xff] }
  0x34   : > { %412 = vst [vmem:[#allocation2 + $0x238] sm:$0xff] %v2207_v2  ;;  %1109 = vmatpush.msrb.mxu2 %v778_v0  ;;  %996 = vmatpush.msrb.mxu1 %v762_v1  ;;  %v271_v0 = vmul.f32 %v2275_v7, %v238_v54  ;;  %v288_v6 = vadd.f32 %v2280_v8, %v255_v53  ;;  %v756_v53 = vld [vmem:[%s3276_s1 + $0xa8] sm:$0xff]  ;;  %v771_v54 = vld [vmem:[%s3276_s1 + $0x120] sm:$0xff] }
  0x35   : > { %428 = vst [vmem:[#allocation2 + $0x108] sm:$0xff] %v323_v62  ;;  %1222 = vmatpush.msrb.mxu3 %v794_v9  ;;  %1333 = vmatpush.msrb.mxu0 %v812_v10  ;;  %v334_v62 = vmax.f32 %v302_v46, 0.0  ;;  %v2541_v10 = vmax.f32 %v295_v56, 0.0  ;;  %v296_v15 = vadd.f32 %v2280_v8, %v263_v57  ;;  %v272_v38 = vmul.f32 %v2275_v7, %v239_v34  ;;  %v787_v57 = vld [vmem:[%s3276_s1 + $0x1a0] sm:$0xff] }
  0x36   : > { %436 = vst [vmem:[#allocation2 + $0x188] sm:$0xff] %v331_v5  ;;  %1110 = vmatpush.msrb.mxu2 %v777_v17  ;;  %997 = vmatpush.msrb.mxu1 %v761_v29  ;;  %v774_v5 = vld [vmem:[%s3276_s1 + $0x138] sm:$0xff]  ;;  %v2569_v24 = vmax.f32 %v288_v6, 0.0 }
  0x37   : > { %421 = vst [vmem:[#allocation2 + $0x90] sm:$0xff] %v2450_v13  ;;  %1223 = vmatpush.msrb.mxu3 %v793_v22  ;;  %1334 = vmatpush.msrb.mxu0 %v811_v23  ;;  %v758_v17 = vld [vmem:[%s3276_s1 + $0xb8] sm:$0xff]  ;;  %v807_v22 = vld [vmem:[%s3276_s1 + $0x240] sm:$0xff]  ;;  %v304_v23 = vadd.f32 %v2280_v8, %v271_v0  ;;  %v2574_v29 = vmax.f32 %v296_v15, 0.0  ;;  %v305_v46 = vadd.f32 %v2280_v8, %v272_v38 }
  0x38   : > { %429 = vst [vmem:[#allocation2 + $0x110] sm:$0xff] %v324_v20  ;;  %898 = vmatmul.f32.gmra.mxu0 %v447_v16  ;;  %1111 = vmatpush.msrb.mxu2 %v776_v30  ;;  %v2552_v16 = vmax.f32 %v278_v59, 0.0  ;;  %v335_v20 = vmax.f32 %v303_v63, 0.0  ;;  %v256_v30 = vmul.f32 %v2275_v7, %v223_v26  ;;  %v805_v59 = vld [vmem:[%s3276_s1 + $0x230] sm:$0xff]  ;;  %v786_v26 = vld [vmem:[%s3276_s1 + $0x198] sm:$0xff]  ;;  %v803_v38 = vld [vmem:[%s3276_s1 + $0x220] sm:$0xff] }
  0x39   : > { %437 = vst [vmem:[#allocation2 + $0x190] sm:$0xff] %v332_v27  ;;  %1224 = vmatpush.msrb.mxu3 %v792_v35  ;;  %1335 = vmatpush.msrb.mxu0 %v810_v36  ;;  %v231_v27 = vld [vmem:[%s2268_s30 + $0xa0] sm:$0xff]  ;;  %v2581_v36 = vmax.f32 %v279_v19, 0.0  ;;  %v336_v40 = vmax.f32 %v304_v23, 0.0  ;;  %v337_v60 = vmax.f32 %v305_v46, 0.0 }
  0x3a   : > { %422 = vst [vmem:[#allocation2 + $0xa8] sm:$0xff] %v2481_v33  ;;  %998 = vmatpush.msrb.mxu1 %v760_v37  ;;  %1112 = vmatpush.msrb.mxu2 %v775_v41  ;;  %v264_v31 = vmul.f32 %v2275_v7, %v231_v27  ;;  %v247_v37 = vmul.f32 %v2275_v7, %v214_v32  ;;  %v804_v27 = vld [vmem:[%s3276_s1 + $0x228] sm:$0xff]  ;;  %v769_v32 = vld [vmem:[%s3276_s1 + $0x110] sm:$0xff] }
  0x3b   : > { %430 = vst [vmem:[#allocation2 + $0x128] sm:$0xff] %v325_v39  ;;  %1225 = vmatpush.msrb.mxu3 %v791_v42  ;;  %1336 = vmatpush.msrb.mxu0 %v809_v43  ;;  %v289_v41 = vadd.f32 %v2280_v8, %v256_v30  ;;  %v757_v43 = vld [vmem:[%s3276_s1 + $0xb0] sm:$0xff] }
  0x3c   : > { %v462_v61 = vld [vmem:[#allocation2 + $0x107] sm:$0xff]  ;;  %438 = vst [vmem:[#allocation2 + $0x1a8] sm:$0xff] %v333_v45  ;;  %999 = vmatpush.msrb.mxu1 %v759_v4  ;;  %1113 = vmatpush.msrb.mxu2 %v774_v5  ;;  %v297_v42 = vadd.f32 %v2280_v8, %v264_v31  ;;  %v280_v45 = vadd.f32 %v2280_v8, %v247_v37  ;;  %v754_v31 = vld [vmem:[%s3276_s1 + $0x98] sm:$0xff]  ;;  %v785_v37 = vld [vmem:[%s3276_s1 + $0x190] sm:$0xff] }
  0x3d   : > { %943 = vmatmul.f32.vlgmr.msra.gmra.mxu2 %v462_v61  ;;  %v470_v1 = vld [vmem:[#allocation2 + $0x187] sm:$0xff]  ;;  %423 = vst [vmem:[#allocation2 + $0xb0] sm:$0xff] %v2512_v51  ;;  %1226 = vmatpush.msrb.mxu3 %v790_v11  ;;  %v2607_v50 = vmax.f32 %v289_v41, 0.0 }
  0x3e   : > { %967 = vmatmul.f32.vlgmr.msra.gmra.mxu3 %v470_v1  ;;  %v2538_v9 = vld [vmem:[#allocation2 + $0x8f] sm:$0xff]  ;;  %431 = vst [vmem:[#allocation2 + $0x130] sm:$0xff] %v2518_v55  ;;  %1337 = vmatpush.msrb.mxu0 %v808_v12  ;;  %v2609_v52 = vmax.f32 %v297_v42, 0.0  ;;  %v2620_v56 = vmax.f32 %v280_v45, 0.0  ;;  %v215_v4 = vld [vmem:[%s2268_s30 + $0x20] sm:$0xff] }
  0x3f   : > { %922 = vmatmul.f32.gmra.mxu1 %v2538_v9  ;;  %414 = vst [vmem:[#allocation2 + $0x28] sm:$0xff] %v2522_v58  ;;  %1114 = vmatpush.msrb.mxu2 %v773_v18  ;;  %v463_v28 = vld [vmem:[#allocation2 + $0x10f] sm:$0xff]  ;;  %v248_v11 = vmul.f32 %v2275_v7, %v215_v4 }
  0x40   : > { %439 = vst [vmem:[#allocation2 + $0x1b0] sm:$0xff] %v334_v62  ;;  %1000 = vmatpush.msrb.mxu1 %v758_v17  ;;  %1227 = vmatpush.msrb.mxu3 %v789_v21  ;;  %v471_v35 = vld [vmem:[#allocation2 + $0x18f] sm:$0xff]  ;;  %v770_v21 = vld [vmem:[%s3276_s1 + $0x118] sm:$0xff] }
  0x41   : > { %424 = vst [vmem:[#allocation2 + $0xc8] sm:$0xff] %v2529_v3  ;;  %1338 = vmatpush.msrb.mxu0 %v807_v22  ;;  %v2585_v39 = vld [vmem:[#allocation2 + $0xa7] sm:$0xff]  ;;  %1115 = vmatpush.msrb.mxu2 %v772_v44  ;;  %v281_v22 = vadd.f32 %v2280_v8, %v248_v11  ;;  %v862_v11 = vld [vmem:[%s3276_s1 + $0x3f8] sm:$0xff] }
  0x42   : > { %432 = vst [vmem:[#allocation2 + $0x148] sm:$0xff] %v2541_v10  ;;  %1001 = vmatpush.msrb.mxu1 %v757_v43  ;;  %1228 = vmatpush.msrb.mxu3 %v788_v48  ;;  %v224_v61 = vld [vmem:[%s2268_s30 + $0x68] sm:$0xff]  ;;  %v753_v48 = vld [vmem:[%s3276_s1 + $0x90] sm:$0xff] }
  0x43   : > { %415 = vst [vmem:[#allocation2 + $0x30] sm:$0xff] %v2552_v16  ;;  %1339 = vmatpush.msrb.mxu0 %v806_v49  ;;  %v232_v62 = vld [vmem:[%s2268_s30 + $0xa8] sm:$0xff]  ;;  %1116 = vmatpush.msrb.mxu2 %v771_v54  ;;  %v257_v0 = vmul.f32 %v2275_v7, %v224_v61  ;;  %v2674_v34 = vmax.f32 %v281_v22, 0.0  ;;  %v751_v61 = vld [vmem:[%s3276_s1 + $0x80] sm:$0xff] }
  0x44   : > { %440 = vst [vmem:[#allocation2 + $0x1c8] sm:$0xff] %v335_v20  ;;  %1002 = vmatpush.msrb.mxu1 %v756_v53  ;;  %v2631_v63 = vld [vmem:[#allocation2 + $0x127] sm:$0xff]  ;;  %1229 = vmatpush.msrb.mxu3 %v787_v57  ;;  %v265_v1 = vmul.f32 %v2275_v7, %v232_v62  ;;  %v2641_v15 = vld [vmem:[#allocation2 + $0xaf] sm:$0xff] }
  0x45   : > { %946 = vmatmul.f32.gmra.mxu2 %v463_v28  ;;  %425 = vst [vmem:[#allocation2 + $0xd0] sm:$0xff] %v2569_v24  ;;  %v240_v5 = vld [vmem:[%s2268_s30 + $0xe8] sm:$0xff]  ;;  %1340 = vmatpush.msrb.mxu0 %v805_v59  ;;  %v290_v18 = vadd.f32 %v2280_v8, %v257_v0  ;;  %v755_v20 = vld [vmem:[%s3276_s1 + $0xa0] sm:$0xff] }
  0x46   : > { %970 = vmatmul.f32.gmra.mxu3 %v471_v35  ;;  %v2598_v47 = vld [vmem:[#allocation2 + $0x27] sm:$0xff]  ;;  %433 = vst [vmem:[#allocation2 + $0x150] sm:$0xff] %v2574_v29  ;;  %v273_v12 = vmul.f32 %v2275_v7, %v240_v5  ;;  %v298_v19 = vadd.f32 %v2280_v8, %v265_v1  ;;  %1003 = vmatpush.msrb.mxu1 %v755_v20  ;;  %v2685_v41 = vld [vmem:[#allocation2 + $0x12f] sm:$0xff]  ;;  %v846_v5 = vld [vmem:[%s3276_s1 + $0x378] sm:$0xff] }
  0x47   : > { %925 = vmatmul.f32.gmra.mxu1 %v2585_v39  ;;  %901 = vmatmul.f32.gmra.mxu0 %v2598_v47  ;;  %416 = vst [vmem:[#allocation2 + $0x48] sm:$0xff] %v2581_v36  ;;  %v472_v6 = vld [vmem:[#allocation2 + $0x1a7] sm:$0xff]  ;;  %v2662_v28 = vmax.f32 %v290_v18, 0.0  ;;  %v473_v43 = vld [vmem:[#allocation2 + $0x1af] sm:$0xff] }
  0x48   : > { %441 = vst [vmem:[#allocation2 + $0x1d0] sm:$0xff] %v336_v40  ;;  %v306_v23 = vadd.f32 %v2280_v8, %v273_v12  ;;  %v2664_v30 = vmax.f32 %v298_v19, 0.0  ;;  %1117 = vmatpush.msrb.mxu2 %v770_v21  ;;  %1230 = vmatpush.msrb.mxu3 %v786_v26  ;;  %v216_v40 = vld [vmem:[%s2268_s30 + $0x28] sm:$0xff]  ;;  %v767_v57 = vld [vmem:[%s3276_s1 + $0x100] sm:$0xff]  ;;  %v830_v12 = vld [vmem:[%s3276_s1 + $0x2f8] sm:$0xff] }
  0x49   : > { %426 = vst [vmem:[#allocation2 + $0xe8] sm:$0xff] %v2607_v50  ;;  %1341 = vmatpush.msrb.mxu0 %v804_v27  ;;  %1004 = vmatpush.msrb.mxu1 %v754_v31  ;;  %v249_v42 = vmul.f32 %v2275_v7, %v216_v40  ;;  %v2689_v44 = vld [vmem:[#allocation2 + $0xc7] sm:$0xff] }
  0x4a   : > { %434 = vst [vmem:[#allocation2 + $0x168] sm:$0xff] %v2609_v52  ;;  %v2643_v17 = vld [vmem:[#allocation2 + $0x2f] sm:$0xff]  ;;  %v338_v35 = vmax.f32 %v306_v23, 0.0  ;;  %1118 = vmatpush.msrb.mxu2 %v769_v32  ;;  %1231 = vmatpush.msrb.mxu3 %v785_v37  ;;  %v783_v59 = vld [vmem:[%s3276_s1 + $0x180] sm:$0xff]  ;;  %v878_v23 = vld [vmem:[%s3276_s1 + $0x478] sm:$0xff] }
  0x4b   : > { %417 = vst [vmem:[#allocation2 + $0x50] sm:$0xff] %v2620_v56  ;;  %1342 = vmatpush.msrb.mxu0 %v803_v38  ;;  %v282_v46 = vadd.f32 %v2280_v8, %v249_v42  ;;  %v768_v49 = vld [vmem:[%s3276_s1 + $0x108] sm:$0xff]  ;;  %1005 = vmatpush.msrb.mxu1 %v753_v48  ;;  %v802_v8 = vld [vmem:[%s3276_s1 + $0x218] sm:$0xff]  ;;  %v799_v18 = vld [vmem:[%s3276_s1 + $0x200] sm:$0xff] }
  0x4c   : > { %442 = vst [vmem:[#allocation2 + $0x1e8] sm:$0xff] %v337_v60  ;;  %v784_v7 = vld [vmem:[%s3276_s1 + $0x188] sm:$0xff]  ;;  %1119 = vmatpush.msrb.mxu2 %v768_v49  ;;  %v801_v60 = vld [vmem:[%s3276_s1 + $0x210] sm:$0xff] }
  0x4d   : > { %949 = vmatmul.f32.gmra.mxu2 %v2631_v63  ;;  %427 = vst [vmem:[#allocation2 + $0xf0] sm:$0xff] %v2662_v28  ;;  %v752_v53 = vld [vmem:[%s3276_s1 + $0x88] sm:$0xff]  ;;  %v2710_v54 = vmax.f32 %v282_v46, 0.0  ;;  %1232 = vmatpush.msrb.mxu3 %v784_v7  ;;  %v861_v37 = vld [vmem:[%s3276_s1 + $0x3f0] sm:$0xff] }
  0x4e   : > { %973 = vmatmul.f32.gmra.mxu3 %v472_v6  ;;  %435 = vst [vmem:[#allocation2 + $0x170] sm:$0xff] %v2664_v30  ;;  %v2691_v45 = vld [vmem:[#allocation2 + $0x47] sm:$0xff]  ;;  %1343 = vmatpush.msrb.mxu0 %v802_v8  ;;  %v2729_v1 = vld [vmem:[#allocation2 + $0xcf] sm:$0xff] }
  0x4f   : > { %928 = vmatmul.f32.gmra.mxu1 %v2641_v15  ;;  %904 = vmatmul.f32.gmra.mxu0 %v2643_v17  ;;  %418 = vst [vmem:[#allocation2 + $0x68] sm:$0xff] %v2674_v34  ;;  %v2727_v62 = vld [vmem:[#allocation2 + $0x147] sm:$0xff]  ;;  %v2751_v19 = vld [vmem:[#allocation2 + $0x14f] sm:$0xff] }
  0x50   : > { %443 = vst [vmem:[#allocation2 + $0x1f0] sm:$0xff] %v338_v35  ;;  %1006 = vmatpush.msrb.mxu1 %v752_v53  ;;  %1120 = vmatpush.msrb.mxu2 %v767_v57  ;;  %v474_v0 = vld [vmem:[#allocation2 + $0x1c7] sm:$0xff]  ;;  %v475_v20 = vld [vmem:[#allocation2 + $0x1cf] sm:$0xff] }
  0x51   : > { %419 = vst [vmem:[#allocation2 + $0x70] sm:$0xff] %v2710_v54  ;;  %1233 = vmatpush.msrb.mxu3 %v783_v59  ;;  %1344 = vmatpush.msrb.mxu0 %v801_v60  ;;  %v800_v6 = vld [vmem:[%s3276_s1 + $0x208] sm:$0xff]  ;;  %v845_v35 = vld [vmem:[%s3276_s1 + $0x370] sm:$0xff]  ;;  %v858_v60 = vld [vmem:[%s3276_s1 + $0x3d8] sm:$0xff] }
  0x52   : > { %1007 = vmatpush.msrb.mxu1 %v751_v61  ;;  %v2731_v4 = vld [vmem:[#allocation2 + $0x4f] sm:$0xff]  ;;  %1557 = vmatpush.msra.mxu2 %v846_v5  ;;  %v2753_v21 = vld [vmem:[#allocation2 + $0xe7] sm:$0xff] }
  0x53   : > { %1345 = vmatpush.msrb.mxu0 %v800_v6  ;;  %1670 = vmatpush.msra.mxu3 %v862_v11  ;;  %v2763_v26 = vld [vmem:[#allocation2 + $0x167] sm:$0xff]  ;;  %v829_v38 = vld [vmem:[%s3276_s1 + $0x2f0] sm:$0xff] }
  0x54   : > { %1444 = vmatpush.msra.mxu1 %v830_v12  ;;  %v476_v27 = vld [vmem:[#allocation2 + $0x1e7] sm:$0xff]  ;;  %v2765_v31 = vld [vmem:[#allocation2 + $0xef] sm:$0xff]  ;;  %1558 = vmatpush.msra.mxu2 %v845_v35 }
  0x55   : > { %952 = vmatmul.f32.gmra.mxu2 %v2685_v41  ;;  %1346 = vmatpush.msrb.mxu0 %v799_v18  ;;  %v2781_v40 = vld [vmem:[#allocation2 + $0x16f] sm:$0xff] }
  0x56   : > { %976 = vmatmul.f32.gmra.mxu3 %v473_v43  ;;  %v2755_v22 = vld [vmem:[#allocation2 + $0x67] sm:$0xff]  ;;  %1445 = vmatpush.msra.mxu1 %v829_v38  ;;  %v877_v43 = vld [vmem:[%s3276_s1 + $0x470] sm:$0xff] }
  0x57   : > { %931 = vmatmul.f32.gmra.mxu1 %v2689_v44  ;;  %907 = vmatmul.f32.gmra.mxu0 %v2691_v45  ;;  %v477_v42 = vld [vmem:[#allocation2 + $0x1ef] sm:$0xff] }
  0x58   : > { %1783 = vmatpush.msra.mxu0 %v878_v23  ;;  %v2767_v32 = vld [vmem:[#allocation2 + $0x6f] sm:$0xff]  ;;  %1671 = vmatpush.msra.mxu3 %v861_v37 }
  0x59   : > { %v510_v46 = vld [vmem:[#allocation2 + $0x9] sm:$0xff]  ;;  %v511_v8 = vld [vmem:[#allocation2 + $0x11] sm:$0xff] }
  0x5a   : > { %1784 = vmatpush.msra.mxu0 %v877_v43  ;;  %v844_v48 = vld [vmem:[%s3276_s1 + $0x368] sm:$0xff]  ;;  %v513_v57 = vld [vmem:[#allocation2 + $0x31] sm:$0xff] }
  0x5b   : > { %1559 = vmatpush.msra.mxu2 %v844_v48  ;;  %v860_v49 = vld [vmem:[%s3276_s1 + $0x3e8] sm:$0xff]  ;;  %v515_v61 = vld [vmem:[#allocation2 + $0x51] sm:$0xff] }
  0x5c   : > { %v828_v7 = vld [vmem:[%s3276_s1 + $0x2e8] sm:$0xff]  ;;  %1672 = vmatpush.msra.mxu3 %v860_v49  ;;  %v857_v5 = vld [vmem:[%s3276_s1 + $0x3d0] sm:$0xff]  ;;  %v823_v49 = vld [vmem:[%s3276_s1 + $0x2c0] sm:$0xff] }
  0x5d   : > { %955 = vmatmul.f32.gmra.mxu2 %v2727_v62  ;;  %1446 = vmatpush.msra.mxu1 %v828_v7  ;;  %v512_v53 = vld [vmem:[#allocation2 + $0x29] sm:$0xff]  ;;  %v517_v11 = vld [vmem:[#allocation2 + $0x71] sm:$0xff] }
  0x5e   : > { %979 = vmatmul.f32.gmra.mxu3 %v474_v0  ;;  %v514_v59 = vld [vmem:[#allocation2 + $0x49] sm:$0xff]  ;;  %v874_v0 = vld [vmem:[%s3276_s1 + $0x458] sm:$0xff] }
  0x5f   : > { %934 = vmatmul.f32.gmra.mxu1 %v2729_v1  ;;  %910 = vmatmul.f32.gmra.mxu0 %v2731_v4  ;;  %v825_v6 = vld [vmem:[%s3276_s1 + $0x2d0] sm:$0xff]  ;;  %v824_v23 = vld [vmem:[%s3276_s1 + $0x2c8] sm:$0xff] }
  0x65   : > { %958 = vmatmul.f32.gmra.mxu2 %v2751_v19 }
  0x66   : > { %982 = vmatmul.f32.gmra.mxu3 %v475_v20 }
  0x67   : > { %937 = vmatmul.f32.gmra.mxu1 %v2753_v21  ;;  %913 = vmatmul.f32.gmra.mxu0 %v2755_v22 }
  0x6d   : > { %961 = vmatmul.f32.gmra.mxu2 %v2763_v26 }
  0x6e   : > { %985 = vmatmul.f32.gmra.mxu3 %v476_v27 }
  0x6f   : > { %940 = vmatmul.f32.gmra.mxu1 %v2765_v31  ;;  %916 = vmatmul.f32.gmra.mxu0 %v2767_v32 }
  0x75   : > { %964 = vmatmul.f32.gmra.mxu2 %v2781_v40 }
  0x76   : > { %988 = vmatmul.f32.gmra.mxu3 %v477_v42  ;;  %v520_v42 = vld [vmem:[#allocation2 + $0xa9] sm:$0xff] }
  0x77   : > { %1008 = vmatmul.f32.vlgmr.msrb.gmra.mxu1 %v2207_v2  ;;  %1347 = vmatmul.f32.vlgmr.msrb.gmra.mxu0 %v2522_v58 }
  0x7d   : > { %1121 = vmatmul.f32.vlgmr.msrb.gmra.mxu2 %v510_v46 }
  0x7e   : > { %1234 = vmatmul.f32.vlgmr.msrb.gmra.mxu3 %v2598_v47  ;;  %v876_v47 = vld [vmem:[%s3276_s1 + $0x468] sm:$0xff] }
  0x7f   : > { %1011 = vmatmul.f32.gmra.mxu1 %v2207_v2  ;;  %1350 = vmatmul.f32.gmra.mxu0 %v2552_v16  ;;  %v843_v2 = vld [vmem:[%s3276_s1 + $0x360] sm:$0xff] }
  0x80   : > { %1785 = vmatpush.msra.mxu0 %v876_v47  ;;  %1560 = vmatpush.msra.mxu2 %v843_v2 }
  0x85   : > { %1124 = vmatmul.f32.gmra.mxu2 %v511_v8 }
  0x86   : > { %1237 = vmatmul.f32.gmra.mxu3 %v2643_v17  ;;  %v859_v17 = vld [vmem:[%s3276_s1 + $0x3e0] sm:$0xff] }
  0x87   : > { %1014 = vmatmul.f32.gmra.mxu1 %v2522_v58  ;;  %1353 = vmatmul.f32.gmra.mxu0 %v2581_v36  ;;  %v827_v58 = vld [vmem:[%s3276_s1 + $0x2e0] sm:$0xff] }
  0x88   : > { %1673 = vmatpush.msra.mxu3 %v859_v17  ;;  %1447 = vmatpush.msra.mxu1 %v827_v58  ;;  %v522_v17 = vld [vmem:[#allocation2 + $0xc9] sm:$0xff] }
  0x8a   : > { %1674 = vmatpush.msra.mxu3 %v858_v60  ;;  %v523_v60 = vld [vmem:[#allocation2 + $0xd1] sm:$0xff] }
  0x8c   : > { %1675 = vmatpush.msra.mxu3 %v857_v5  ;;  %v556_v5 = vld [vmem:[#allocation2 + $0x107] sm:$0xff] }
  0x8d   : > { %1127 = vmatmul.f32.gmra.mxu2 %v512_v53 }
  0x8e   : > { %1240 = vmatmul.f32.gmra.mxu3 %v2691_v45  ;;  %v875_v45 = vld [vmem:[%s3276_s1 + $0x460] sm:$0xff] }
  0x8f   : > { %1017 = vmatmul.f32.gmra.mxu1 %v2552_v16  ;;  %1356 = vmatmul.f32.gmra.mxu0 %v2620_v56  ;;  %v842_v16 = vld [vmem:[%s3276_s1 + $0x358] sm:$0xff] }
  0x90   : > { %1786 = vmatpush.msra.mxu0 %v875_v45  ;;  %1561 = vmatpush.msra.mxu2 %v842_v16  ;;  %v822_v16 = vld [vmem:[%s3276_s1 + $0x2b8] sm:$0xff] }
  0x92   : > { %1787 = vmatpush.msra.mxu0 %v874_v0 }
  0x95   : > { %1130 = vmatmul.f32.gmra.mxu2 %v513_v57 }
  0x96   : > { %1243 = vmatmul.f32.gmra.mxu3 %v2731_v4  ;;  %v841_v4 = vld [vmem:[%s3276_s1 + $0x350] sm:$0xff] }
  0x97   : > { %1020 = vmatmul.f32.gmra.mxu1 %v2581_v36  ;;  %1359 = vmatmul.f32.gmra.mxu0 %v2674_v34  ;;  %v826_v36 = vld [vmem:[%s3276_s1 + $0x2d8] sm:$0xff] }
  0x98   : > { %1448 = vmatpush.msra.mxu1 %v826_v36  ;;  %1562 = vmatpush.msra.mxu2 %v841_v4  ;;  %v524_v4 = vld [vmem:[#allocation2 + $0xe9] sm:$0xff] }
  0x9a   : > { %1449 = vmatpush.msra.mxu1 %v825_v6 }
  0x9c   : > { %1450 = vmatpush.msra.mxu1 %v824_v23  ;;  %v525_v23 = vld [vmem:[#allocation2 + $0xf1] sm:$0xff] }
  0x9d   : > { %1133 = vmatmul.f32.gmra.mxu2 %v514_v59 }
  0x9e   : > { %1246 = vmatmul.f32.gmra.mxu3 %v2755_v22  ;;  %v840_v22 = vld [vmem:[%s3276_s1 + $0x348] sm:$0xff]  ;;  %1451 = vmatpush.msra.mxu1 %v823_v49 }
  0x9f   : > { %1023 = vmatmul.f32.gmra.mxu1 %v2620_v56  ;;  %1362 = vmatmul.f32.gmra.mxu0 %v2710_v54  ;;  %v516_v56 = vld [vmem:[#allocation2 + $0x69] sm:$0xff] }
  0xa0   : > { %1563 = vmatpush.msra.mxu2 %v840_v22  ;;  %1452 = vmatpush.msra.mxu1 %v822_v16 }
  0xa5   : > { %1136 = vmatmul.f32.gmra.mxu2 %v515_v61  ;;  %v588_v61 = vld [vmem:[#allocation2 + $0x108] sm:$0xff] }
  0xa6   : > { %1249 = vmatmul.f32.gmra.mxu3 %v2767_v32 }
  0xa7   : > { %1026 = vmatmul.f32.gmra.mxu1 %v2674_v34  ;;  %1365 = vmatmul.f32.gmra.mxu0 %v2299_v14 }
  0xa8   : > { %v2857_v12 = vpop.f32.mrf.mxu1 }
  0xac   : > { %v2852_v34 = vpop.f32.mrf.mxu0 }
  0xad   : > { %1139 = vmatmul.f32.gmra.mxu2 %v516_v56 }
  0xae   : > { %1252 = vmatmul.f32.gmra.mxu3 %v2344_v25  ;;  %v873_v25 = vld [vmem:[%s3276_s1 + $0x450] sm:$0xff] }
  0xaf   : > { %1029 = vmatmul.f32.gmra.mxu1 %v2710_v54  ;;  %1368 = vmatmul.f32.gmra.mxu0 %v2450_v13  ;;  %v518_v54 = vld [vmem:[#allocation2 + $0x89] sm:$0xff] }
  0xb0   : > { %1788 = vmatpush.msra.mxu0 %v873_v25  ;;  %v589_v25 = vld [vmem:[#allocation2 + $0x110] sm:$0xff] }
  0xb5   : > { %1142 = vmatmul.f32.gmra.mxu2 %v517_v11  ;;  %v2865_v18 = vpop.f32.mrf.mxu0 }
  0xb6   : > { %1255 = vmatmul.f32.gmra.mxu3 %v2538_v9 }
  0xb7   : > { %1032 = vmatmul.f32.gmra.mxu1 %v2299_v14  ;;  %1371 = vmatmul.f32.gmra.mxu0 %v2481_v33  ;;  %v856_v14 = vld [vmem:[%s3276_s1 + $0x3c8] sm:$0xff] }
  0xb8   : > { %1676 = vmatpush.msra.mxu3 %v856_v14  ;;  %v821_v14 = vld [vmem:[%s3276_s1 + $0x2b0] sm:$0xff] }
  0xb9   : > { %1453 = vmatpush.msra.mxu1 %v821_v14 }
  0xbc   : > { %v2867_v20 = vpop.f32.mrf.mxu1 }
  0xbd   : > { %1145 = vmatmul.f32.gmra.mxu2 %v518_v54 }
  0xbe   : > { %1258 = vmatmul.f32.gmra.mxu3 %v2585_v39  ;;  %v519_v39 = vld [vmem:[#allocation2 + $0x91] sm:$0xff] }
  0xbf   : > { %1035 = vmatmul.f32.gmra.mxu1 %v2450_v13  ;;  %1374 = vmatmul.f32.gmra.mxu0 %v2512_v51  ;;  %v872_v13 = vld [vmem:[%s3276_s1 + $0x448] sm:$0xff] }
  0xc0   : > { %v2878_v9 = vpop.f32.mrf.mxu2  ;;  %1789 = vmatpush.msra.mxu0 %v872_v13 }
  0xc1   : > { %v2883_v27 = vpop.f32.mrf.mxu3 }
  0xc4   : > { %v2885_v32 = vpop.f32.mrf.mxu1  ;;  %v2887_v35 = vpop.f32.mrf.mxu0 }
  0xc5   : > { %1148 = vmatmul.f32.gmra.mxu2 %v519_v39  ;;  %v557_v39 = vld [vmem:[#allocation2 + $0x10f] sm:$0xff] }
  0xc6   : > { %1261 = vmatmul.f32.gmra.mxu3 %v2641_v15  ;;  %v839_v15 = vld [vmem:[%s3276_s1 + $0x340] sm:$0xff] }
  0xc7   : > { %1038 = vmatmul.f32.gmra.mxu1 %v2481_v33  ;;  %1377 = vmatmul.f32.gmra.mxu0 %v2529_v3  ;;  %v855_v33 = vld [vmem:[%s3276_s1 + $0x3c0] sm:$0xff] }
  0xc8   : > { %v2895_v37 = vpop.f32.mrf.mxu2  ;;  %1564 = vmatpush.msra.mxu2 %v839_v15  ;;  %1677 = vmatpush.msra.mxu3 %v855_v33  ;;  %v590_v15 = vld [vmem:[#allocation2 + $0x128] sm:$0xff] }
  0xc9   : > { %v2897_v38 = vpop.f32.mrf.mxu3 }
  0xcc   : > { %v2899_v43 = vpop.f32.mrf.mxu1  ;;  %v2901_v46 = vpop.f32.mrf.mxu0 }
  0xcd   : > { %1151 = vmatmul.f32.gmra.mxu2 %v520_v42 }
  0xce   : > { %1264 = vmatmul.f32.gmra.mxu3 %v2689_v44  ;;  %v521_v44 = vld [vmem:[#allocation2 + $0xb1] sm:$0xff] }
  0xcf   : > { %1041 = vmatmul.f32.gmra.mxu1 %v2512_v51  ;;  %1380 = vmatmul.f32.gmra.mxu0 %v2569_v24  ;;  %v871_v51 = vld [vmem:[%s3276_s1 + $0x440] sm:$0xff] }
  0xd0   : > { %v2912_v48 = vpop.f32.mrf.mxu2  ;;  %1790 = vmatpush.msra.mxu0 %v871_v51 }
  0xd1   : > { %v2917_v7 = vpop.f32.mrf.mxu3 }
  0xd4   : > { %v2919_v8 = vpop.f32.mrf.mxu1  ;;  %v2921_v47 = vpop.f32.mrf.mxu0 }
  0xd5   : > { %1154 = vmatmul.f32.gmra.mxu2 %v521_v44  ;;  %v526_v44 = vld [vmem:[#allocation2 + $0x109] sm:$0xff] }
  0xd6   : > { %1267 = vmatmul.f32.gmra.mxu3 %v2729_v1  ;;  %v838_v1 = vld [vmem:[%s3276_s1 + $0x338] sm:$0xff] }
  0xd7   : > { %1044 = vmatmul.f32.gmra.mxu1 %v2529_v3  ;;  %1383 = vmatmul.f32.gmra.mxu0 %v2607_v50  ;;  %v854_v3 = vld [vmem:[%s3276_s1 + $0x3b8] sm:$0xff] }
  0xd8   : > { %v2929_v53 = vpop.f32.mrf.mxu2  ;;  %1565 = vmatpush.msra.mxu2 %v838_v1  ;;  %1678 = vmatpush.msra.mxu3 %v854_v3  ;;  %v836_v1 = vld [vmem:[%s3276_s1 + $0x328] sm:$0xff] }
  0xd9   : > { %v2931_v2 = vpop.f32.mrf.mxu3  ;;  %v852_v3 = vld [vmem:[%s3276_s1 + $0x3a8] sm:$0xff] }
  0xdc   : > { %v2933_v58 = vpop.f32.mrf.mxu1  ;;  %v2935_v57 = vpop.f32.mrf.mxu0 }
  0xdd   : > { %1157 = vmatmul.f32.gmra.mxu2 %v522_v17 }
  0xde   : > { %1270 = vmatmul.f32.gmra.mxu3 %v2753_v21 }
  0xdf   : > { %1047 = vmatmul.f32.gmra.mxu1 %v2569_v24  ;;  %1386 = vmatmul.f32.gmra.mxu0 %v2662_v28  ;;  %v870_v24 = vld [vmem:[%s3276_s1 + $0x438] sm:$0xff] }
  0xe0   : > { %v2946_v45 = vpop.f32.mrf.mxu2  ;;  %1791 = vmatpush.msra.mxu0 %v870_v24 }
  0xe1   : > { %v2948_v59 = vpop.f32.mrf.mxu3 }
  0xe4   : > { %v2953_v21 = vpop.f32.mrf.mxu1  ;;  %v2955_v36 = vpop.f32.mrf.mxu0 }
  0xe5   : > { %1160 = vmatmul.f32.gmra.mxu2 %v523_v60 }
  0xe6   : > { %1273 = vmatmul.f32.gmra.mxu3 %v2765_v31  ;;  %v837_v31 = vld [vmem:[%s3276_s1 + $0x330] sm:$0xff] }
  0xe7   : > { %1050 = vmatmul.f32.gmra.mxu1 %v2607_v50  ;;  %1389 = vmatmul.f32.gmra.mxu0 %v588_v61  ;;  %v853_v50 = vld [vmem:[%s3276_s1 + $0x3b0] sm:$0xff] }
  0xe8   : > { %v2962_v0 = vpop.f32.mrf.mxu2  ;;  %1566 = vmatpush.msra.mxu2 %v837_v31  ;;  %1679 = vmatpush.msra.mxu3 %v853_v50 }
  0xe9   : > { %v2964_v56 = vpop.f32.mrf.mxu3 }
  0xea   : > { %1567 = vmatpush.msra.mxu2 %v836_v1  ;;  %1680 = vmatpush.msra.mxu3 %v852_v3 }
  0xec   : > { %v2966_v6 = vpop.f32.mrf.mxu1  ;;  %v2968_v11 = vpop.f32.mrf.mxu0 }
  0xed   : > { %1163 = vmatmul.f32.gmra.mxu2 %v524_v4  ;;  %v820_v4 = vld [vmem:[%s3276_s1 + $0x2a8] sm:$0xff] }
  0xee   : > { %1276 = vmatmul.f32.gmra.mxu3 %v556_v5  ;;  %v527_v5 = vld [vmem:[#allocation2 + $0x111] sm:$0xff]  ;;  %1454 = vmatpush.msra.mxu1 %v820_v4 }
  0xef   : > { %1053 = vmatmul.f32.gmra.mxu1 %v2662_v28  ;;  %1392 = vmatmul.f32.gmra.mxu0 %v589_v25  ;;  %v869_v28 = vld [vmem:[%s3276_s1 + $0x430] sm:$0xff] }
  0xf0   : > { %v2977_v54 = vpop.f32.mrf.mxu2  ;;  %1792 = vmatpush.msra.mxu0 %v869_v28  ;;  %v528_v28 = vld [vmem:[#allocation2 + $0x129] sm:$0xff] }
  0xf1   : > { %v2979_v22 = vpop.f32.mrf.mxu3 }
  0xf4   : > { %v1009_v13 = vpop.f32.mrf.mxu1  ;;  %v1348_v42 = vpop.f32.mrf.mxu0 }
  0xf5   : > { %1166 = vmatmul.f32.gmra.mxu2 %v525_v23  ;;  %v1010_v16 = vadd.f32 %v1009_v13, %v2852_v34  ;;  %v868_v34 = vld [vmem:[%s3276_s1 + $0x428] sm:$0xff] }
  0xf6   : > { %1279 = vmatmul.f32.gmra.mxu3 %v557_v39  ;;  %1793 = vmatpush.msra.mxu0 %v868_v34 }
  0xf7   : > { %1056 = vmatmul.f32.gmra.mxu1 %v588_v61  ;;  %1395 = vmatmul.f32.gmra.mxu0 %v590_v15 }
  0xf8   : > { %v2987_v33 = vpop.f32.mrf.mxu2 }
  0xf9   : > { %v2989_v49 = vpop.f32.mrf.mxu3 }
  0xfc   : > { %v1012_v51 = vpop.f32.mrf.mxu1  ;;  %v1351_v17 = vpop.f32.mrf.mxu0 }
  0xfd   : > { %1169 = vmatmul.f32.gmra.mxu2 %v526_v44 }
  0xfe   : > { %1282 = vmatmul.f32.gmra.mxu3 %v2631_v63 }
  0xff   : > { %1059 = vmatmul.f32.gmra.mxu1 %v589_v25  ;;  %1398 = vmatmul.f32.gmra.mxu0 %v2518_v55  ;;  %v1013_v25 = vadd.f32 %v1012_v51, %v2865_v18  ;;  %v851_v18 = vld [vmem:[%s3276_s1 + $0x3a0] sm:$0xff] }
 0x100   : > { %v1122_v60 = vpop.f32.mrf.mxu2  ;;  %1681 = vmatpush.msra.mxu3 %v851_v18 }
 0x101   : > { %v1123_v61 = vadd.f32 %v1122_v60, %v1010_v16  ;;  %v1235_v24 = vpop.f32.mrf.mxu3  ;;  %v819_v60 = vld [vmem:[%s3276_s1 + $0x2a0] sm:$0xff] }
 0x102   : > { %1455 = vmatpush.msra.mxu1 %v819_v60 }
 0x103   : > { %v1236_v63 = vadd.f32 %v1235_v24, %v1123_v61 }
 0x104   : > { %v1015_v31 = vpop.f32.mrf.mxu1  ;;  %v1354_v50 = vpop.f32.mrf.mxu0 }
 0x105   : > { %v3003_v14 = vadd.f32 %v1348_v42, %v1236_v63  ;;  %1172 = vmatmul.f32.gmra.mxu2 %v527_v5 }
 0x106   : > { %1285 = vmatmul.f32.gmra.mxu3 %v2685_v41  ;;  %v835_v41 = vld [vmem:[%s3276_s1 + $0x320] sm:$0xff] }
 0x107   : > { %1062 = vmatmul.f32.gmra.mxu1 %v590_v15  ;;  %1401 = vmatmul.f32.gmra.mxu0 %v2541_v10  ;;  %v1016_v15 = vadd.f32 %v1015_v31, %v2887_v35 }
 0x108   : > { %v1125_v23 = vpop.f32.mrf.mxu2  ;;  %1568 = vmatpush.msra.mxu2 %v835_v41 }
 0x109   : > { %v1126_v39 = vadd.f32 %v1125_v23, %v1013_v25  ;;  %v1238_v13 = vpop.f32.mrf.mxu3  ;;  %v530_v25 = vld [vmem:[#allocation2 + $0x149] sm:$0xff] }
 0x10b   : > { %v1239_v44 = vadd.f32 %v1238_v13, %v1126_v39 }
 0x10c   : > { %v1018_v42 = vpop.f32.mrf.mxu1  ;;  %v1357_v1 = vpop.f32.mrf.mxu0 }
 0x10d   : > { %v3011_v3 = vadd.f32 %v1351_v17, %v1239_v44  ;;  %1175 = vmatmul.f32.gmra.mxu2 %v528_v28  ;;  %v1019_v35 = vadd.f32 %v1018_v42, %v2901_v46 }
 0x10e   : > { %1288 = vmatmul.f32.gmra.mxu3 %v2727_v62  ;;  %v529_v62 = vld [vmem:[#allocation2 + $0x131] sm:$0xff] }
 0x10f   : > { %1065 = vmatmul.f32.gmra.mxu1 %v2518_v55  ;;  %1404 = vmatmul.f32.gmra.mxu0 %v2574_v29  ;;  %v867_v55 = vld [vmem:[%s3276_s1 + $0x420] sm:$0xff] }
 0x110   : > { %v1128_v51 = vpop.f32.mrf.mxu2  ;;  %1794 = vmatpush.msra.mxu0 %v867_v55 }
 0x111   : > { %v1129_v17 = vadd.f32 %v1128_v51, %v1016_v15  ;;  %v1241_v16 = vpop.f32.mrf.mxu3  ;;  %v596_v51 = vld [vmem:[#allocation2 + $0x188] sm:$0xff] }
 0x113   : > { %v1242_v61 = vadd.f32 %v1241_v16, %v1129_v17 }
 0x114   : > { %v1021_v24 = vpop.f32.mrf.mxu1  ;;  %v1360_v4 = vpop.f32.mrf.mxu0 }
 0x115   : > { %v3026_v5 = vadd.f32 %v1354_v50, %v1242_v61  ;;  %1178 = vmatmul.f32.gmra.mxu2 %v529_v62  ;;  %v1022_v46 = vadd.f32 %v1021_v24, %v2921_v47  ;;  %v532_v61 = vld [vmem:[#allocation2 + $0x169] sm:$0xff] }
 0x116   : > { %1291 = vmatmul.f32.gmra.mxu3 %v2751_v19  ;;  %v834_v19 = vld [vmem:[%s3276_s1 + $0x318] sm:$0xff] }
 0x117   : > { %1068 = vmatmul.f32.gmra.mxu1 %v2541_v10  ;;  %1407 = vmatmul.f32.gmra.mxu0 %v2609_v52  ;;  %v850_v10 = vld [vmem:[%s3276_s1 + $0x398] sm:$0xff] }
 0x118   : > { %v1131_v63 = vpop.f32.mrf.mxu2  ;;  %1569 = vmatpush.msra.mxu2 %v834_v19  ;;  %1682 = vmatpush.msra.mxu3 %v850_v10  ;;  %v565_v10 = vld [vmem:[#allocation2 + $0x18f] sm:$0xff] }
 0x119   : > { %v1132_v31 = vadd.f32 %v1131_v63, %v1019_v35  ;;  %v1244_v34 = vpop.f32.mrf.mxu3  ;;  %v597_v63 = vld [vmem:[#allocation2 + $0x190] sm:$0xff] }
 0x11b   : > { %v1245_v50 = vadd.f32 %v1244_v34, %v1132_v31 }
 0x11c   : > { %v1024_v23 = vpop.f32.mrf.mxu1  ;;  %v1363_v39 = vpop.f32.mrf.mxu0 }
 0x11d   : > { %v3035_v13 = vadd.f32 %v1357_v1, %v1245_v50  ;;  %1181 = vmatmul.f32.gmra.mxu2 %v530_v25  ;;  %v818_v1 = vld [vmem:[%s3276_s1 + $0x298] sm:$0xff]  ;;  %v1025_v47 = vadd.f32 %v1024_v23, %v2935_v57  ;;  %v833_v57 = vld [vmem:[%s3276_s1 + $0x310] sm:$0xff] }
 0x11e   : > { %1294 = vmatmul.f32.gmra.mxu3 %v2763_v26  ;;  %v531_v26 = vld [vmem:[#allocation2 + $0x151] sm:$0xff]  ;;  %1456 = vmatpush.msra.mxu1 %v818_v1 }
 0x11f   : > { %1071 = vmatmul.f32.gmra.mxu1 %v2574_v29  ;;  %1410 = vmatmul.f32.gmra.mxu0 %v2664_v30  ;;  %v866_v29 = vld [vmem:[%s3276_s1 + $0x418] sm:$0xff]  ;;  %v817_v23 = vld [vmem:[%s3276_s1 + $0x290] sm:$0xff] }
 0x120   : > { %v1134_v28 = vpop.f32.mrf.mxu2  ;;  %1795 = vmatpush.msra.mxu0 %v866_v29  ;;  %1570 = vmatpush.msra.mxu2 %v833_v57  ;;  %v816_v57 = vld [vmem:[%s3276_s1 + $0x288] sm:$0xff] }
 0x121   : > { %v1135_v44 = vadd.f32 %v1134_v28, %v1022_v46  ;;  %v1247_v42 = vpop.f32.mrf.mxu3  ;;  %1457 = vmatpush.msra.mxu1 %v817_v23 }
 0x123   : > { %v1248_v41 = vadd.f32 %v1247_v42, %v1135_v44  ;;  %v598_v44 = vld [vmem:[#allocation2 + $0x1a8] sm:$0xff]  ;;  %1458 = vmatpush.msra.mxu1 %v816_v57 }
 0x124   : > { %v1027_v18 = vpop.f32.mrf.mxu1  ;;  %v1366_v15 = vpop.f32.mrf.mxu0 }
 0x125   : > { %v3050_v17 = vadd.f32 %v1360_v4, %v1248_v41  ;;  %1184 = vmatmul.f32.gmra.mxu2 %v531_v26  ;;  %v564_v4 = vld [vmem:[#allocation2 + $0x187] sm:$0xff]  ;;  %v1028_v31 = vadd.f32 %v1027_v18, %v2955_v36 }
 0x126   : > { %1297 = vmatmul.f32.gmra.mxu3 %v2781_v40  ;;  %v534_v18 = vld [vmem:[#allocation2 + $0x189] sm:$0xff] }
 0x127   : > { %1074 = vmatmul.f32.gmra.mxu1 %v2609_v52  ;;  %1413 = vmatmul.f32.gmra.mxu0 %v596_v51  ;;  %v849_v52 = vld [vmem:[%s3276_s1 + $0x390] sm:$0xff] }
 0x128   : > { %v1137_v16 = vpop.f32.mrf.mxu2  ;;  %1683 = vmatpush.msra.mxu3 %v849_v52  ;;  %v2196_v52 = vld [vmem:[%s3277_s2] ss:$0 sm:$0xff] }
 0x129   : > { %v1138_v60 = vadd.f32 %v1137_v16, %v1025_v47  ;;  %v1250_v62 = vpop.f32.mrf.mxu3  ;;  %v566_v47 = vld [vmem:[#allocation2 + $0x1a7] sm:$0xff] }
 0x12b   : > { %v1251_v24 = vadd.f32 %v1250_v62, %v1138_v60  ;;  %v599_v60 = vld [vmem:[#allocation2 + $0x1b0] sm:$0xff] }
 0x12c   : > { %v1030_v55 = vpop.f32.mrf.mxu1  ;;  %v1369_v35 = vpop.f32.mrf.mxu0 }
 0x12d   : > { %v3058_v40 = vadd.f32 %v1363_v39, %v1251_v24  ;;  %1187 = vmatmul.f32.gmra.mxu2 %v532_v61  ;;  %v533_v39 = vld [vmem:[#allocation2 + $0x171] sm:$0xff]  ;;  %v1031_v36 = vadd.f32 %v1030_v55, %v2968_v11  ;;  %v832_v11 = vld [vmem:[%s3276_s1 + $0x308] sm:$0xff] }
 0x12e   : > { %1300 = vmatmul.f32.gmra.mxu3 %v564_v4  ;;  %1571 = vmatpush.msra.mxu2 %v832_v11  ;;  %v241_v4 = vld [vmem:[%s2268_s30 + $0xf0] sm:$0xff]  ;;  %v568_v11 = vld [vmem:[#allocation2 + $0x1c7] sm:$0xff] }
 0x12f   : > { %1077 = vmatmul.f32.gmra.mxu1 %v2664_v30  ;;  %1416 = vmatmul.f32.gmra.mxu0 %v597_v63  ;;  %v865_v30 = vld [vmem:[%s3276_s1 + $0x410] sm:$0xff] }
 0x130   : > { %v1140_v34 = vpop.f32.mrf.mxu2  ;;  %1796 = vmatpush.msra.mxu0 %v865_v30  ;;  %v864_v30 = vld [vmem:[%s3276_s1 + $0x408] sm:$0xff] }
 0x131   : > { %v1141_v25 = vadd.f32 %v1140_v34, %v1028_v31  ;;  %v1253_v50 = vpop.f32.mrf.mxu3  ;;  %v274_v31 = vmul.f32 %v2196_v52, %v241_v4  ;;  %v535_v34 = vld [vmem:[#allocation2 + $0x191] sm:$0xff] }
 0x132   : > { %1797 = vmatpush.msra.mxu0 %v864_v30  ;;  %v601_v4 = vld [vmem:[#allocation2 + $0x1d0] sm:$0xff] }
 0x133   : > { %v1254_v19 = vadd.f32 %v1253_v50, %v1141_v25 }
 0x134   : > { %v1033_v46 = vpop.f32.mrf.mxu1  ;;  %v1372_v28 = vpop.f32.mrf.mxu0 }
 0x135   : > { %v3071_v42 = vadd.f32 %v1366_v15, %v1254_v19  ;;  %1190 = vmatmul.f32.gmra.mxu2 %v533_v39  ;;  %v1034_v61 = vadd.f32 %v1033_v46, %v2857_v12  ;;  %v567_v12 = vld [vmem:[#allocation2 + $0x1af] sm:$0xff] }
 0x136   : > { %1303 = vmatmul.f32.gmra.mxu3 %v565_v10  ;;  %v600_v19 = vld [vmem:[#allocation2 + $0x1c8] sm:$0xff] }
 0x137   : > { %1080 = vmatmul.f32.gmra.mxu1 %v596_v51  ;;  %1419 = vmatmul.f32.gmra.mxu0 %v598_v44  ;;  %v848_v51 = vld [vmem:[%s3276_s1 + $0x388] sm:$0xff] }
 0x138   : > { %v1143_v1 = vpop.f32.mrf.mxu2  ;;  %1684 = vmatpush.msra.mxu3 %v848_v51 }
 0x139   : > { %v1144_v26 = vadd.f32 %v1143_v1, %v1031_v36  ;;  %v1256_v41 = vpop.f32.mrf.mxu3 }
 0x13b   : > { %v1257_v29 = vadd.f32 %v1256_v41, %v1144_v26  ;;  %v242_v26 = vld [vmem:[%s2268_s30 + $0xf8] sm:$0xff] }
 0x13c   : > { %v1036_v15 = vpop.f32.mrf.mxu1  ;;  %v1375_v16 = vpop.f32.mrf.mxu0 }
 0x13d   : > { %v3077_v62 = vadd.f32 %v1369_v35, %v1257_v29  ;;  %1193 = vmatmul.f32.gmra.mxu2 %v534_v18  ;;  %v1037_v36 = vadd.f32 %v1036_v15, %v2867_v20  ;;  %v275_v18 = vmul.f32 %v2196_v52, %v242_v26  ;;  %v536_v29 = vld [vmem:[#allocation2 + $0x1a9] sm:$0xff] }
 0x13e   : > { %1306 = vmatmul.f32.gmra.mxu3 %v566_v47 }
 0x13f   : > { %1083 = vmatmul.f32.gmra.mxu1 %v597_v63  ;;  %1422 = vmatmul.f32.gmra.mxu0 %v599_v60  ;;  %v2197_v63 = vld [vmem:[%s3277_s2 + $0x1] ss:$0 sm:$0xff] }
 0x140   : > { %v1146_v24 = vpop.f32.mrf.mxu2  ;;  %v3096_v50 = vadd.f32 %v2197_v63, %v274_v31  ;;  %v3108_v51 = vadd.f32 %v2197_v63, %v275_v18  ;;  %v815_v31 = vld [vmem:[%s3276_s1 + $0x280] sm:$0xff] }
 0x141   : > { %v1147_v55 = vadd.f32 %v1146_v24, %v1034_v61  ;;  %v1259_v35 = vpop.f32.mrf.mxu3  ;;  %1459 = vmatpush.msra.mxu1 %v815_v31 }
 0x142   : > { %v339_v46 = vmax.f32 %v3096_v50, 0.0  ;;  %v340_v15 = vmax.f32 %v3108_v51, 0.0 }
 0x143   : > { %v1260_v25 = vadd.f32 %v1259_v35, %v1147_v55  ;;  %v847_v55 = vld [vmem:[%s3276_s1 + $0x380] sm:$0xff] }
 0x144   : > { %v1039_v23 = vpop.f32.mrf.mxu1  ;;  %v1378_v39 = vpop.f32.mrf.mxu0  ;;  %444 = vst [vmem:[#allocation2 + $0x208] sm:$0xff] %v339_v46  ;;  %1685 = vmatpush.msra.mxu3 %v847_v55 }
 0x145   : > { %v3098_v10 = vadd.f32 %v1372_v28, %v1260_v25  ;;  %1196 = vmatmul.f32.gmra.mxu2 %v535_v34  ;;  %v1040_v35 = vadd.f32 %v1039_v23, %v2885_v32  ;;  %445 = vst [vmem:[#allocation2 + $0x210] sm:$0xff] %v340_v15  ;;  %v537_v34 = vld [vmem:[#allocation2 + $0x1b1] sm:$0xff]  ;;  %v602_v32 = vld [vmem:[#allocation2 + $0x1e8] sm:$0xff]  ;;  %v863_v23 = vld [vmem:[%s3276_s1 + $0x400] sm:$0xff] }
 0x146   : > { %1309 = vmatmul.f32.gmra.mxu3 %v567_v12  ;;  %v569_v12 = vld [vmem:[#allocation2 + $0x1cf] sm:$0xff]  ;;  %1798 = vmatpush.msra.mxu0 %v863_v23 }
 0x147   : > { %1086 = vmatmul.f32.gmra.mxu1 %v598_v44  ;;  %1425 = vmatmul.f32.gmra.mxu0 %v600_v19  ;;  %v831_v44 = vld [vmem:[%s3276_s1 + $0x300] sm:$0xff] }
 0x148   : > { %v1149_v1 = vpop.f32.mrf.mxu2  ;;  %1572 = vmatpush.msra.mxu2 %v831_v44 }
 0x149   : > { %v1150_v28 = vadd.f32 %v1149_v1, %v1037_v36  ;;  %v1262_v41 = vpop.f32.mrf.mxu3 }
 0x14b   : > { %v1263_v47 = vadd.f32 %v1262_v41, %v1150_v28  ;;  %v538_v41 = vld [vmem:[#allocation2 + $0x1c9] sm:$0xff] }
 0x14c   : > { %v1042_v61 = vpop.f32.mrf.mxu1  ;;  %v1381_v24 = vpop.f32.mrf.mxu0  ;;  %v572_v23 = vld [vmem:[#allocation2 + $0x207] sm:$0xff] }
 0x14d   : > { %v3110_v20 = vadd.f32 %v1375_v16, %v1263_v47  ;;  %1199 = vmatmul.f32.gmra.mxu2 %v536_v29  ;;  %v1043_v36 = vadd.f32 %v1042_v61, %v2899_v43  ;;  %v570_v29 = vld [vmem:[#allocation2 + $0x1e7] sm:$0xff] }
 0x14e   : > { %1312 = vmatmul.f32.gmra.mxu3 %v568_v11  ;;  %v603_v11 = vld [vmem:[#allocation2 + $0x1f0] sm:$0xff] }
 0x14f   : > { %1089 = vmatmul.f32.gmra.mxu1 %v599_v60  ;;  %1428 = vmatmul.f32.gmra.mxu0 %v601_v4 }
 0x150   : > { %v1152_v16 = vpop.f32.mrf.mxu2 }
 0x151   : > { %v1153_v57 = vadd.f32 %v1152_v16, %v1040_v35  ;;  %v1265_v52 = vpop.f32.mrf.mxu3  ;;  %v539_v35 = vld [vmem:[#allocation2 + $0x1d1] sm:$0xff] }
 0x153   : > { %v1266_v25 = vadd.f32 %v1265_v52, %v1153_v57  ;;  %v571_v57 = vld [vmem:[#allocation2 + $0x1ef] sm:$0xff] }
 0x154   : > { %v1045_v63 = vpop.f32.mrf.mxu1  ;;  %v1384_v30 = vpop.f32.mrf.mxu0 }
 0x155   : > { %v3125_v60 = vadd.f32 %v1378_v39, %v1266_v25  ;;  %1202 = vmatmul.f32.gmra.mxu2 %v537_v34  ;;  %v1046_v55 = vadd.f32 %v1045_v63, %v2919_v8 }
 0x156   : > { %1315 = vmatmul.f32.gmra.mxu3 %v569_v12  ;;  %v540_v12 = vld [vmem:[#allocation2 + $0x1e9] sm:$0xff] }
 0x157   : > { %1092 = vmatmul.f32.gmra.mxu1 %v600_v19  ;;  %1431 = vmatmul.f32.gmra.mxu0 %v602_v32 }
 0x158   : > { %v1155_v1 = vpop.f32.mrf.mxu2 }
 0x159   : > { %v1156_v26 = vadd.f32 %v1155_v1, %v1043_v36  ;;  %v1268_v28 = vpop.f32.mrf.mxu3 }
 0x15b   : > { %v1269_v18 = vadd.f32 %v1268_v28, %v1156_v26 }
 0x15c   : > { %v1048_v47 = vpop.f32.mrf.mxu1  ;;  %v1387_v39 = vpop.f32.mrf.mxu0 }
 0x15d   : > { %v3131_v44 = vadd.f32 %v1381_v24, %v1269_v18  ;;  %1205 = vmatmul.f32.gmra.mxu2 %v538_v41  ;;  %v1049_v24 = vadd.f32 %v1048_v47, %v2933_v58  ;;  %v573_v41 = vld [vmem:[#allocation2 + $0x20f] sm:$0xff] }
 0x15e   : > { %1318 = vmatmul.f32.gmra.mxu3 %v570_v29  ;;  %v606_v29 = vld [vmem:[#allocation2 + $0x29] sm:$0xff] }
 0x15f   : > { %1095 = vmatmul.f32.gmra.mxu1 %v601_v4  ;;  %1434 = vmatmul.f32.gmra.mxu0 %v603_v11 }
 0x160   : > { %v1158_v43 = vpop.f32.mrf.mxu2 }
 0x161   : > { %v1159_v19 = vadd.f32 %v1158_v43, %v1046_v55  ;;  %v1271_v61 = vpop.f32.mrf.mxu3  ;;  %v703_v55 = vld [vmem:[#allocation2 + $0x49] sm:$0xff] }
 0x162   : > { %v639_v43 = vld [vmem:[#allocation2 + $0x47] sm:$0xff] }
 0x163   : > { %v1272_v16 = vadd.f32 %v1271_v61, %v1159_v19  ;;  %v671_v61 = vld [vmem:[#allocation2 + $0x48] sm:$0xff] }
 0x164   : > { %v1051_v52 = vpop.f32.mrf.mxu1  ;;  %v1390_v31 = vpop.f32.mrf.mxu0 }
 0x165   : > { %v3134_v34 = vadd.f32 %v1384_v30, %v1272_v16  ;;  %1208 = vmatmul.f32.gmra.mxu2 %v539_v35  ;;  %v1052_v30 = vadd.f32 %v1051_v52, %v2953_v21  ;;  %v607_v16 = vld [vmem:[#allocation2 + $0x31] sm:$0xff] }
 0x166   : > { %1321 = vmatmul.f32.gmra.mxu3 %v571_v57  ;;  %v704_v52 = vld [vmem:[#allocation2 + $0x51] sm:$0xff] }
 0x167   : > { %1098 = vmatmul.f32.gmra.mxu1 %v602_v32  ;;  %1437 = vmatmul.f32.gmra.mxu0 %v339_v46  ;;  %v541_v32 = vld [vmem:[#allocation2 + $0x1f1] sm:$0xff] }
 0x168   : > { %v1161_v8 = vpop.f32.mrf.mxu2 }
 0x169   : > { %v1162_v4 = vadd.f32 %v1161_v8, %v1049_v24  ;;  %v1274_v25 = vpop.f32.mrf.mxu3 }
 0x16b   : > { %v1275_v63 = vadd.f32 %v1274_v25, %v1162_v4  ;;  %v640_v25 = vld [vmem:[#allocation2 + $0x4f] sm:$0xff] }
 0x16c   : > { %v1054_v36 = vpop.f32.mrf.mxu1  ;;  %v1393_v1 = vpop.f32.mrf.mxu0 }
 0x16d   : > { %v3139_v26 = vadd.f32 %v1387_v39, %v1275_v63  ;;  %1211 = vmatmul.f32.gmra.mxu2 %v540_v12  ;;  %v1055_v21 = vadd.f32 %v1054_v36, %v2966_v6  ;;  %v672_v63 = vld [vmem:[#allocation2 + $0x50] sm:$0xff] }
 0x16e   : > { %1324 = vmatmul.f32.gmra.mxu3 %v572_v23 }
 0x16f   : > { %1101 = vmatmul.f32.gmra.mxu1 %v603_v11  ;;  %1440 = vmatmul.f32.gmra.mxu0 %v340_v15 }
 0x170   : > { %v1164_v58 = vpop.f32.mrf.mxu2 }
 0x171   : > { %v1165_v50 = vadd.f32 %v1164_v58, %v1052_v30  ;;  %v1277_v46 = vpop.f32.mrf.mxu3  ;;  %v705_v30 = vld [vmem:[#allocation2 + $0x69] sm:$0xff] }
 0x173   : > { %v1278_v28 = vadd.f32 %v1277_v46, %v1165_v50 }
 0x174   : > { %v1057_v18 = vpop.f32.mrf.mxu1  ;;  %v1396_v47 = vpop.f32.mrf.mxu0 }
 0x175   : > { %v3144_v39 = vadd.f32 %v1390_v31, %v1278_v28  ;;  %1214 = vmatmul.f32.gmra.mxu2 %v541_v32  ;;  %v1058_v31 = vadd.f32 %v1057_v18, %v2878_v9  ;;  %v641_v32 = vld [vmem:[#allocation2 + $0x67] sm:$0xff] }
 0x176   : > { %1327 = vmatmul.f32.gmra.mxu3 %v573_v41  ;;  %v673_v41 = vld [vmem:[#allocation2 + $0x68] sm:$0xff] }
 0x177   : > { %1460 = vmatmul.f32.vlgmr.msra.gmra.mxu1 %v606_v29  ;;  %1799 = vmatmul.f32.vlgmr.msra.gmra.mxu0 %v703_v55 }
 0x178   : > { %v1167_v51 = vpop.f32.mrf.mxu2 }
 0x179   : > { %v1168_v15 = vadd.f32 %v1167_v51, %v1055_v21  ;;  %v1280_v11 = vpop.f32.mrf.mxu3  ;;  %v706_v21 = vld [vmem:[#allocation2 + $0x71] sm:$0xff] }
 0x17b   : > { %v1281_v19 = vadd.f32 %v1280_v11, %v1168_v15  ;;  %v642_v11 = vld [vmem:[#allocation2 + $0x6f] sm:$0xff] }
 0x17c   : > { %v1060_v35 = vpop.f32.mrf.mxu1  ;;  %v1399_v57 = vpop.f32.mrf.mxu0 }
 0x17d   : > { %v3147_v24 = vadd.f32 %v1393_v1, %v1281_v19  ;;  %1573 = vmatmul.f32.vlgmr.msra.gmra.mxu2 %v639_v43  ;;  %v1061_v1 = vadd.f32 %v1060_v35, %v2895_v37  ;;  %v674_v19 = vld [vmem:[#allocation2 + $0x70] sm:$0xff] }
 0x17e   : > { %1686 = vmatmul.f32.vlgmr.msra.gmra.mxu3 %v671_v61 }
 0x17f   : > { %1463 = vmatmul.f32.gmra.mxu1 %v607_v16  ;;  %1802 = vmatmul.f32.gmra.mxu0 %v704_v52  ;;  %v707_v16 = vld [vmem:[#allocation2 + $0x89] sm:$0xff] }
 0x180   : > { %v1170_v6 = vpop.f32.mrf.mxu2 }
 0x181   : > { %v1171_v8 = vadd.f32 %v1170_v6, %v1058_v31  ;;  %v1283_v4 = vpop.f32.mrf.mxu3 }
 0x183   : > { %v1284_v12 = vadd.f32 %v1283_v4, %v1171_v8  ;;  %v643_v8 = vld [vmem:[#allocation2 + $0x87] sm:$0xff] }
 0x184   : > { %v1063_v23 = vpop.f32.mrf.mxu1  ;;  %v1402_v36 = vpop.f32.mrf.mxu0 }
 0x185   : > { %v3150_v58 = vadd.f32 %v1396_v47, %v1284_v12  ;;  %1576 = vmatmul.f32.gmra.mxu2 %v640_v25  ;;  %v1064_v47 = vadd.f32 %v1063_v23, %v2912_v48  ;;  %v675_v25 = vld [vmem:[#allocation2 + $0x88] sm:$0xff]  ;;  %v708_v23 = vld [vmem:[#allocation2 + $0x91] sm:$0xff] }
 0x186   : > { %1689 = vmatmul.f32.gmra.mxu3 %v672_v63 }
 0x187   : > { %1466 = vmatmul.f32.gmra.mxu1 %v703_v55  ;;  %1805 = vmatmul.f32.gmra.mxu0 %v705_v30 }
 0x188   : > { %v1173_v9 = vpop.f32.mrf.mxu2 }
 0x189   : > { %v1174_v50 = vadd.f32 %v1173_v9, %v1061_v1  ;;  %v1286_v46 = vpop.f32.mrf.mxu3 }
 0x18b   : > { %v1287_v28 = vadd.f32 %v1286_v46, %v1174_v50  ;;  %v644_v50 = vld [vmem:[#allocation2 + $0x8f] sm:$0xff] }
 0x18c   : > { %v1066_v18 = vpop.f32.mrf.mxu1  ;;  %v1405_v29 = vpop.f32.mrf.mxu0 }
 0x18d   : > { %v3153_v51 = vadd.f32 %v1399_v57, %v1287_v28  ;;  %1579 = vmatmul.f32.gmra.mxu2 %v641_v32  ;;  %v1067_v57 = vadd.f32 %v1066_v18, %v2929_v53  ;;  %v676_v32 = vld [vmem:[#allocation2 + $0x90] sm:$0xff] }
 0x18e   : > { %1692 = vmatmul.f32.gmra.mxu3 %v673_v41  ;;  %v709_v18 = vld [vmem:[#allocation2 + $0xa9] sm:$0xff] }
 0x18f   : > { %1469 = vmatmul.f32.gmra.mxu1 %v704_v52  ;;  %1808 = vmatmul.f32.gmra.mxu0 %v706_v21 }
 0x190   : > { %v1176_v37 = vpop.f32.mrf.mxu2 }
 0x191   : > { %v1177_v55 = vadd.f32 %v1176_v37, %v1064_v47  ;;  %v1289_v15 = vpop.f32.mrf.mxu3 }
 0x193   : > { %v1290_v43 = vadd.f32 %v1289_v15, %v1177_v55  ;;  %v645_v55 = vld [vmem:[#allocation2 + $0xa7] sm:$0xff] }
 0x194   : > { %v1069_v61 = vpop.f32.mrf.mxu1  ;;  %v1408_v35 = vpop.f32.mrf.mxu0 }
 0x195   : > { %v3156_v31 = vadd.f32 %v1402_v36, %v1290_v43  ;;  %1582 = vmatmul.f32.gmra.mxu2 %v642_v11  ;;  %v1070_v36 = vadd.f32 %v1069_v61, %v2946_v45  ;;  %v677_v11 = vld [vmem:[#allocation2 + $0xa8] sm:$0xff]  ;;  %v710_v61 = vld [vmem:[#allocation2 + $0xb1] sm:$0xff] }
 0x196   : > { %1695 = vmatmul.f32.gmra.mxu3 %v674_v19 }
 0x197   : > { %1472 = vmatmul.f32.gmra.mxu1 %v705_v30  ;;  %1811 = vmatmul.f32.gmra.mxu0 %v707_v16 }
 0x198   : > { %v1179_v48 = vpop.f32.mrf.mxu2 }
 0x199   : > { %v1180_v52 = vadd.f32 %v1179_v48, %v1067_v57  ;;  %v1292_v6 = vpop.f32.mrf.mxu3 }
 0x19b   : > { %v1293_v4 = vadd.f32 %v1292_v6, %v1180_v52  ;;  %v646_v52 = vld [vmem:[#allocation2 + $0xaf] sm:$0xff] }
 0x19c   : > { %v1072_v12 = vpop.f32.mrf.mxu1  ;;  %v1411_v63 = vpop.f32.mrf.mxu0 }
 0x19d   : > { %v3159_v1 = vadd.f32 %v1405_v29, %v1293_v4  ;;  %1585 = vmatmul.f32.gmra.mxu2 %v643_v8  ;;  %v1073_v29 = vadd.f32 %v1072_v12, %v2962_v0  ;;  %v678_v8 = vld [vmem:[#allocation2 + $0xb0] sm:$0xff] }
 0x19e   : > { %1698 = vmatmul.f32.gmra.mxu3 %v675_v25  ;;  %v711_v12 = vld [vmem:[#allocation2 + $0xc9] sm:$0xff] }
 0x19f   : > { %1475 = vmatmul.f32.gmra.mxu1 %v706_v21  ;;  %1814 = vmatmul.f32.gmra.mxu0 %v708_v23 }
 0x1a0   : > { %v1182_v53 = vpop.f32.mrf.mxu2 }
 0x1a1   : > { %v1183_v30 = vadd.f32 %v1182_v53, %v1070_v36  ;;  %v1295_v9 = vpop.f32.mrf.mxu3 }
 0x1a3   : > { %v1296_v46 = vadd.f32 %v1295_v9, %v1183_v30  ;;  %v647_v30 = vld [vmem:[#allocation2 + $0xc7] sm:$0xff] }
 0x1a4   : > { %v1075_v28 = vpop.f32.mrf.mxu1  ;;  %v1414_v41 = vpop.f32.mrf.mxu0 }
 0x1a5   : > { %v3162_v47 = vadd.f32 %v1408_v35, %v1296_v46  ;;  %1588 = vmatmul.f32.gmra.mxu2 %v644_v50  ;;  %v1076_v35 = vadd.f32 %v1075_v28, %v2977_v54  ;;  %v679_v50 = vld [vmem:[#allocation2 + $0xc8] sm:$0xff]  ;;  %v712_v28 = vld [vmem:[#allocation2 + $0xd1] sm:$0xff] }
 0x1a6   : > { %1701 = vmatmul.f32.gmra.mxu3 %v676_v32 }
 0x1a7   : > { %1478 = vmatmul.f32.gmra.mxu1 %v707_v16  ;;  %1817 = vmatmul.f32.gmra.mxu0 %v709_v18 }
 0x1a8   : > { %v1185_v45 = vpop.f32.mrf.mxu2 }
 0x1a9   : > { %v1186_v21 = vadd.f32 %v1185_v45, %v1073_v29  ;;  %v1298_v37 = vpop.f32.mrf.mxu3 }
 0x1ab   : > { %v1299_v15 = vadd.f32 %v1298_v37, %v1186_v21  ;;  %v648_v21 = vld [vmem:[#allocation2 + $0xcf] sm:$0xff] }
 0x1ac   : > { %v1078_v43 = vpop.f32.mrf.mxu1  ;;  %v1417_v19 = vpop.f32.mrf.mxu0 }
 0x1ad   : > { %v3165_v57 = vadd.f32 %v1411_v63, %v1299_v15  ;;  %1591 = vmatmul.f32.gmra.mxu2 %v645_v55  ;;  %v1079_v63 = vadd.f32 %v1078_v43, %v2987_v33  ;;  %v680_v55 = vld [vmem:[#allocation2 + $0xd0] sm:$0xff] }
 0x1ae   : > { %1704 = vmatmul.f32.gmra.mxu3 %v677_v11  ;;  %v713_v43 = vld [vmem:[#allocation2 + $0xe9] sm:$0xff] }
 0x1af   : > { %1481 = vmatmul.f32.gmra.mxu1 %v708_v23  ;;  %1820 = vmatmul.f32.gmra.mxu0 %v710_v61 }
 0x1b0   : > { %v1188_v0 = vpop.f32.mrf.mxu2 }
 0x1b1   : > { %v1189_v16 = vadd.f32 %v1188_v0, %v1076_v35  ;;  %v1301_v48 = vpop.f32.mrf.mxu3 }
 0x1b3   : > { %v1302_v6 = vadd.f32 %v1301_v48, %v1189_v16  ;;  %v649_v16 = vld [vmem:[#allocation2 + $0xe7] sm:$0xff] }
 0x1b4   : > { %v1081_v4 = vpop.f32.mrf.mxu1  ;;  %v1420_v25 = vpop.f32.mrf.mxu0 }
 0x1b5   : > { %v3168_v36 = vadd.f32 %v1414_v41, %v1302_v6  ;;  %1594 = vmatmul.f32.gmra.mxu2 %v646_v52  ;;  %v1082_v41 = vadd.f32 %v1081_v4, %v2883_v27  ;;  %v681_v52 = vld [vmem:[#allocation2 + $0xe8] sm:$0xff]  ;;  %v714_v4 = vld [vmem:[#allocation2 + $0xf1] sm:$0xff] }
 0x1b6   : > { %1707 = vmatmul.f32.gmra.mxu3 %v678_v8 }
 0x1b7   : > { %1484 = vmatmul.f32.gmra.mxu1 %v709_v18  ;;  %1823 = vmatmul.f32.gmra.mxu0 %v711_v12 }
 0x1b8   : > { %v1191_v54 = vpop.f32.mrf.mxu2 }
 0x1b9   : > { %v1192_v23 = vadd.f32 %v1191_v54, %v1079_v63  ;;  %v1304_v53 = vpop.f32.mrf.mxu3 }
 0x1bb   : > { %v1305_v9 = vadd.f32 %v1304_v53, %v1192_v23  ;;  %v650_v23 = vld [vmem:[#allocation2 + $0xef] sm:$0xff] }
 0x1bc   : > { %v1084_v46 = vpop.f32.mrf.mxu1  ;;  %v1423_v32 = vpop.f32.mrf.mxu0 }
 0x1bd   : > { %v3171_v29 = vadd.f32 %v1417_v19, %v1305_v9  ;;  %1597 = vmatmul.f32.gmra.mxu2 %v647_v30  ;;  %v1085_v19 = vadd.f32 %v1084_v46, %v2897_v38  ;;  %v682_v30 = vld [vmem:[#allocation2 + $0xf0] sm:$0xff] }
 0x1be   : > { %1710 = vmatmul.f32.gmra.mxu3 %v679_v50  ;;  %v715_v46 = vld [vmem:[#allocation2 + $0x109] sm:$0xff] }
 0x1bf   : > { %1487 = vmatmul.f32.gmra.mxu1 %v710_v61  ;;  %1826 = vmatmul.f32.gmra.mxu0 %v712_v28 }
 0x1c0   : > { %v1194_v33 = vpop.f32.mrf.mxu2 }
 0x1c1   : > { %v1195_v18 = vadd.f32 %v1194_v33, %v1082_v41  ;;  %v1307_v45 = vpop.f32.mrf.mxu3 }
 0x1c3   : > { %v1308_v37 = vadd.f32 %v1307_v45, %v1195_v18  ;;  %v651_v18 = vld [vmem:[#allocation2 + $0x107] sm:$0xff] }
 0x1c4   : > { %v1087_v15 = vpop.f32.mrf.mxu1  ;;  %v1426_v11 = vpop.f32.mrf.mxu0 }
 0x1c5   : > { %v3174_v35 = vadd.f32 %v1420_v25, %v1308_v37  ;;  %1600 = vmatmul.f32.gmra.mxu2 %v648_v21  ;;  %v1088_v25 = vadd.f32 %v1087_v15, %v2917_v7  ;;  %v683_v21 = vld [vmem:[#allocation2 + $0x108] sm:$0xff]  ;;  %v716_v15 = vld [vmem:[#allocation2 + $0x111] sm:$0xff] }
 0x1c6   : > { %1713 = vmatmul.f32.gmra.mxu3 %v680_v55 }
 0x1c7   : > { %1490 = vmatmul.f32.gmra.mxu1 %v711_v12  ;;  %1829 = vmatmul.f32.gmra.mxu0 %v713_v43 }
 0x1c8   : > { %v1197_v27 = vpop.f32.mrf.mxu2 }
 0x1c9   : > { %v1198_v61 = vadd.f32 %v1197_v27, %v1085_v19  ;;  %v1310_v0 = vpop.f32.mrf.mxu3 }
 0x1cb   : > { %v1311_v48 = vadd.f32 %v1310_v0, %v1198_v61  ;;  %v652_v61 = vld [vmem:[#allocation2 + $0x10f] sm:$0xff] }
 0x1cc   : > { %v1090_v6 = vpop.f32.mrf.mxu1  ;;  %v1429_v8 = vpop.f32.mrf.mxu0 }
 0x1cd   : > { %v3177_v63 = vadd.f32 %v1423_v32, %v1311_v48  ;;  %1603 = vmatmul.f32.gmra.mxu2 %v649_v16  ;;  %v1091_v32 = vadd.f32 %v1090_v6, %v2931_v2  ;;  %v684_v16 = vld [vmem:[#allocation2 + $0x110] sm:$0xff] }
 0x1ce   : > { %1716 = vmatmul.f32.gmra.mxu3 %v681_v52  ;;  %v717_v6 = vld [vmem:[#allocation2 + $0x129] sm:$0xff] }
 0x1cf   : > { %1493 = vmatmul.f32.gmra.mxu1 %v712_v28  ;;  %1832 = vmatmul.f32.gmra.mxu0 %v714_v4 }
 0x1d0   : > { %v1200_v38 = vpop.f32.mrf.mxu2 }
 0x1d1   : > { %v1201_v12 = vadd.f32 %v1200_v38, %v1088_v25  ;;  %v1313_v54 = vpop.f32.mrf.mxu3 }
 0x1d3   : > { %v1314_v53 = vadd.f32 %v1313_v54, %v1201_v12  ;;  %v653_v12 = vld [vmem:[#allocation2 + $0x127] sm:$0xff] }
 0x1d4   : > { %v1093_v9 = vpop.f32.mrf.mxu1  ;;  %v1432_v50 = vpop.f32.mrf.mxu0 }
 0x1d5   : > { %v3180_v41 = vadd.f32 %v1426_v11, %v1314_v53  ;;  %1606 = vmatmul.f32.gmra.mxu2 %v650_v23  ;;  %v1094_v11 = vadd.f32 %v1093_v9, %v2948_v59  ;;  %v685_v23 = vld [vmem:[#allocation2 + $0x128] sm:$0xff]  ;;  %v718_v9 = vld [vmem:[#allocation2 + $0x131] sm:$0xff] }
 0x1d6   : > { %1719 = vmatmul.f32.gmra.mxu3 %v682_v30 }
 0x1d7   : > { %1496 = vmatmul.f32.gmra.mxu1 %v713_v43  ;;  %1835 = vmatmul.f32.gmra.mxu0 %v715_v46 }
 0x1d8   : > { %v1203_v7 = vpop.f32.mrf.mxu2 }
 0x1d9   : > { %v1204_v28 = vadd.f32 %v1203_v7, %v1091_v32  ;;  %v1316_v33 = vpop.f32.mrf.mxu3 }
 0x1db   : > { %v1317_v45 = vadd.f32 %v1316_v33, %v1204_v28  ;;  %v654_v28 = vld [vmem:[#allocation2 + $0x12f] sm:$0xff] }
 0x1dc   : > { %v1096_v37 = vpop.f32.mrf.mxu1  ;;  %v1435_v55 = vpop.f32.mrf.mxu0 }
 0x1dd   : > { %v3183_v19 = vadd.f32 %v1429_v8, %v1317_v45  ;;  %1609 = vmatmul.f32.gmra.mxu2 %v651_v18  ;;  %v1097_v8 = vadd.f32 %v1096_v37, %v2964_v56  ;;  %v686_v18 = vld [vmem:[#allocation2 + $0x130] sm:$0xff] }
 0x1de   : > { %1722 = vmatmul.f32.gmra.mxu3 %v683_v21  ;;  %v719_v37 = vld [vmem:[#allocation2 + $0x149] sm:$0xff] }
 0x1df   : > { %1499 = vmatmul.f32.gmra.mxu1 %v714_v4  ;;  %1838 = vmatmul.f32.gmra.mxu0 %v716_v15 }
 0x1e0   : > { %v1206_v2 = vpop.f32.mrf.mxu2 }
 0x1e1   : > { %v1207_v43 = vadd.f32 %v1206_v2, %v1094_v11  ;;  %v1319_v27 = vpop.f32.mrf.mxu3 }
 0x1e3   : > { %v1320_v0 = vadd.f32 %v1319_v27, %v1207_v43  ;;  %v655_v43 = vld [vmem:[#allocation2 + $0x147] sm:$0xff] }
 0x1e4   : > { %v1099_v48 = vpop.f32.mrf.mxu1  ;;  %v1438_v52 = vpop.f32.mrf.mxu0 }
 0x1e5   : > { %v3186_v25 = vadd.f32 %v1432_v50, %v1320_v0  ;;  %1612 = vmatmul.f32.gmra.mxu2 %v652_v61  ;;  %v1100_v50 = vadd.f32 %v1099_v48, %v2979_v22  ;;  %v687_v61 = vld [vmem:[#allocation2 + $0x148] sm:$0xff]  ;;  %v720_v48 = vld [vmem:[#allocation2 + $0x151] sm:$0xff] }
 0x1e6   : > { %1725 = vmatmul.f32.gmra.mxu3 %v684_v16 }
 0x1e7   : > { %1502 = vmatmul.f32.gmra.mxu1 %v715_v46  ;;  %1841 = vmatmul.f32.gmra.mxu0 %v717_v6 }
 0x1e8   : > { %v1209_v59 = vpop.f32.mrf.mxu2 }
 0x1e9   : > { %v1210_v4 = vadd.f32 %v1209_v59, %v1097_v8  ;;  %v1322_v38 = vpop.f32.mrf.mxu3 }
 0x1eb   : > { %v1323_v54 = vadd.f32 %v1322_v38, %v1210_v4  ;;  %v656_v4 = vld [vmem:[#allocation2 + $0x14f] sm:$0xff] }
 0x1ec   : > { %v1102_v53 = vpop.f32.mrf.mxu1  ;;  %v1441_v30 = vpop.f32.mrf.mxu0 }
 0x1ed   : > { %v3189_v32 = vadd.f32 %v1435_v55, %v1323_v54  ;;  %1615 = vmatmul.f32.gmra.mxu2 %v653_v12  ;;  %v1103_v55 = vadd.f32 %v1102_v53, %v2989_v49  ;;  %v688_v12 = vld [vmem:[#allocation2 + $0x150] sm:$0xff] }
 0x1ee   : > { %1728 = vmatmul.f32.gmra.mxu3 %v685_v23  ;;  %v721_v53 = vld [vmem:[#allocation2 + $0x169] sm:$0xff] }
 0x1ef   : > { %1505 = vmatmul.f32.gmra.mxu1 %v716_v15  ;;  %1844 = vmatmul.f32.gmra.mxu0 %v718_v9 }
 0x1f0   : > { %v1212_v56 = vpop.f32.mrf.mxu2 }
 0x1f1   : > { %v1213_v46 = vadd.f32 %v1212_v56, %v1100_v50  ;;  %v1325_v7 = vpop.f32.mrf.mxu3 }
 0x1f3   : > { %v1326_v33 = vadd.f32 %v1325_v7, %v1213_v46  ;;  %v657_v46 = vld [vmem:[#allocation2 + $0x167] sm:$0xff] }
 0x1f4   : > { %v1461_v45 = vpop.f32.mrf.mxu1  ;;  %v1800_v21 = vpop.f32.mrf.mxu0 }
 0x1f5   : > { %v3192_v11 = vadd.f32 %v1438_v52, %v1326_v33  ;;  %1618 = vmatmul.f32.gmra.mxu2 %v654_v28  ;;  %v1462_v52 = vadd.f32 %v1461_v45, %v3003_v14  ;;  %v689_v28 = vld [vmem:[#allocation2 + $0x168] sm:$0xff]  ;;  %v722_v45 = vld [vmem:[#allocation2 + $0x171] sm:$0xff] }
 0x1f6   : > { %1731 = vmatmul.f32.gmra.mxu3 %v686_v18 }
 0x1f7   : > { %1508 = vmatmul.f32.gmra.mxu1 %v717_v6  ;;  %1847 = vmatmul.f32.gmra.mxu0 %v719_v37 }
 0x1f8   : > { %v1215_v22 = vpop.f32.mrf.mxu2 }
 0x1f9   : > { %v1216_v15 = vadd.f32 %v1215_v22, %v1103_v55  ;;  %v1328_v2 = vpop.f32.mrf.mxu3 }
 0x1fb   : > { %v1329_v27 = vadd.f32 %v1328_v2, %v1216_v15 }
 0x1fc   : > { %v1464_v0 = vpop.f32.mrf.mxu1  ;;  %v1803_v16 = vpop.f32.mrf.mxu0 }
 0x1fd   : > { %v3195_v8 = vadd.f32 %v1441_v30, %v1329_v27  ;;  %1621 = vmatmul.f32.gmra.mxu2 %v655_v43  ;;  %v1465_v14 = vadd.f32 %v1464_v0, %v3011_v3 }
 0x1fe   : > { %1734 = vmatmul.f32.gmra.mxu3 %v687_v61  ;;  %v658_v61 = vld [vmem:[#allocation2 + $0x16f] sm:$0xff] }
 0x1ff   : > { %1511 = vmatmul.f32.gmra.mxu1 %v718_v9  ;;  %1850 = vmatmul.f32.gmra.mxu0 %v720_v48 }
 0x200   : > { %v1574_v49 = vpop.f32.mrf.mxu2 }
 0x201   : > { %v1575_v6 = vadd.f32 %v1574_v49, %v1462_v52  ;;  %v1687_v59 = vpop.f32.mrf.mxu3  ;;  %v690_v52 = vld [vmem:[#allocation2 + $0x170] sm:$0xff] }
 0x203   : > { %v1688_v38 = vadd.f32 %v1687_v59, %v1575_v6  ;;  %v723_v6 = vld [vmem:[#allocation2 + $0x189] sm:$0xff] }
 0x204   : > { %v1467_v54 = vpop.f32.mrf.mxu1  ;;  %v1806_v23 = vpop.f32.mrf.mxu0 }
 0x205   : > { %v1801_v30 = vadd.f32 %v1800_v21, %v1688_v38  ;;  %1624 = vmatmul.f32.gmra.mxu2 %v656_v4  ;;  %v1468_v21 = vadd.f32 %v1467_v54, %v3026_v5 }
 0x206   : > { %1737 = vmatmul.f32.gmra.mxu3 %v688_v12 }
 0x207   : > { %1896 = vst [vmem:[%s3203_s6] sm:$0xff] %v1801_v30  ;;  %1514 = vmatmul.f32.gmra.mxu1 %v719_v37  ;;  %1853 = vmatmul.f32.gmra.mxu0 %v721_v53  ;;  %v1965_v22 = vmul.f32 %v1801_v30, %v1801_v30 }
 0x208   : > { %v1577_v9 = vpop.f32.mrf.mxu2 }
 0x209   : > { %v1578_v50 = vadd.f32 %v1577_v9, %v1465_v14  ;;  %v1690_v56 = vpop.f32.mrf.mxu3  ;;  %v659_v14 = vld [vmem:[#allocation2 + $0x187] sm:$0xff] }
 0x20b   : > { %v1691_v7 = vadd.f32 %v1690_v56, %v1578_v50  ;;  %v691_v50 = vld [vmem:[#allocation2 + $0x188] sm:$0xff] }
 0x20c   : > { %v1470_v33 = vpop.f32.mrf.mxu1  ;;  %v1809_v18 = vpop.f32.mrf.mxu0 }
 0x20d   : > { %v1804_v55 = vadd.f32 %v1803_v16, %v1691_v7  ;;  %1627 = vmatmul.f32.gmra.mxu2 %v657_v46  ;;  %v1471_v5 = vadd.f32 %v1470_v33, %v3035_v13 }
 0x20e   : > { %1740 = vmatmul.f32.gmra.mxu3 %v689_v28 }
 0x20f   : > { %1897 = vst [vmem:[%s3203_s6 + $0x8] sm:$0xff] %v1804_v55  ;;  %v1928_v3 = vadd.f32 %v1804_v55, %v1801_v30  ;;  %v1966_v37 = vmul.f32 %v1804_v55, %v1804_v55  ;;  %1517 = vmatmul.f32.gmra.mxu1 %v720_v48  ;;  %1856 = vmatmul.f32.gmra.mxu0 %v722_v45 }
 0x210   : > { %v1580_v15 = vpop.f32.mrf.mxu2 }
 0x211   : > { %v1997_v2 = vadd.f32 %v1966_v37, %v1965_v22  ;;  %v1581_v43 = vadd.f32 %v1580_v15, %v1468_v21  ;;  %v1693_v27 = vpop.f32.mrf.mxu3  ;;  %v692_v15 = vld [vmem:[#allocation2 + $0x190] sm:$0xff] }
 0x213   : > { %v1694_v0 = vadd.f32 %v1693_v27, %v1581_v43 }
 0x214   : > { %v1473_v49 = vpop.f32.mrf.mxu1  ;;  %v1812_v16 = vpop.f32.mrf.mxu0 }
 0x215   : > { %v1807_v59 = vadd.f32 %v1806_v23, %v1694_v0  ;;  %1630 = vmatmul.f32.gmra.mxu2 %v658_v61  ;;  %v724_v23 = vld [vmem:[#allocation2 + $0x191] sm:$0xff]  ;;  %v1474_v13 = vadd.f32 %v1473_v49, %v3050_v17 }
 0x216   : > { %1743 = vmatmul.f32.gmra.mxu3 %v690_v52 }
 0x217   : > { %1898 = vst [vmem:[%s3203_s6 + $0x10] sm:$0xff] %v1807_v59  ;;  %v1929_v4 = vadd.f32 %v1928_v3, %v1807_v59  ;;  %v1967_v48 = vmul.f32 %v1807_v59, %v1807_v59  ;;  %1520 = vmatmul.f32.gmra.mxu1 %v721_v53  ;;  %1859 = vmatmul.f32.gmra.mxu0 %v723_v6  ;;  %v660_v3 = vld [vmem:[#allocation2 + $0x18f] sm:$0xff] }
 0x218   : > { %v1583_v38 = vpop.f32.mrf.mxu2 }
 0x219   : > { %v1998_v12 = vadd.f32 %v1997_v2, %v1967_v48  ;;  %v1584_v54 = vadd.f32 %v1583_v38, %v1471_v5  ;;  %v1696_v30 = vpop.f32.mrf.mxu3  ;;  %v661_v5 = vld [vmem:[#allocation2 + $0x1a7] sm:$0xff] }
 0x21a   : > { %v693_v48 = vld [vmem:[#allocation2 + $0x1a8] sm:$0xff] }
 0x21b   : > { %v1697_v9 = vadd.f32 %v1696_v30, %v1584_v54 }
 0x21c   : > { %v1476_v56 = vpop.f32.mrf.mxu1  ;;  %v1815_v46 = vpop.f32.mrf.mxu0 }
 0x21d   : > { %v1810_v7 = vadd.f32 %v1809_v18, %v1697_v9  ;;  %1633 = vmatmul.f32.gmra.mxu2 %v659_v14  ;;  %v725_v18 = vld [vmem:[#allocation2 + $0x1a9] sm:$0xff]  ;;  %v1477_v17 = vadd.f32 %v1476_v56, %v3058_v40 }
 0x21e   : > { %1746 = vmatmul.f32.gmra.mxu3 %v691_v50 }
 0x21f   : > { %1899 = vst [vmem:[%s3203_s6 + $0x18] sm:$0xff] %v1810_v7  ;;  %v1930_v28 = vadd.f32 %v1929_v4, %v1810_v7  ;;  %v1968_v53 = vmul.f32 %v1810_v7, %v1810_v7  ;;  %1523 = vmatmul.f32.gmra.mxu1 %v722_v45  ;;  %1862 = vmatmul.f32.gmra.mxu0 %v724_v23  ;;  %v662_v7 = vld [vmem:[#allocation2 + $0x1af] sm:$0xff] }
 0x220   : > { %v1586_v33 = vpop.f32.mrf.mxu2 }
 0x221   : > { %v1999_v55 = vadd.f32 %v1998_v12, %v1968_v53  ;;  %v1587_v21 = vadd.f32 %v1586_v33, %v1474_v13  ;;  %v1699_v22 = vpop.f32.mrf.mxu3 }
 0x223   : > { %v1700_v37 = vadd.f32 %v1699_v22, %v1587_v21 }
 0x224   : > { %v1479_v2 = vpop.f32.mrf.mxu1  ;;  %v1818_v43 = vpop.f32.mrf.mxu0 }
 0x225   : > { %v1813_v27 = vadd.f32 %v1812_v16, %v1700_v37  ;;  %1636 = vmatmul.f32.gmra.mxu2 %v660_v3  ;;  %v726_v16 = vld [vmem:[#allocation2 + $0x1b1] sm:$0xff]  ;;  %v1480_v40 = vadd.f32 %v1479_v2, %v3071_v42  ;;  %v663_v2 = vld [vmem:[#allocation2 + $0x1c7] sm:$0xff] }
 0x226   : > { %1749 = vmatmul.f32.gmra.mxu3 %v692_v15 }
 0x227   : > { %1900 = vst [vmem:[%s3203_s6 + $0x20] sm:$0xff] %v1813_v27  ;;  %v1931_v61 = vadd.f32 %v1930_v28, %v1813_v27  ;;  %v1969_v45 = vmul.f32 %v1813_v27, %v1813_v27  ;;  %1526 = vmatmul.f32.gmra.mxu1 %v723_v6  ;;  %1865 = vmatmul.f32.gmra.mxu0 %v725_v18  ;;  %v694_v28 = vld [vmem:[#allocation2 + $0x1b0] sm:$0xff] }
 0x228   : > { %v1589_v0 = vpop.f32.mrf.mxu2 }
 0x229   : > { %v2000_v52 = vadd.f32 %v1999_v55, %v1969_v45  ;;  %v1590_v49 = vadd.f32 %v1589_v0, %v1477_v17  ;;  %v1702_v59 = vpop.f32.mrf.mxu3  ;;  %v695_v17 = vld [vmem:[#allocation2 + $0x1c8] sm:$0xff] }
 0x22b   : > { %v1703_v4 = vadd.f32 %v1702_v59, %v1590_v49 }
 0x22c   : > { %v1482_v38 = vpop.f32.mrf.mxu1  ;;  %v1821_v12 = vpop.f32.mrf.mxu0 }
 0x22d   : > { %v1816_v54 = vadd.f32 %v1815_v46, %v1703_v4  ;;  %1639 = vmatmul.f32.gmra.mxu2 %v661_v5  ;;  %v727_v46 = vld [vmem:[#allocation2 + $0x1c9] sm:$0xff]  ;;  %v1483_v42 = vadd.f32 %v1482_v38, %v3077_v62 }
 0x22e   : > { %1752 = vmatmul.f32.gmra.mxu3 %v693_v48  ;;  %v664_v48 = vld [vmem:[#allocation2 + $0x1cf] sm:$0xff] }
 0x22f   : > { %1901 = vst [vmem:[%s3203_s6 + $0x28] sm:$0xff] %v1816_v54  ;;  %v1932_v30 = vadd.f32 %v1931_v61, %v1816_v54  ;;  %v1970_v6 = vmul.f32 %v1816_v54, %v1816_v54  ;;  %1529 = vmatmul.f32.gmra.mxu1 %v724_v23  ;;  %1868 = vmatmul.f32.gmra.mxu0 %v726_v16  ;;  %v696_v54 = vld [vmem:[#allocation2 + $0x1d0] sm:$0xff] }
 0x230   : > { %v1592_v14 = vpop.f32.mrf.mxu2 }
 0x231   : > { %v2001_v9 = vadd.f32 %v2000_v52, %v1970_v6  ;;  %v1593_v50 = vadd.f32 %v1592_v14, %v1480_v40  ;;  %v1705_v56 = vpop.f32.mrf.mxu3 }
 0x233   : > { %v1706_v13 = vadd.f32 %v1705_v56, %v1593_v50 }
 0x234   : > { %v1485_v53 = vpop.f32.mrf.mxu1  ;;  %v1824_v33 = vpop.f32.mrf.mxu0 }
 0x235   : > { %v1819_v55 = vadd.f32 %v1818_v43, %v1706_v13  ;;  %1642 = vmatmul.f32.gmra.mxu2 %v662_v7  ;;  %v728_v43 = vld [vmem:[#allocation2 + $0x1d1] sm:$0xff]  ;;  %v1486_v62 = vadd.f32 %v1485_v53, %v3098_v10  ;;  %v665_v13 = vld [vmem:[#allocation2 + $0x1e7] sm:$0xff] }
 0x236   : > { %1755 = vmatmul.f32.gmra.mxu3 %v694_v28  ;;  %v697_v53 = vld [vmem:[#allocation2 + $0x1e8] sm:$0xff] }
 0x237   : > { %1902 = vst [vmem:[%s3203_s6 + $0x30] sm:$0xff] %v1819_v55  ;;  %v1933_v21 = vadd.f32 %v1932_v30, %v1819_v55  ;;  %v1971_v23 = vmul.f32 %v1819_v55, %v1819_v55  ;;  %1532 = vmatmul.f32.gmra.mxu1 %v725_v18  ;;  %1871 = vmatmul.f32.gmra.mxu0 %v727_v46 }
 0x238   : > { %v1595_v22 = vpop.f32.mrf.mxu2 }
 0x239   : > { %v2002_v3 = vadd.f32 %v2001_v9, %v1971_v23  ;;  %v1596_v37 = vadd.f32 %v1595_v22, %v1483_v42  ;;  %v1708_v15 = vpop.f32.mrf.mxu3 }
 0x23b   : > { %v1709_v27 = vadd.f32 %v1708_v15, %v1596_v37 }
 0x23c   : > { %v1488_v61 = vpop.f32.mrf.mxu1  ;;  %v1827_v45 = vpop.f32.mrf.mxu0 }
 0x23d   : > { %v1822_v0 = vadd.f32 %v1821_v12, %v1709_v27  ;;  %1645 = vmatmul.f32.gmra.mxu2 %v663_v2  ;;  %v729_v12 = vld [vmem:[#allocation2 + $0x1e9] sm:$0xff]  ;;  %v1489_v10 = vadd.f32 %v1488_v61, %v3110_v20 }
 0x23e   : > { %1758 = vmatmul.f32.gmra.mxu3 %v695_v17  ;;  %v666_v2 = vld [vmem:[#allocation2 + $0x1ef] sm:$0xff] }
 0x23f   : > { %1903 = vst [vmem:[%s3203_s6 + $0x38] sm:$0xff] %v1822_v0  ;;  %v1934_v52 = vadd.f32 %v1933_v21, %v1822_v0  ;;  %v1972_v18 = vmul.f32 %v1822_v0, %v1822_v0  ;;  %1535 = vmatmul.f32.gmra.mxu1 %v726_v16  ;;  %1874 = vmatmul.f32.gmra.mxu0 %v728_v43  ;;  %v698_v17 = vld [vmem:[#allocation2 + $0x1f0] sm:$0xff] }
 0x240   : > { %v1598_v49 = vpop.f32.mrf.mxu2 }
 0x241   : > { %v2003_v59 = vadd.f32 %v2002_v3, %v1972_v18  ;;  %v1599_v5 = vadd.f32 %v1598_v49, %v1486_v62  ;;  %v1711_v4 = vpop.f32.mrf.mxu3 }
 0x243   : > { %v1712_v38 = vadd.f32 %v1711_v4, %v1599_v5  ;;  %v667_v4 = vld [vmem:[#allocation2 + $0x207] sm:$0xff] }
 0x244   : > { %v1491_v40 = vpop.f32.mrf.mxu1  ;;  %v1830_v30 = vpop.f32.mrf.mxu0 }
 0x245   : > { %v1825_v6 = vadd.f32 %v1824_v33, %v1712_v38  ;;  %1648 = vmatmul.f32.gmra.mxu2 %v664_v48  ;;  %v730_v33 = vld [vmem:[#allocation2 + $0x1f1] sm:$0xff]  ;;  %v1492_v20 = vadd.f32 %v1491_v40, %v3125_v60  ;;  %v699_v38 = vld [vmem:[#allocation2 + $0x208] sm:$0xff] }
 0x246   : > { %1761 = vmatmul.f32.gmra.mxu3 %v696_v54 }
 0x247   : > { %1904 = vst [vmem:[%s3203_s6 + $0x40] sm:$0xff] %v1825_v6  ;;  %v1935_v14 = vadd.f32 %v1934_v52, %v1825_v6  ;;  %v1973_v16 = vmul.f32 %v1825_v6, %v1825_v6  ;;  %1538 = vmatmul.f32.gmra.mxu1 %v727_v46  ;;  %1877 = vmatmul.f32.gmra.mxu0 %v729_v12 }
 0x248   : > { %v1601_v9 = vpop.f32.mrf.mxu2 }
 0x249   : > { %v2004_v50 = vadd.f32 %v2003_v59, %v1973_v16  ;;  %v1602_v56 = vadd.f32 %v1601_v9, %v1489_v10  ;;  %v1714_v7 = vpop.f32.mrf.mxu3 }
 0x24b   : > { %v1715_v28 = vadd.f32 %v1714_v7, %v1602_v56  ;;  %v668_v56 = vld [vmem:[#allocation2 + $0x20f] sm:$0xff] }
 0x24c   : > { %v1494_v55 = vpop.f32.mrf.mxu1  ;;  %v1833_v42 = vpop.f32.mrf.mxu0 }
 0x24d   : > { %v1828_v21 = vadd.f32 %v1827_v45, %v1715_v28  ;;  %1651 = vmatmul.f32.gmra.mxu2 %v665_v13  ;;  %v731_v45 = vld [vmem:[#allocation2 + $0x209] sm:$0xff]  ;;  %v1495_v60 = vadd.f32 %v1494_v55, %v3131_v44 }
 0x24e   : > { %1764 = vmatmul.f32.gmra.mxu3 %v697_v53  ;;  %v700_v13 = vld [vmem:[#allocation2 + $0x210] sm:$0xff] }
 0x24f   : > { %1905 = vst [vmem:[%s3203_s6 + $0x48] sm:$0xff] %v1828_v21  ;;  %v1936_v23 = vadd.f32 %v1935_v14, %v1828_v21  ;;  %v1974_v46 = vmul.f32 %v1828_v21, %v1828_v21  ;;  %1541 = vmatmul.f32.gmra.mxu1 %v728_v43  ;;  %1880 = vmatmul.f32.gmra.mxu0 %v730_v33  ;;  %v733_v55 = vld [vmem:[#allocation2 + $0x229] sm:$0xff] }
 0x250   : > { %v1604_v22 = vpop.f32.mrf.mxu2 }
 0x251   : > { %v2005_v3 = vadd.f32 %v2004_v50, %v1974_v46  ;;  %v1605_v37 = vadd.f32 %v1604_v22, %v1492_v20  ;;  %v1717_v15 = vpop.f32.mrf.mxu3 }
 0x253   : > { %v1718_v27 = vadd.f32 %v1717_v15, %v1605_v37 }
 0x254   : > { %v1497_v61 = vpop.f32.mrf.mxu1  ;;  %v1836_v0 = vpop.f32.mrf.mxu0 }
 0x255   : > { %v1831_v62 = vadd.f32 %v1830_v30, %v1718_v27  ;;  %1654 = vmatmul.f32.gmra.mxu2 %v666_v2  ;;  %v732_v30 = vld [vmem:[#allocation2 + $0x211] sm:$0xff]  ;;  %v1498_v44 = vadd.f32 %v1497_v61, %v3134_v34  ;;  %v2198_v61 = vld [vmem:[#allocation2 + $0x80] sm:$0xff] }
 0x256   : > { %1767 = vmatmul.f32.gmra.mxu3 %v698_v17  ;;  %v734_v27 = vld [vmem:[#allocation2 + $0x231] sm:$0xff] }
 0x257   : > { %1906 = vst [vmem:[%s3203_s6 + $0x50] sm:$0xff] %v1831_v62  ;;  %v1937_v52 = vadd.f32 %v1936_v23, %v1831_v62  ;;  %v1975_v43 = vmul.f32 %v1831_v62, %v1831_v62  ;;  %1544 = vmatmul.f32.gmra.mxu1 %v729_v12  ;;  %1883 = vmatmul.f32.gmra.mxu0 %v731_v45 }
 0x258   : > { %v1607_v18 = vpop.f32.mrf.mxu2 }
 0x259   : > { %v2006_v49 = vadd.f32 %v2005_v3, %v1975_v43  ;;  %v1608_v59 = vadd.f32 %v1607_v18, %v1495_v60  ;;  %v1720_v5 = vpop.f32.mrf.mxu3  ;;  %v669_v3 = vld [vmem:[#allocation2 + $0x227] sm:$0xff]  ;;  %v670_v18 = vld [vmem:[#allocation2 + $0x22f] sm:$0xff] }
 0x25b   : > { %v1721_v48 = vadd.f32 %v1720_v5, %v1608_v59 }
 0x25c   : > { %v1500_v54 = vpop.f32.mrf.mxu1  ;;  %v1839_v40 = vpop.f32.mrf.mxu0 }
 0x25d   : > { %v1834_v6 = vadd.f32 %v1833_v42, %v1721_v48  ;;  %1657 = vmatmul.f32.gmra.mxu2 %v667_v4  ;;  %v1501_v34 = vadd.f32 %v1500_v54, %v3139_v26 }
 0x25e   : > { %1770 = vmatmul.f32.gmra.mxu3 %v699_v38 }
 0x25f   : > { %1907 = vst [vmem:[%s3203_s6 + $0x58] sm:$0xff] %v1834_v6  ;;  %v1938_v10 = vadd.f32 %v1937_v52, %v1834_v6  ;;  %v1976_v12 = vmul.f32 %v1834_v6, %v1834_v6  ;;  %1547 = vmatmul.f32.gmra.mxu1 %v730_v33  ;;  %1886 = vmatmul.f32.gmra.mxu0 %v732_v30 }
 0x260   : > { %v1610_v14 = vpop.f32.mrf.mxu2 }
 0x261   : > { %v2007_v16 = vadd.f32 %v2006_v49, %v1976_v12  ;;  %v1611_v9 = vadd.f32 %v1610_v14, %v1498_v44  ;;  %v1723_v50 = vpop.f32.mrf.mxu3 }
 0x263   : > { %v1724_v7 = vadd.f32 %v1723_v50, %v1611_v9 }
 0x264   : > { %v1503_v28 = vpop.f32.mrf.mxu1  ;;  %v1842_v53 = vpop.f32.mrf.mxu0 }
 0x265   : > { %v1837_v42 = vadd.f32 %v1836_v0, %v1724_v7  ;;  %1660 = vmatmul.f32.gmra.mxu2 %v668_v56  ;;  %v1504_v26 = vadd.f32 %v1503_v28, %v3144_v39 }
 0x266   : > { %1773 = vmatmul.f32.gmra.mxu3 %v700_v13 }
 0x267   : > { %1908 = vst [vmem:[%s3203_s6 + $0x60] sm:$0xff] %v1837_v42  ;;  %v1939_v21 = vadd.f32 %v1938_v10, %v1837_v42  ;;  %v1977_v33 = vmul.f32 %v1837_v42, %v1837_v42  ;;  %1550 = vmatmul.f32.gmra.mxu1 %v731_v45  ;;  %1889 = vmatmul.f32.gmra.mxu0 %v733_v55 }
 0x268   : > { %v1613_v20 = vpop.f32.mrf.mxu2 }
 0x269   : > { %v2008_v23 = vadd.f32 %v2007_v16, %v1977_v33  ;;  %v1614_v46 = vadd.f32 %v1613_v20, %v1501_v34  ;;  %v1726_v22 = vpop.f32.mrf.mxu3 }
 0x26b   : > { %v1727_v37 = vadd.f32 %v1726_v22, %v1614_v46 }
 0x26c   : > { %v1506_v15 = vpop.f32.mrf.mxu1  ;;  %v1845_v2 = vpop.f32.mrf.mxu0 }
 0x26d   : > { %v1840_v17 = vadd.f32 %v1839_v40, %v1727_v37  ;;  %1663 = vmatmul.f32.gmra.mxu2 %v669_v3  ;;  %v1507_v39 = vadd.f32 %v1506_v15, %v3147_v24 }
 0x26e   : > { %1776 = vmatmul.f32.gmra.mxu3 %v2198_v61 }
 0x26f   : > { %1909 = vst [vmem:[%s3203_s6 + $0x68] sm:$0xff] %v1840_v17  ;;  %v1940_v0 = vadd.f32 %v1939_v21, %v1840_v17  ;;  %v1978_v45 = vmul.f32 %v1840_v17, %v1840_v17  ;;  %1553 = vmatmul.f32.gmra.mxu1 %v732_v30  ;;  %1892 = vmatmul.f32.gmra.mxu0 %v734_v27 }
 0x270   : > { %v1616_v62 = vpop.f32.mrf.mxu2 }
 0x271   : > { %v2009_v60 = vadd.f32 %v2008_v23, %v1978_v45  ;;  %v1617_v52 = vadd.f32 %v1616_v62, %v1504_v26  ;;  %v1729_v43 = vpop.f32.mrf.mxu3 }
 0x273   : > { %v1730_v49 = vadd.f32 %v1729_v43, %v1617_v52 }
 0x274   : > { %v1509_v59 = vpop.f32.mrf.mxu1  ;;  %v1848_v5 = vpop.f32.mrf.mxu0 }
 0x275   : > { %v1843_v4 = vadd.f32 %v1842_v53, %v1730_v49  ;;  %1666 = vmatmul.f32.gmra.mxu2 %v670_v18  ;;  %v1510_v16 = vadd.f32 %v1509_v59, %v3150_v58 }
 0x276   : > { %1779 = vmatmul.f32.gmra.mxu3 %v2198_v61 }
 0x277   : > { %1910 = vst [vmem:[%s3203_s6 + $0x70] sm:$0xff] %v1843_v4  ;;  %v1941_v48 = vadd.f32 %v1940_v0, %v1843_v4  ;;  %v1979_v38 = vmul.f32 %v1843_v4, %v1843_v4 }
 0x278   : > { %v1619_v54 = vpop.f32.mrf.mxu2 }
 0x279   : > { %v2010_v40 = vadd.f32 %v2009_v60, %v1979_v38  ;;  %v1620_v30 = vadd.f32 %v1619_v54, %v1507_v39  ;;  %v1732_v6 = vpop.f32.mrf.mxu3 }
 0x27b   : > { %v1733_v44 = vadd.f32 %v1732_v6, %v1620_v30 }
 0x27c   : > { %v1512_v10 = vpop.f32.mrf.mxu1  ;;  %v1851_v12 = vpop.f32.mrf.mxu0 }
 0x27d   : > { %v1846_v14 = vadd.f32 %v1845_v2, %v1733_v44  ;;  %v1513_v34 = vadd.f32 %v1512_v10, %v3153_v51 }
 0x27f   : > { %1911 = vst [vmem:[%s3203_s6 + $0x78] sm:$0xff] %v1846_v14  ;;  %v1942_v9 = vadd.f32 %v1941_v48, %v1846_v14  ;;  %v1980_v50 = vmul.f32 %v1846_v14, %v1846_v14 }
 0x280   : > { %v1622_v56 = vpop.f32.mrf.mxu2 }
 0x281   : > { %v2011_v7 = vadd.f32 %v2010_v40, %v1980_v50  ;;  %v1623_v24 = vadd.f32 %v1622_v56, %v1510_v16  ;;  %v1735_v13 = vpop.f32.mrf.mxu3 }
 0x283   : > { %v1736_v28 = vadd.f32 %v1735_v13, %v1623_v24 }
 0x284   : > { %v1515_v53 = vpop.f32.mrf.mxu1  ;;  %v1854_v55 = vpop.f32.mrf.mxu0 }
 0x285   : > { %v1849_v42 = vadd.f32 %v1848_v5, %v1736_v28  ;;  %v1516_v2 = vadd.f32 %v1515_v53, %v3156_v31 }
 0x287   : > { %1912 = vst [vmem:[%s3203_s6 + $0x80] sm:$0xff] %v1849_v42  ;;  %v1943_v21 = vadd.f32 %v1942_v9, %v1849_v42  ;;  %v1981_v33 = vmul.f32 %v1849_v42, %v1849_v42 }
 0x288   : > { %v1625_v20 = vpop.f32.mrf.mxu2 }
 0x289   : > { %v2012_v23 = vadd.f32 %v2011_v7, %v1981_v33  ;;  %v1626_v58 = vadd.f32 %v1625_v20, %v1513_v34  ;;  %v1738_v46 = vpop.f32.mrf.mxu3 }
 0x28b   : > { %v1739_v22 = vadd.f32 %v1738_v46, %v1626_v58 }
 0x28c   : > { %v1518_v3 = vpop.f32.mrf.mxu1  ;;  %v1857_v37 = vpop.f32.mrf.mxu0 }
 0x28d   : > { %v1852_v15 = vadd.f32 %v1851_v12, %v1739_v22  ;;  %v1519_v43 = vadd.f32 %v1518_v3, %v3159_v1 }
 0x28f   : > { %1913 = vst [vmem:[%s3203_s6 + $0x88] sm:$0xff] %v1852_v15  ;;  %v1944_v27 = vadd.f32 %v1943_v21, %v1852_v15  ;;  %v1982_v17 = vmul.f32 %v1852_v15, %v1852_v15 }
 0x290   : > { %v1628_v61 = vpop.f32.mrf.mxu2 }
 0x291   : > { %v2013_v26 = vadd.f32 %v2012_v23, %v1982_v17  ;;  %v1629_v51 = vadd.f32 %v1628_v61, %v1516_v2  ;;  %v1741_v0 = vpop.f32.mrf.mxu3 }
 0x293   : > { %v1742_v45 = vadd.f32 %v1741_v0, %v1629_v51 }
 0x294   : > { %v1521_v62 = vpop.f32.mrf.mxu1  ;;  %v1860_v60 = vpop.f32.mrf.mxu0 }
 0x295   : > { %v1855_v52 = vadd.f32 %v1854_v55, %v1742_v45  ;;  %v1522_v40 = vadd.f32 %v1521_v62, %v3162_v47 }
 0x297   : > { %1914 = vst [vmem:[%s3203_s6 + $0x90] sm:$0xff] %v1855_v52  ;;  %v1945_v18 = vadd.f32 %v1944_v27, %v1855_v52  ;;  %v1983_v49 = vmul.f32 %v1855_v52, %v1855_v52 }
 0x298   : > { %v1631_v59 = vpop.f32.mrf.mxu2 }
 0x299   : > { %v2014_v5 = vadd.f32 %v2013_v26, %v1983_v49  ;;  %v1632_v31 = vadd.f32 %v1631_v59, %v1519_v43  ;;  %v1744_v4 = vpop.f32.mrf.mxu3 }
 0x29b   : > { %v1745_v39 = vadd.f32 %v1744_v4, %v1632_v31 }
 0x29c   : > { %v1524_v48 = vpop.f32.mrf.mxu1  ;;  %v1863_v38 = vpop.f32.mrf.mxu0 }
 0x29d   : > { %v1858_v54 = vadd.f32 %v1857_v37, %v1745_v39  ;;  %v1525_v56 = vadd.f32 %v1524_v48, %v3165_v57 }
 0x29f   : > { %1915 = vst [vmem:[%s3203_s6 + $0x98] sm:$0xff] %v1858_v54  ;;  %v1946_v30 = vadd.f32 %v1945_v18, %v1858_v54  ;;  %v1984_v6 = vmul.f32 %v1858_v54, %v1858_v54 }
 0x2a0   : > { %v1634_v44 = vpop.f32.mrf.mxu2 }
 0x2a1   : > { %v2015_v10 = vadd.f32 %v2014_v5, %v1984_v6  ;;  %v1635_v1 = vadd.f32 %v1634_v44, %v1522_v40  ;;  %v1747_v12 = vpop.f32.mrf.mxu3 }
 0x2a3   : > { %v1748_v14 = vadd.f32 %v1747_v12, %v1635_v1 }
 0x2a4   : > { %v1527_v16 = vpop.f32.mrf.mxu1  ;;  %v1866_v9 = vpop.f32.mrf.mxu0 }
 0x2a5   : > { %v1861_v50 = vadd.f32 %v1860_v60, %v1748_v14  ;;  %v1528_v33 = vadd.f32 %v1527_v16, %v3168_v36 }
 0x2a7   : > { %1916 = vst [vmem:[%s3203_s6 + $0xa0] sm:$0xff] %v1861_v50  ;;  %v1947_v7 = vadd.f32 %v1946_v30, %v1861_v50  ;;  %v1985_v24 = vmul.f32 %v1861_v50, %v1861_v50 }
 0x2a8   : > { %v1637_v13 = vpop.f32.mrf.mxu2 }
 0x2a9   : > { %v2016_v28 = vadd.f32 %v2015_v10, %v1985_v24  ;;  %v1638_v47 = vadd.f32 %v1637_v13, %v1525_v56  ;;  %v1750_v53 = vpop.f32.mrf.mxu3 }
 0x2ab   : > { %v1751_v55 = vadd.f32 %v1750_v53, %v1638_v47 }
 0x2ac   : > { %v1530_v42 = vpop.f32.mrf.mxu1  ;;  %v1869_v34 = vpop.f32.mrf.mxu0 }
 0x2ad   : > { %v1864_v21 = vadd.f32 %v1863_v38, %v1751_v55  ;;  %v1531_v27 = vadd.f32 %v1530_v42, %v3171_v29 }
 0x2af   : > { %1917 = vst [vmem:[%s3203_s6 + $0xa8] sm:$0xff] %v1864_v21  ;;  %v1948_v20 = vadd.f32 %v1947_v7, %v1864_v21  ;;  %v1986_v23 = vmul.f32 %v1864_v21, %v1864_v21 }
 0x2b0   : > { %v1640_v58 = vpop.f32.mrf.mxu2 }
 0x2b1   : > { %v2017_v46 = vadd.f32 %v2016_v28, %v1986_v23  ;;  %v1641_v57 = vadd.f32 %v1640_v58, %v1528_v33  ;;  %v1753_v22 = vpop.f32.mrf.mxu3 }
 0x2b3   : > { %v1754_v3 = vadd.f32 %v1753_v22, %v1641_v57 }
 0x2b4   : > { %v1533_v37 = vpop.f32.mrf.mxu1  ;;  %v1872_v15 = vpop.f32.mrf.mxu0 }
 0x2b5   : > { %v1867_v2 = vadd.f32 %v1866_v9, %v1754_v3  ;;  %v1534_v43 = vadd.f32 %v1533_v37, %v3174_v35 }
 0x2b7   : > { %1918 = vst [vmem:[%s3203_s6 + $0xb0] sm:$0xff] %v1867_v2  ;;  %v1949_v17 = vadd.f32 %v1948_v20, %v1867_v2  ;;  %v1987_v61 = vmul.f32 %v1867_v2, %v1867_v2 }
 0x2b8   : > { %v1643_v26 = vpop.f32.mrf.mxu2 }
 0x2b9   : > { %v2018_v51 = vadd.f32 %v2017_v46, %v1987_v61  ;;  %v1644_v36 = vadd.f32 %v1643_v26, %v1531_v27  ;;  %v1756_v0 = vpop.f32.mrf.mxu3 }
 0x2bb   : > { %v1757_v45 = vadd.f32 %v1756_v0, %v1644_v36 }
 0x2bc   : > { %v1536_v62 = vpop.f32.mrf.mxu1  ;;  %v1875_v52 = vpop.f32.mrf.mxu0 }
 0x2bd   : > { %v1870_v60 = vadd.f32 %v1869_v34, %v1757_v45  ;;  %v1537_v38 = vadd.f32 %v1536_v62, %v3177_v63 }
 0x2bf   : > { %1919 = vst [vmem:[%s3203_s6 + $0xb8] sm:$0xff] %v1870_v60  ;;  %v1950_v18 = vadd.f32 %v1949_v17, %v1870_v60  ;;  %v1988_v49 = vmul.f32 %v1870_v60, %v1870_v60 }
 0x2c0   : > { %v1646_v59 = vpop.f32.mrf.mxu2 }
 0x2c1   : > { %v2019_v5 = vadd.f32 %v2018_v51, %v1988_v49  ;;  %v1647_v29 = vadd.f32 %v1646_v59, %v1534_v43  ;;  %v1759_v31 = vpop.f32.mrf.mxu3 }
 0x2c3   : > { %v1760_v4 = vadd.f32 %v1759_v31, %v1647_v29 }
 0x2c4   : > { %v1539_v39 = vpop.f32.mrf.mxu1  ;;  %v1878_v6 = vpop.f32.mrf.mxu0 }
 0x2c5   : > { %v1873_v48 = vadd.f32 %v1872_v15, %v1760_v4  ;;  %v1540_v16 = vadd.f32 %v1539_v39, %v3180_v41 }
 0x2c7   : > { %1920 = vst [vmem:[%s3203_s6 + $0xc0] sm:$0xff] %v1873_v48  ;;  %v1951_v54 = vadd.f32 %v1950_v18, %v1873_v48  ;;  %v1989_v40 = vmul.f32 %v1873_v48, %v1873_v48 }
 0x2c8   : > { %v1649_v30 = vpop.f32.mrf.mxu2 }
 0x2c9   : > { %v2020_v44 = vadd.f32 %v2019_v5, %v1989_v40  ;;  %v1650_v35 = vadd.f32 %v1649_v30, %v1537_v38  ;;  %v1762_v10 = vpop.f32.mrf.mxu3 }
 0x2cb   : > { %v1763_v1 = vadd.f32 %v1762_v10, %v1650_v35 }
 0x2cc   : > { %v1542_v12 = vpop.f32.mrf.mxu1  ;;  %v1881_v13 = vpop.f32.mrf.mxu0 }
 0x2cd   : > { %v1876_v14 = vadd.f32 %v1875_v52, %v1763_v1  ;;  %v1543_v55 = vadd.f32 %v1542_v12, %v3183_v19 }
 0x2cf   : > { %1921 = vst [vmem:[%s3203_s6 + $0xc8] sm:$0xff] %v1876_v14  ;;  %v1952_v9 = vadd.f32 %v1951_v54, %v1876_v14  ;;  %v1990_v50 = vmul.f32 %v1876_v14, %v1876_v14 }
 0x2d0   : > { %v1652_v56 = vpop.f32.mrf.mxu2 }
 0x2d1   : > { %v2021_v7 = vadd.f32 %v2020_v44, %v1990_v50  ;;  %v1653_v63 = vadd.f32 %v1652_v56, %v1540_v16  ;;  %v1765_v24 = vpop.f32.mrf.mxu3 }
 0x2d3   : > { %v1766_v28 = vadd.f32 %v1765_v24, %v1653_v63 }
 0x2d4   : > { %v1545_v53 = vpop.f32.mrf.mxu1  ;;  %v1884_v58 = vpop.f32.mrf.mxu0 }
 0x2d5   : > { %v1879_v47 = vadd.f32 %v1878_v6, %v1766_v28  ;;  %v1546_v57 = vadd.f32 %v1545_v53, %v3186_v25 }
 0x2d7   : > { %1922 = vst [vmem:[%s3203_s6 + $0xd0] sm:$0xff] %v1879_v47  ;;  %v1953_v42 = vadd.f32 %v1952_v9, %v1879_v47  ;;  %v1991_v34 = vmul.f32 %v1879_v47, %v1879_v47 }
 0x2d8   : > { %v1655_v21 = vpop.f32.mrf.mxu2 }
 0x2d9   : > { %v2022_v33 = vadd.f32 %v2021_v7, %v1991_v34  ;;  %v1656_v41 = vadd.f32 %v1655_v21, %v1543_v55  ;;  %v1768_v20 = vpop.f32.mrf.mxu3 }
 0x2db   : > { %v1769_v23 = vadd.f32 %v1768_v20, %v1656_v41 }
 0x2dc   : > { %v1548_v15 = vpop.f32.mrf.mxu1  ;;  %v1887_v26 = vpop.f32.mrf.mxu0 }
 0x2dd   : > { %v1882_v46 = vadd.f32 %v1881_v13, %v1769_v23  ;;  %v1549_v51 = vadd.f32 %v1548_v15, %v3189_v32 }
 0x2df   : > { %1923 = vst [vmem:[%s3203_s6 + $0xd8] sm:$0xff] %v1882_v46  ;;  %v1954_v22 = vadd.f32 %v1953_v42, %v1882_v46  ;;  %v1992_v3 = vmul.f32 %v1882_v46, %v1882_v46 }
 0x2e0   : > { %v1658_v37 = vpop.f32.mrf.mxu2 }
 0x2e1   : > { %v2023_v2 = vadd.f32 %v2022_v33, %v1992_v3  ;;  %v1659_v19 = vadd.f32 %v1658_v37, %v1546_v57  ;;  %v1771_v27 = vpop.f32.mrf.mxu3 }
 0x2e3   : > { %v1772_v17 = vadd.f32 %v1771_v27, %v1659_v19 }
 0x2e4   : > { %v1551_v52 = vpop.f32.mrf.mxu1  ;;  %v1890_v31 = vpop.f32.mrf.mxu0 }
 0x2e5   : > { %v1885_v61 = vadd.f32 %v1884_v58, %v1772_v17  ;;  %v1552_v49 = vadd.f32 %v1551_v52, %v3192_v11 }
 0x2e7   : > { %1924 = vst [vmem:[%s3203_s6 + $0xe0] sm:$0xff] %v1885_v61  ;;  %v1955_v36 = vadd.f32 %v1954_v22, %v1885_v61  ;;  %v1993_v0 = vmul.f32 %v1885_v61, %v1885_v61 }
 0x2e8   : > { %v1661_v45 = vpop.f32.mrf.mxu2 }
 0x2e9   : > { %v2024_v62 = vadd.f32 %v2023_v2, %v1993_v0  ;;  %v1662_v25 = vadd.f32 %v1661_v45, %v1549_v51  ;;  %v1774_v60 = vpop.f32.mrf.mxu3 }
 0x2eb   : > { %v1775_v43 = vadd.f32 %v1774_v60, %v1662_v25 }
 0x2ec   : > { %v1554_v38 = vpop.f32.mrf.mxu1  ;;  %v1893_v1 = vpop.f32.mrf.mxu0 }
 0x2ed   : > { %v1888_v18 = vadd.f32 %v1887_v26, %v1775_v43  ;;  %v1555_v40 = vadd.f32 %v1554_v38, %v3195_v8 }
 0x2ef   : > { %1925 = vst [vmem:[%s3203_s6 + $0xe8] sm:$0xff] %v1888_v18  ;;  %v1956_v59 = vadd.f32 %v1955_v36, %v1888_v18  ;;  %v1994_v5 = vmul.f32 %v1888_v18, %v1888_v18 }
 0x2f0   : > { %v1664_v29 = vpop.f32.mrf.mxu2 }
 0x2f1   : > { %v2025_v4 = vadd.f32 %v2024_v62, %v1994_v5  ;;  %v1665_v32 = vadd.f32 %v1664_v29, %v1552_v49  ;;  %v1777_v39 = vpop.f32.mrf.mxu3 }
 0x2f3   : > { %v1778_v48 = vadd.f32 %v1777_v39, %v1665_v32 }
 0x2f5   : > { %v1891_v54 = vadd.f32 %v1890_v31, %v1778_v48 }
 0x2f7   : > { %1926 = vst [vmem:[%s3203_s6 + $0xf0] sm:$0xff] %v1891_v54  ;;  %v1957_v30 = vadd.f32 %v1956_v59, %v1891_v54  ;;  %v1995_v6 = vmul.f32 %v1891_v54, %v1891_v54 }
 0x2f8   : > { %v1667_v44 = vpop.f32.mrf.mxu2 }
 0x2f9   : > { %v2026_v35 = vadd.f32 %v2025_v4, %v1995_v6  ;;  %v1668_v11 = vadd.f32 %v1667_v44, %v1555_v40  ;;  %v1780_v10 = vpop.f32.mrf.mxu3 }
 0x2fb   : > { %v1781_v12 = vadd.f32 %v1780_v10, %v1668_v11 }
 0x2fd   : > { %v1894_v14 = vadd.f32 %v1893_v1, %v1781_v12 }
 0x2ff   : > { %1927 = vst [vmem:[%s3203_s6 + $0xf8] sm:$0xff] %v1894_v14  ;;  %v1958_v16 = vadd.f32 %v1957_v30, %v1894_v14  ;;  %v1996_v9 = vmul.f32 %v1894_v14, %v1894_v14 }
 0x301   : > { %v1959_v50 = vrot.slane %v1958_v16, 4  ;;  %v2027_v56 = vadd.f32 %v2026_v35, %v1996_v9 }
 0x303   : > { %v1960_v7 = vadd.f32 %v1959_v50, %v1958_v16  ;;  %v2028_v63 = vrot.slane %v2027_v56, 4 }
 0x305   : > { %v1961_v24 = vrot.slane %v1960_v7, 2  ;;  %v2029_v8 = vadd.f32 %v2028_v63, %v2027_v56 }
 0x307   : > { %v1962_v13 = vadd.f32 %v1961_v24, %v1960_v7  ;;  %v2030_v28 = vrot.slane %v2029_v8, 2 }
 0x309   : > { %v1963_v47 = vrot.slane %v1962_v13, 1  ;;  %v2031_v53 = vadd.f32 %v2030_v28, %v2029_v8 }
 0x30b   : > { %v2032_v55 = vrot.slane %v2031_v53, 1  ;;  %v1964_v42 = vadd.f32 %v1963_v47, %v1962_v13 }
 0x30d   : > { %v2033_v34 = vadd.f32 %v2032_v55, %v2031_v53 }
 0x30f   : > { %v2035_v21 = vsel %vm2034_vm0, %v1964_v42, %v2033_v34 }
 0x310   : > { %2036 = vst [vmem:[%s208_s9] sm:$0x3] %v2035_v21 }
 0x311 PF: > { %s15_s15 = sadd.s32 1, %s2205_s15  }
 0x312   : > { %p12_p4 = scmp.ge.s32.totalorder %s15_s15, 4  }
 0x314   :  { %14 = sbr.rel (!%p12_p4) target bundleno = 1 (0x1), region = 76 }

</bundles_post_ra>
